<compile_context>
chip_gen: v6e
topology: v6e:2x2x1
jax: 0.10.0
libtpu: 0.0.40
codegen_flags: <defaults>
</compile_context>

<pallas_src>
import math
from functools import partial

import jax
import jax.numpy as jnp
from jax import lax
from jax.experimental import pallas as pl
from jax.experimental.pallas import tpu as pltpu


CFG = dict(
    vocab_size=128,
    type_vocab_size=2,
    max_position=64,
    hidden=128,          # scaled-down stand-in for BERT's 768
    num_layers=2,        # scaled-down stand-in for BERT's 12
    num_heads=4,
    intermediate=256,
    seq=16,
    batch=2,
)

HEAD_PAD = 128           # lane-dense padding for the 3 scalar heads
LN_EPS = 1e-12
NEG_INF = -1e9           # cross-(head,batch) block mask; exp underflows to 0


# ----------------------------------------------------------------------------
# Fused Pallas kernel: one grid step == `b_fold` batch rows of the full model
# ----------------------------------------------------------------------------

def _qa_fused_kernel(
    emb_ref, bias_ref,
    emb_ln_g_ref, emb_ln_b_ref,
    qkv_w_ref, qkv_b_ref,
    o_w_ref, o_b_ref,
    ln1_g_ref, ln1_b_ref,
    ff1_w_ref, ff1_b_ref,
    ff2_w_ref, ff2_b_ref,
    ln2_g_ref, ln2_b_ref,
    heads_w_ref, heads_b_ref,
    out_ref,
    *, num_layers, num_heads, eps,
):
    R, H = emb_ref.shape          # R = residual rows in this grid step (b_fold*S)
    Dh = H // num_heads
    P = num_heads * R             # packed-attention rows (head-major, then row)
    NC = 3 * num_heads            # Dh-wide column chunks of the fused QKV output

    # (P, P) additive bias: per-key attention mask on same-(head,batch) blocks,
    # NEG_INF across blocks.  Built once in XLA -> zero in-kernel broadcasts.
    bias = bias_ref[0]

    def layernorm(x, g, b):
        mu = jnp.mean(x, axis=-1, keepdims=True)
        xc = x - mu
        var = jnp.mean(xc * xc, axis=-1, keepdims=True)
        return xc * lax.rsqrt(var + eps) * g + b

    def mm(x_f32, w_bf16):
        # bf16 MXU operands, f32 accumulation.
        # TODO(synk): on v6e/v7x the residual stream could stay bf16 between
        # sub-ops (f32 only inside LN stats / softmax); kept f32 so the same
        # kernel is also safe on v5e's f32-only VPU/EUP.
        return jnp.dot(x_f32.astype(jnp.bfloat16), w_bf16,
                       preferred_element_type=jnp.float32)

    # Embedding LayerNorm; the residual stream stays f32 in VMEM/vregs.
    x = layernorm(emb_ref[...].astype(jnp.float32),
                  emb_ln_g_ref[...], emb_ln_b_ref[...])          # (R, H)

    for l in range(num_layers):
        # ---- fused QKV projection (1/sqrt(Dh) pre-folded into Q weights) ----
        qkv = mm(x, qkv_w_ref[l]) + qkv_b_ref[l]                 # (R, 3H) f32

        # ---- head packing: head lanes -> sublanes, ONE concat + ONE cast ----
        # (H=128 => Dh=32 lane slices cannot land on vreg boundaries; a single
        #  sublane concat replaces the old per-head matmul/softmax/concat.)
        packed = jnp.concatenate(
            [qkv[:, c * Dh:(c + 1) * Dh] for c in range(NC)], axis=0)  # (3P,Dh)
        packed = packed.astype(jnp.bfloat16)     # single hoisted bf16 cast
        q_p = packed[0 * P:1 * P]                # (P, Dh), rows = (head, b, s)
        k_p = packed[1 * P:2 * P]
        v_p = packed[2 * P:3 * P]

        # ---- ONE QK^T, ONE softmax, ONE P.V for ALL heads & batch rows ----
        s = jnp.einsum('qd,kd->qk', q_p, k_p,
                       preferred_element_type=jnp.float32) + bias       # (P, P)
        s = s - jnp.max(s, axis=-1, keepdims=True)
        p = jnp.exp(s)
        p = p * pl.reciprocal(jnp.sum(p, axis=-1, keepdims=True), approx=True)
        ctx_p = jnp.dot(p.astype(jnp.bfloat16), v_p,
                        preferred_element_type=jnp.float32)             # (P, Dh)
        ctx_b16 = ctx_p.astype(jnp.bfloat16)

        # ---- output projection folded over heads (no lane concat of ctx) ----
        o_w_l = o_w_ref[l]                                              # (H, H)
        attn_out = jnp.dot(ctx_b16[0:R], o_w_l[0:Dh, :],
                           preferred_element_type=jnp.float32)
        for h in range(1, num_heads):
            attn_out = attn_out + jnp.dot(
                ctx_b16[h * R:(h + 1) * R], o_w_l[h * Dh:(h + 1) * Dh, :],
                preferred_element_type=jnp.float32)
        attn_out = attn_out + o_b_ref[l]

        # ---- residual + LayerNorm (fused) ----
        x = layernorm(x + attn_out, ln1_g_ref[l], ln1_b_ref[l])

        # ---- FFN + residual + LayerNorm (fused) ----
        # TODO(synk): HF BERT uses exact erf GELU; tanh approximation is used
        # here to guarantee Mosaic lowering.
        hmid = jax.nn.gelu(mm(x, ff1_w_ref[l]) + ff1_b_ref[l],
                           approximate=True)                            # (R, I)
        ff = mm(hmid, ff2_w_ref[l]) + ff2_b_ref[l]
        x = layernorm(x + ff, ln2_g_ref[l], ln2_b_ref[l])

    # ---- three Linear(H,1) heads packed into one lane-dense matmul ----
    out = mm(x, heads_w_ref[...]) + heads_b_ref[...]                    # (R, 128)
    out_ref[...] = out.astype(out_ref.dtype)


# ----------------------------------------------------------------------------
# Parameters (synthetic, deterministic) — packed / stacked for the fused kernel
# ----------------------------------------------------------------------------

def init_params(key, cfg):
    H, I = cfg["hidden"], cfg["intermediate"]
    L, NH = cfg["num_layers"], cfg["num_heads"]
    Dh = H // NH
    scale = 1.0 / math.sqrt(Dh)
    std = 0.02
    keys = iter(jax.random.split(key, 32))

    def w(shape):
        return jax.random.normal(next(keys), shape, jnp.float32) * std

    q_w, k_w, v_w = w((L, H, H)), w((L, H, H)), w((L, H, H))
    qkv_w = jnp.concatenate([q_w * scale, k_w, v_w], axis=2)   # scale folded
    qkv_b = jnp.zeros((L, 1, 3 * H), jnp.float32)

    heads_w3 = w((H, 3))                                       # cls/start/end
    heads_w = jnp.zeros((H, HEAD_PAD), jnp.float32).at[:, :3].set(heads_w3)

    return {
        "word_emb": w((cfg["vocab_size"], H)),
        "pos_emb": w((cfg["max_position"], H)),
        "type_emb": w((cfg["type_vocab_size"], H)),
        "emb_ln_g": jnp.ones((1, H), jnp.float32),
        "emb_ln_b": jnp.zeros((1, H), jnp.float32),
        # stacked per-layer weights; matmul operands stored in bf16
        "qkv_w": qkv_w.astype(jnp.bfloat16),
        "qkv_b": qkv_b,
        "o_w": w((L, H, H)).astype(jnp.bfloat16),
        "o_b": jnp.zeros((L, 1, H), jnp.float32),
        "ln1_g": jnp.ones((L, 1, H), jnp.float32),
        "ln1_b": jnp.zeros((L, 1, H), jnp.float32),
        "ff1_w": w((L, H, I)).astype(jnp.bfloat16),
        "ff1_b": jnp.zeros((L, 1, I), jnp.float32),
        "ff2_w": w((L, I, H)).astype(jnp.bfloat16),
        "ff2_b": jnp.zeros((L, 1, H), jnp.float32),
        "ln2_g": jnp.ones((L, 1, H), jnp.float32),
        "ln2_b": jnp.zeros((L, 1, H), jnp.float32),
        "heads_w": heads_w.astype(jnp.bfloat16),
        "heads_b": jnp.zeros((1, HEAD_PAD), jnp.float32),
    }


def _cost_numbers(cfg, inputs, steps, rows, prows):
    H, I, L = cfg["hidden"], cfg["intermediate"], cfg["num_layers"]
    B, S, NH = cfg["batch"], cfg["seq"], cfg["num_heads"]
    Dh = H // NH
    per_step_layer = (2 * rows * H * 3 * H          # fused QKV projection
                      + 2 * prows * prows * Dh * 2  # packed QK^T + P.V
                      + 2 * rows * H * H            # output projection
                      + 2 * rows * H * I * 2)       # FFN up + down
    flops = steps * (L * per_step_layer + 2 * rows * H * HEAD_PAD)
    transcendentals = steps * (L * (prows * prows + rows * I)
                               + rows * (2 * L + 1))
    bytes_accessed = (sum(int(a.size) * a.dtype.itemsize for a in inputs)
                      + B * S * HEAD_PAD * 4)
    return flops, transcendentals, bytes_accessed


def _batch_fold(batch):
    """Batch rows folded into one grid step.

    v5e/v6e have a single TensorCore, so a batch grid is a serial loop paying
    per-step overhead for little work -> fold the whole batch (grid=(1,)).
    v7x has 2 TensorCores -> keep 2 'parallel' grid steps so both stay busy.
    """
    try:
        kind = jax.devices()[0].device_kind.lower()
    except Exception:  # pragma: no cover - defensive
        kind = ""
    if "v7" in kind and batch % 2 == 0:
        return batch // 2
    return batch


# ----------------------------------------------------------------------------
# Forward
# ----------------------------------------------------------------------------

def qa_model_forward(params, input_ids, attention_mask=None,
                     token_type_ids=None, cfg=CFG):
    B, S, H = cfg["batch"], cfg["seq"], cfg["hidden"]
    L, NH = cfg["num_layers"], cfg["num_heads"]
    if attention_mask is None:
        attention_mask = jnp.ones((B, S), jnp.float32)
    if token_type_ids is None:
        token_type_ids = jnp.zeros((B, S), jnp.int32)

    # --- embeddings (gathers are XLA glue; everything else is one kernel) ---
    emb = (jnp.take(params["word_emb"], input_ids, axis=0)
           + params["pos_emb"][None, :S, :]
           + jnp.take(params["type_emb"], token_type_ids, axis=0))
    emb2d = emb.reshape(B * S, H)

    # --- batch folding + packed-head block-diagonal additive attention bias ---
    b_fold = _batch_fold(B)
    steps = B // b_fold
    R = b_fold * S                 # residual-stream rows per grid step
    P = NH * R                     # packed-attention rows per grid step

    row = jnp.arange(P)
    blk = row // S                                 # (head, batch-in-fold) block
    bb = (row // S) % b_fold                       # key batch within the fold
    sj = row % S                                   # key position
    same = blk[None, :, None] == blk[None, None, :]                  # (1, P, P)
    am = attention_mask.astype(jnp.float32).reshape(steps, b_fold, S)
    key_bias = (1.0 - am[:, bb, sj]) * -10000.0                      # (steps, P)
    big_bias = jnp.where(same, key_bias[:, None, :],
                         jnp.float32(NEG_INF))                       # (steps,P,P)

    inputs = (
        emb2d, big_bias,
        params["emb_ln_g"], params["emb_ln_b"],
        params["qkv_w"], params["qkv_b"],
        params["o_w"], params["o_b"],
        params["ln1_g"], params["ln1_b"],
        params["ff1_w"], params["ff1_b"],
        params["ff2_w"], params["ff2_b"],
        params["ln2_g"], params["ln2_b"],
        params["heads_w"], params["heads_b"],
    )

    def replicated(shape):
        nd = len(shape)
        return pl.BlockSpec(shape, lambda g, _nd=nd: (0,) * _nd)

    # TODO(synk): at real BERT-base size (H=768, L=12) the stacked weights
    # (~170 MB bf16) exceed VMEM (64 MiB on v7x): add a layer axis to the grid
    # ("arbitrary"), index per-layer weight blocks in the index_maps, keep the
    # residual x in persistent VMEM scratch, and raise vmem_limit_bytes.
    in_specs = [
        pl.BlockSpec((R, H), lambda g: (g, 0)),        # residual rows of step g
        pl.BlockSpec((1, P, P), lambda g: (g, 0, 0)),  # packed-head bias, step g
    ] + [replicated(a.shape) for a in inputs[2:]]      # weights: full blocks

    flops, transcend, bytes_acc = _cost_numbers(cfg, inputs, steps, R, P)

    out = pl.pallas_call(
        partial(_qa_fused_kernel, num_layers=L, num_heads=NH, eps=LN_EPS),
        out_shape=jax.ShapeDtypeStruct((B * S, HEAD_PAD), jnp.float32),
        grid=(steps,),
        in_specs=in_specs,
        out_specs=pl.BlockSpec((R, HEAD_PAD), lambda g: (g, 0)),
        compiler_params=pltpu.CompilerParams(
            dimension_semantics=("parallel",)),        # v7x: both TCs busy
        cost_estimate=pl.CostEstimate(
            flops=flops, transcendentals=transcend, bytes_accessed=bytes_acc),
    )(*inputs)

    out3 = out.reshape(B, S, HEAD_PAD)
    cls = out3[:, 0, 0:1]          # Linear(H,1)(x[:,0,:])        -> (B, 1)
    start = out3[:, :, 1]          # Linear(H,1)(x).squeeze(2)    -> (B, S)
    end = out3[:, :, 2]            # Linear(H,1)(x).squeeze(2)    -> (B, S)
    return cls, start, end


# ----------------------------------------------------------------------------
# Pure-JAX f32 reference (same synthetic params / folded-scale conventions)
# ----------------------------------------------------------------------------

def qa_model_reference(params, input_ids, attention_mask=None,
                       token_type_ids=None, cfg=CFG):
    B, S, H = cfg["batch"], cfg["seq"], cfg["hidden"]
    L, NH = cfg["num_layers"], cfg["num_heads"]
    Dh = H // NH
    if attention_mask is None:
        attention_mask = jnp.ones((B, S), jnp.float32)
    if token_type_ids is None:
        token_type_ids = jnp.zeros((B, S), jnp.int32)

    def ln(x, g, b):
        mu = x.mean(-1, keepdims=True)
        var = ((x - mu) ** 2).mean(-1, keepdims=True)
        return (x - mu) / jnp.sqrt(var + LN_EPS) * g + b

    emb = (jnp.take(params["word_emb"], input_ids, axis=0)
           + params["pos_emb"][None, :S, :]
           + jnp.take(params["type_emb"], token_type_ids, axis=0))
    x = ln(emb, params["emb_ln_g"], params["emb_ln_b"])
    bias = ((1.0 - attention_mask.astype(jnp.float32))
            * -10000.0)[:, None, None, :]                     # (B,1,1,S)

    for l in range(L):
        qkv = x @ params["qkv_w"][l].astype(jnp.float32) + params["qkv_b"][l]
        q, k, v = qkv[..., :H], qkv[..., H:2 * H], qkv[..., 2 * H:]
        q = q.reshape(B, S, NH, Dh).transpose(0, 2, 1, 3)
        k = k.reshape(B, S, NH, Dh).transpose(0, 2, 1, 3)
        v = v.reshape(B, S, NH, Dh).transpose(0, 2, 1, 3)
        s = jnp.einsum('bhqd,bhkd->bhqk', q, k) + bias        # scale pre-folded
        p = jax.nn.softmax(s, axis=-1)
        ctx = jnp.einsum('bhqk,bhkd->bhqd', p, v)
        ctx = ctx.transpose(0, 2, 1, 3).reshape(B, S, H)
        attn = ctx @ params["o_w"][l].astype(jnp.float32) + params["o_b"][l]
        x = ln(x + attn, params["ln1_g"][l], params["ln1_b"][l])
        hmid = jax.nn.gelu(
            x @ params["ff1_w"][l].astype(jnp.float32) + params["ff1_b"][l],
            approximate=True)
        ff = hmid @ params["ff2_w"][l].astype(jnp.float32) + params["ff2_b"][l]
        x = ln(x + ff, params["ln2_g"][l], params["ln2_b"][l])

    out = x @ params["heads_w"].astype(jnp.float32) + params["heads_b"]
    return out[:, 0, 0:1], out[:, :, 1], out[:, :, 2]


# ----------------------------------------------------------------------------
# Main
# ----------------------------------------------------------------------------

if __name__ == "__main__":
    key = jax.random.PRNGKey(0)
    pkey, dkey = jax.random.split(key)
    params = init_params(pkey, CFG)

    B, S = CFG["batch"], CFG["seq"]
    input_ids = jax.random.randint(dkey, (B, S), 0, CFG["vocab_size"],
                                   dtype=jnp.int32)
    attention_mask = jnp.ones((B, S), jnp.float32)
    token_type_ids = jnp.zeros((B, S), jnp.int32)

    fwd = jax.jit(qa_model_forward)
    cls, start, end = fwd(params, input_ids, attention_mask, token_type_ids)
    jax.block_until_ready((cls, start, end))

    assert cls.shape == (B, 1)
    assert start.shape == (B, S)
    assert end.shape == (B, S)

    # Loose-tolerance check against a pure-JAX f32 reference (bf16 MXU +
    # approx reciprocal cause small deviations; this guards against gross
    # head-packing / masking bugs, not bit-exactness).
    rcls, rstart, rend = qa_model_reference(params, input_ids,
                                            attention_mask, token_type_ids)
    for got, ref in ((cls, rcls), (start, rstart), (end, rend)):
        assert float(jnp.max(jnp.abs(got - ref))) < 0.05

    # TODO(synk): pretrained 'bert-base-chinese' weights cannot be loaded here;
    # parameters are synthetic (deterministic PRNG) at a scaled-down config.
    print("KERNEL_OK")
</pallas_src>

<mosaic_0001>
module attributes {stable_mosaic.version = 11 : i64} {
  func.func @_qa_fused_kernel(%arg0: i32, %arg1: memref<32x128xf32, #tpu.memory_space<vmem>>, %arg2: memref<1x128x128xf32, #tpu.memory_space<vmem>>, %arg3: memref<1x128xf32, #tpu.memory_space<vmem>>, %arg4: memref<1x128xf32, #tpu.memory_space<vmem>>, %arg5: memref<2x128x384xbf16, #tpu.memory_space<vmem>>, %arg6: memref<2x1x384xf32, #tpu.memory_space<vmem>>, %arg7: memref<2x128x128xbf16, #tpu.memory_space<vmem>>, %arg8: memref<2x1x128xf32, #tpu.memory_space<vmem>>, %arg9: memref<2x1x128xf32, #tpu.memory_space<vmem>>, %arg10: memref<2x1x128xf32, #tpu.memory_space<vmem>>, %arg11: memref<2x128x256xbf16, #tpu.memory_space<vmem>>, %arg12: memref<2x1x256xf32, #tpu.memory_space<vmem>>, %arg13: memref<2x256x128xbf16, #tpu.memory_space<vmem>>, %arg14: memref<2x1x128xf32, #tpu.memory_space<vmem>>, %arg15: memref<2x1x128xf32, #tpu.memory_space<vmem>>, %arg16: memref<2x1x128xf32, #tpu.memory_space<vmem>>, %arg17: memref<128x128xbf16, #tpu.memory_space<vmem>>, %arg18: memref<1x128xf32, #tpu.memory_space<vmem>>, %arg19: memref<32x128xf32, #tpu.memory_space<vmem>>) attributes {dimension_semantics = [#tpu.dimension_semantics<parallel>], iteration_bounds = array<i64: 1>, scalar_prefetch = 0 : i64, scratch_operands = 0 : i64, tpu.core_type = #tpu.core_type<tc>, window_params = [{transform_indices = @transform_0, window_bounds = array<i64: 32, 128>}, {transform_indices = @transform_1, window_bounds = array<i64: 1, 128, 128>}, {pipeline_mode = #tpu.pipeline_mode<synchronous>, transform_indices = @transform_2, window_bounds = array<i64: 1, 128>}, {pipeline_mode = #tpu.pipeline_mode<synchronous>, transform_indices = @transform_3, window_bounds = array<i64: 1, 128>}, {pipeline_mode = #tpu.pipeline_mode<synchronous>, transform_indices = @transform_4, window_bounds = array<i64: 2, 128, 384>}, {pipeline_mode = #tpu.pipeline_mode<synchronous>, transform_indices = @transform_5, window_bounds = array<i64: 2, 1, 384>}, {pipeline_mode = #tpu.pipeline_mode<synchronous>, transform_indices = @transform_6, window_bounds = array<i64: 2, 128, 128>}, {pipeline_mode = #tpu.pipeline_mode<synchronous>, transform_indices = @transform_7, window_bounds = array<i64: 2, 1, 128>}, {pipeline_mode = #tpu.pipeline_mode<synchronous>, transform_indices = @transform_8, window_bounds = array<i64: 2, 1, 128>}, {pipeline_mode = #tpu.pipeline_mode<synchronous>, transform_indices = @transform_9, window_bounds = array<i64: 2, 1, 128>}, {pipeline_mode = #tpu.pipeline_mode<synchronous>, transform_indices = @transform_10, window_bounds = array<i64: 2, 128, 256>}, {pipeline_mode = #tpu.pipeline_mode<synchronous>, transform_indices = @transform_11, window_bounds = array<i64: 2, 1, 256>}, {pipeline_mode = #tpu.pipeline_mode<synchronous>, transform_indices = @transform_12, window_bounds = array<i64: 2, 256, 128>}, {pipeline_mode = #tpu.pipeline_mode<synchronous>, transform_indices = @transform_13, window_bounds = array<i64: 2, 1, 128>}, {pipeline_mode = #tpu.pipeline_mode<synchronous>, transform_indices = @transform_14, window_bounds = array<i64: 2, 1, 128>}, {pipeline_mode = #tpu.pipeline_mode<synchronous>, transform_indices = @transform_15, window_bounds = array<i64: 2, 1, 128>}, {pipeline_mode = #tpu.pipeline_mode<synchronous>, transform_indices = @transform_16, window_bounds = array<i64: 128, 128>}, {pipeline_mode = #tpu.pipeline_mode<synchronous>, transform_indices = @transform_17, window_bounds = array<i64: 1, 128>}, {transform_indices = @transform_18, window_bounds = array<i64: 32, 128>}]} {
    %c0 = arith.constant 0 : index
    %c0_0 = arith.constant 0 : index
    %c0_1 = arith.constant 0 : index
    %0 = vector.load %arg2[%c0, %c0_0, %c0_1] : memref<1x128x128xf32, #tpu.memory_space<vmem>>, vector<1x128x128xf32>
    %1 = vector.shape_cast %0 : vector<1x128x128xf32> to vector<128x128xf32>
    %c0_2 = arith.constant 0 : index
    %c0_3 = arith.constant 0 : index
    %2 = vector.load %arg1[%c0_2, %c0_3] : memref<32x128xf32, #tpu.memory_space<vmem>>, vector<32x128xf32>
    %c0_4 = arith.constant 0 : index
    %c0_5 = arith.constant 0 : index
    %3 = vector.load %arg3[%c0_4, %c0_5] : memref<1x128xf32, #tpu.memory_space<vmem>>, vector<1x128xf32>
    %c0_6 = arith.constant 0 : index
    %c0_7 = arith.constant 0 : index
    %4 = vector.load %arg4[%c0_6, %c0_7] : memref<1x128xf32, #tpu.memory_space<vmem>>, vector<1x128xf32>
    %cst = arith.constant dense<0.000000e+00> : vector<32xf32>
    %5 = vector.multi_reduction <add>, %2, %cst [1] : vector<32x128xf32> to vector<32xf32>
    %6 = vector.shape_cast %5 : vector<32xf32> to vector<32x1xf32>
    %cst_8 = arith.constant 1.280000e+02 : f32
    %7 = vector.broadcast %cst_8 : f32 to vector<32x1xf32>
    %8 = arith.divf %6, %7 : vector<32x1xf32>
    %9 = vector.broadcast %8 : vector<32x1xf32> to vector<32x128xf32>
    %10 = arith.subf %2, %9 : vector<32x128xf32>
    %11 = arith.mulf %10, %10 : vector<32x128xf32>
    %cst_9 = arith.constant dense<0.000000e+00> : vector<32xf32>
    %12 = vector.multi_reduction <add>, %11, %cst_9 [1] : vector<32x128xf32> to vector<32xf32>
    %13 = vector.shape_cast %12 : vector<32xf32> to vector<32x1xf32>
    %cst_10 = arith.constant 1.280000e+02 : f32
    %14 = vector.broadcast %cst_10 : f32 to vector<32x1xf32>
    %15 = arith.divf %13, %14 : vector<32x1xf32>
    %cst_11 = arith.constant 9.99999996E-13 : f32
    %16 = vector.broadcast %cst_11 : f32 to vector<32x1xf32>
    %17 = arith.addf %15, %16 : vector<32x1xf32>
    %18 = math.rsqrt %17 : vector<32x1xf32>
    %19 = vector.broadcast %18 : vector<32x1xf32> to vector<32x128xf32>
    %20 = arith.mulf %10, %19 : vector<32x128xf32>
    %21 = vector.broadcast %3 : vector<1x128xf32> to vector<32x128xf32>
    %22 = arith.mulf %20, %21 : vector<32x128xf32>
    %23 = vector.broadcast %4 : vector<1x128xf32> to vector<32x128xf32>
    %24 = arith.addf %22, %23 : vector<32x128xf32>
    %c0_12 = arith.constant 0 : index
    %c0_13 = arith.constant 0 : index
    %c0_14 = arith.constant 0 : index
    %25 = vector.load %arg5[%c0_12, %c0_13, %c0_14] : memref<2x128x384xbf16, #tpu.memory_space<vmem>>, vector<1x128x384xbf16>
    %26 = vector.shape_cast %25 : vector<1x128x384xbf16> to vector<128x384xbf16>
    %27 = arith.truncf %24 : vector<32x128xf32> to vector<32x128xbf16>
    %cst_15 = arith.constant dense<0.000000e+00> : vector<32x384xf32>
    %28 = tpu.matmul %27, %26, %cst_15 {dimension_numbers = #tpu.dot_dimension_numbers<[1], [0], [0], [1], [0, 0, 1, 1], [], []>} : vector<32x128xbf16>, vector<128x384xbf16>, vector<32x384xf32> -> vector<32x384xf32>
    %c0_16 = arith.constant 0 : index
    %c0_17 = arith.constant 0 : index
    %c0_18 = arith.constant 0 : index
    %29 = vector.load %arg6[%c0_16, %c0_17, %c0_18] : memref<2x1x384xf32, #tpu.memory_space<vmem>>, vector<1x1x384xf32>
    %30 = vector.shape_cast %29 : vector<1x1x384xf32> to vector<1x384xf32>
    %31 = vector.broadcast %30 : vector<1x384xf32> to vector<32x384xf32>
    %32 = arith.addf %28, %31 : vector<32x384xf32>
    %33 = vector.extract_strided_slice %32 {offsets = [0, 0], sizes = [32, 32], strides = [1, 1]} : vector<32x384xf32> to vector<32x32xf32>
    %34 = vector.extract_strided_slice %32 {offsets = [0, 32], sizes = [32, 32], strides = [1, 1]} : vector<32x384xf32> to vector<32x32xf32>
    %35 = vector.extract_strided_slice %32 {offsets = [0, 64], sizes = [32, 32], strides = [1, 1]} : vector<32x384xf32> to vector<32x32xf32>
    %36 = vector.extract_strided_slice %32 {offsets = [0, 96], sizes = [32, 32], strides = [1, 1]} : vector<32x384xf32> to vector<32x32xf32>
    %37 = vector.extract_strided_slice %32 {offsets = [0, 128], sizes = [32, 32], strides = [1, 1]} : vector<32x384xf32> to vector<32x32xf32>
    %38 = vector.extract_strided_slice %32 {offsets = [0, 160], sizes = [32, 32], strides = [1, 1]} : vector<32x384xf32> to vector<32x32xf32>
    %39 = vector.extract_strided_slice %32 {offsets = [0, 192], sizes = [32, 32], strides = [1, 1]} : vector<32x384xf32> to vector<32x32xf32>
    %40 = vector.extract_strided_slice %32 {offsets = [0, 224], sizes = [32, 32], strides = [1, 1]} : vector<32x384xf32> to vector<32x32xf32>
    %41 = vector.extract_strided_slice %32 {offsets = [0, 256], sizes = [32, 32], strides = [1, 1]} : vector<32x384xf32> to vector<32x32xf32>
    %42 = vector.extract_strided_slice %32 {offsets = [0, 288], sizes = [32, 32], strides = [1, 1]} : vector<32x384xf32> to vector<32x32xf32>
    %43 = vector.extract_strided_slice %32 {offsets = [0, 320], sizes = [32, 32], strides = [1, 1]} : vector<32x384xf32> to vector<32x32xf32>
    %44 = vector.extract_strided_slice %32 {offsets = [0, 352], sizes = [32, 32], strides = [1, 1]} : vector<32x384xf32> to vector<32x32xf32>
    %45 = tpu.concatenate %33, %34, %35, %36, %37, %38, %39, %40, %41, %42, %43, %44 in 0 : vector<32x32xf32>, vector<32x32xf32>, vector<32x32xf32>, vector<32x32xf32>, vector<32x32xf32>, vector<32x32xf32>, vector<32x32xf32>, vector<32x32xf32>, vector<32x32xf32>, vector<32x32xf32>, vector<32x32xf32>, vector<32x32xf32> -> vector<384x32xf32>
    %46 = arith.truncf %45 : vector<384x32xf32> to vector<384x32xbf16>
    %47 = vector.extract_strided_slice %46 {offsets = [0, 0], sizes = [128, 32], strides = [1, 1]} : vector<384x32xbf16> to vector<128x32xbf16>
    %48 = vector.extract_strided_slice %46 {offsets = [128, 0], sizes = [128, 32], strides = [1, 1]} : vector<384x32xbf16> to vector<128x32xbf16>
    %49 = vector.extract_strided_slice %46 {offsets = [256, 0], sizes = [128, 32], strides = [1, 1]} : vector<384x32xbf16> to vector<128x32xbf16>
    "tpu.trace_start"() <{level = 10 : i32, message = "qd,kd->qk"}> : () -> ()
    %cst_19 = arith.constant dense<0.000000e+00> : vector<128x128xf32>
    %50 = tpu.matmul %47, %48, %cst_19 {dimension_numbers = #tpu.dot_dimension_numbers<[1], [1], [0], [0], [0, 0, 1, 0], [], []>} : vector<128x32xbf16>, vector<128x32xbf16>, vector<128x128xf32> -> vector<128x128xf32>
    "tpu.trace_stop"() : () -> ()
    %51 = arith.addf %50, %1 : vector<128x128xf32>
    %cst_20 = arith.constant dense<0xFF800000> : vector<128xf32>
    %52 = vector.multi_reduction <maximumf>, %51, %cst_20 [1] : vector<128x128xf32> to vector<128xf32>
    %53 = vector.shape_cast %52 : vector<128xf32> to vector<128x1xf32>
    %54 = vector.broadcast %53 : vector<128x1xf32> to vector<128x128xf32>
    %55 = arith.subf %51, %54 : vector<128x128xf32>
    %56 = math.exp %55 : vector<128x128xf32>
    %cst_21 = arith.constant dense<0.000000e+00> : vector<128xf32>
    %57 = vector.multi_reduction <add>, %56, %cst_21 [1] : vector<128x128xf32> to vector<128xf32>
    %58 = vector.shape_cast %57 : vector<128xf32> to vector<128x1xf32>
    %59 = tpu.reciprocal %58 {approx = true} : vector<128x1xf32> -> vector<128x1xf32>
    %60 = vector.broadcast %59 : vector<128x1xf32> to vector<128x128xf32>
    %61 = arith.mulf %56, %60 : vector<128x128xf32>
    %62 = arith.truncf %61 : vector<128x128xf32> to vector<128x128xbf16>
    %cst_22 = arith.constant dense<0.000000e+00> : vector<128x32xf32>
    %63 = tpu.matmul %62, %49, %cst_22 {dimension_numbers = #tpu.dot_dimension_numbers<[1], [0], [0], [1], [0, 0, 1, 1], [], []>} : vector<128x128xbf16>, vector<128x32xbf16>, vector<128x32xf32> -> vector<128x32xf32>
    %64 = arith.truncf %63 : vector<128x32xf32> to vector<128x32xbf16>
    %c0_23 = arith.constant 0 : index
    %c0_24 = arith.constant 0 : index
    %c0_25 = arith.constant 0 : index
    %65 = vector.load %arg7[%c0_23, %c0_24, %c0_25] : memref<2x128x128xbf16, #tpu.memory_space<vmem>>, vector<1x128x128xbf16>
    %66 = vector.shape_cast %65 : vector<1x128x128xbf16> to vector<128x128xbf16>
    %67 = vector.extract_strided_slice %64 {offsets = [0, 0], sizes = [32, 32], strides = [1, 1]} : vector<128x32xbf16> to vector<32x32xbf16>
    %68 = vector.extract_strided_slice %66 {offsets = [0, 0], sizes = [32, 128], strides = [1, 1]} : vector<128x128xbf16> to vector<32x128xbf16>
    %cst_26 = arith.constant dense<0.000000e+00> : vector<32x128xf32>
    %69 = tpu.matmul %67, %68, %cst_26 {dimension_numbers = #tpu.dot_dimension_numbers<[1], [0], [0], [1], [0, 0, 1, 1], [], []>} : vector<32x32xbf16>, vector<32x128xbf16>, vector<32x128xf32> -> vector<32x128xf32>
    %70 = vector.extract_strided_slice %64 {offsets = [32, 0], sizes = [32, 32], strides = [1, 1]} : vector<128x32xbf16> to vector<32x32xbf16>
    %71 = vector.extract_strided_slice %66 {offsets = [32, 0], sizes = [32, 128], strides = [1, 1]} : vector<128x128xbf16> to vector<32x128xbf16>
    %cst_27 = arith.constant dense<0.000000e+00> : vector<32x128xf32>
    %72 = tpu.matmul %70, %71, %cst_27 {dimension_numbers = #tpu.dot_dimension_numbers<[1], [0], [0], [1], [0, 0, 1, 1], [], []>} : vector<32x32xbf16>, vector<32x128xbf16>, vector<32x128xf32> -> vector<32x128xf32>
    %73 = arith.addf %69, %72 : vector<32x128xf32>
    %74 = vector.extract_strided_slice %64 {offsets = [64, 0], sizes = [32, 32], strides = [1, 1]} : vector<128x32xbf16> to vector<32x32xbf16>
    %75 = vector.extract_strided_slice %66 {offsets = [64, 0], sizes = [32, 128], strides = [1, 1]} : vector<128x128xbf16> to vector<32x128xbf16>
    %cst_28 = arith.constant dense<0.000000e+00> : vector<32x128xf32>
    %76 = tpu.matmul %74, %75, %cst_28 {dimension_numbers = #tpu.dot_dimension_numbers<[1], [0], [0], [1], [0, 0, 1, 1], [], []>} : vector<32x32xbf16>, vector<32x128xbf16>, vector<32x128xf32> -> vector<32x128xf32>
    %77 = arith.addf %73, %76 : vector<32x128xf32>
    %78 = vector.extract_strided_slice %64 {offsets = [96, 0], sizes = [32, 32], strides = [1, 1]} : vector<128x32xbf16> to vector<32x32xbf16>
    %79 = vector.extract_strided_slice %66 {offsets = [96, 0], sizes = [32, 128], strides = [1, 1]} : vector<128x128xbf16> to vector<32x128xbf16>
    %cst_29 = arith.constant dense<0.000000e+00> : vector<32x128xf32>
    %80 = tpu.matmul %78, %79, %cst_29 {dimension_numbers = #tpu.dot_dimension_numbers<[1], [0], [0], [1], [0, 0, 1, 1], [], []>} : vector<32x32xbf16>, vector<32x128xbf16>, vector<32x128xf32> -> vector<32x128xf32>
    %81 = arith.addf %77, %80 : vector<32x128xf32>
    %c0_30 = arith.constant 0 : index
    %c0_31 = arith.constant 0 : index
    %c0_32 = arith.constant 0 : index
    %82 = vector.load %arg8[%c0_30, %c0_31, %c0_32] : memref<2x1x128xf32, #tpu.memory_space<vmem>>, vector<1x1x128xf32>
    %83 = vector.shape_cast %82 : vector<1x1x128xf32> to vector<1x128xf32>
    %84 = vector.broadcast %83 : vector<1x128xf32> to vector<32x128xf32>
    %85 = arith.addf %81, %84 : vector<32x128xf32>
    %86 = arith.addf %24, %85 : vector<32x128xf32>
    %c0_33 = arith.constant 0 : index
    %c0_34 = arith.constant 0 : index
    %c0_35 = arith.constant 0 : index
    %87 = vector.load %arg9[%c0_33, %c0_34, %c0_35] : memref<2x1x128xf32, #tpu.memory_space<vmem>>, vector<1x1x128xf32>
    %88 = vector.shape_cast %87 : vector<1x1x128xf32> to vector<1x128xf32>
    %c0_36 = arith.constant 0 : index
    %c0_37 = arith.constant 0 : index
    %c0_38 = arith.constant 0 : index
    %89 = vector.load %arg10[%c0_36, %c0_37, %c0_38] : memref<2x1x128xf32, #tpu.memory_space<vmem>>, vector<1x1x128xf32>
    %90 = vector.shape_cast %89 : vector<1x1x128xf32> to vector<1x128xf32>
    %cst_39 = arith.constant dense<0.000000e+00> : vector<32xf32>
    %91 = vector.multi_reduction <add>, %86, %cst_39 [1] : vector<32x128xf32> to vector<32xf32>
    %92 = vector.shape_cast %91 : vector<32xf32> to vector<32x1xf32>
    %cst_40 = arith.constant 1.280000e+02 : f32
    %93 = vector.broadcast %cst_40 : f32 to vector<32x1xf32>
    %94 = arith.divf %92, %93 : vector<32x1xf32>
    %95 = vector.broadcast %94 : vector<32x1xf32> to vector<32x128xf32>
    %96 = arith.subf %86, %95 : vector<32x128xf32>
    %97 = arith.mulf %96, %96 : vector<32x128xf32>
    %cst_41 = arith.constant dense<0.000000e+00> : vector<32xf32>
    %98 = vector.multi_reduction <add>, %97, %cst_41 [1] : vector<32x128xf32> to vector<32xf32>
    %99 = vector.shape_cast %98 : vector<32xf32> to vector<32x1xf32>
    %cst_42 = arith.constant 1.280000e+02 : f32
    %100 = vector.broadcast %cst_42 : f32 to vector<32x1xf32>
    %101 = arith.divf %99, %100 : vector<32x1xf32>
    %cst_43 = arith.constant 9.99999996E-13 : f32
    %102 = vector.broadcast %cst_43 : f32 to vector<32x1xf32>
    %103 = arith.addf %101, %102 : vector<32x1xf32>
    %104 = math.rsqrt %103 : vector<32x1xf32>
    %105 = vector.broadcast %104 : vector<32x1xf32> to vector<32x128xf32>
    %106 = arith.mulf %96, %105 : vector<32x128xf32>
    %107 = vector.broadcast %88 : vector<1x128xf32> to vector<32x128xf32>
    %108 = arith.mulf %106, %107 : vector<32x128xf32>
    %109 = vector.broadcast %90 : vector<1x128xf32> to vector<32x128xf32>
    %110 = arith.addf %108, %109 : vector<32x128xf32>
    %c0_44 = arith.constant 0 : index
    %c0_45 = arith.constant 0 : index
    %c0_46 = arith.constant 0 : index
    %111 = vector.load %arg11[%c0_44, %c0_45, %c0_46] : memref<2x128x256xbf16, #tpu.memory_space<vmem>>, vector<1x128x256xbf16>
    %112 = vector.shape_cast %111 : vector<1x128x256xbf16> to vector<128x256xbf16>
    %113 = arith.truncf %110 : vector<32x128xf32> to vector<32x128xbf16>
    %cst_47 = arith.constant dense<0.000000e+00> : vector<32x256xf32>
    %114 = tpu.matmul %113, %112, %cst_47 {dimension_numbers = #tpu.dot_dimension_numbers<[1], [0], [0], [1], [0, 0, 1, 1], [], []>} : vector<32x128xbf16>, vector<128x256xbf16>, vector<32x256xf32> -> vector<32x256xf32>
    %c0_48 = arith.constant 0 : index
    %c0_49 = arith.constant 0 : index
    %c0_50 = arith.constant 0 : index
    %115 = vector.load %arg12[%c0_48, %c0_49, %c0_50] : memref<2x1x256xf32, #tpu.memory_space<vmem>>, vector<1x1x256xf32>
    %116 = vector.shape_cast %115 : vector<1x1x256xf32> to vector<1x256xf32>
    %117 = vector.broadcast %116 : vector<1x256xf32> to vector<32x256xf32>
    %118 = arith.addf %114, %117 : vector<32x256xf32>
    %119 = arith.mulf %118, %118 : vector<32x256xf32>
    %120 = arith.mulf %118, %119 : vector<32x256xf32>
    %cst_51 = arith.constant 4.471500e-02 : f32
    %121 = vector.broadcast %cst_51 : f32 to vector<32x256xf32>
    %122 = arith.mulf %121, %120 : vector<32x256xf32>
    %123 = arith.addf %118, %122 : vector<32x256xf32>
    %cst_52 = arith.constant 0.797884583 : f32
    %124 = vector.broadcast %cst_52 : f32 to vector<32x256xf32>
    %125 = arith.mulf %124, %123 : vector<32x256xf32>
    %126 = math.tanh %125 : vector<32x256xf32>
    %cst_53 = arith.constant 1.000000e+00 : f32
    %127 = vector.broadcast %cst_53 : f32 to vector<32x256xf32>
    %128 = arith.addf %127, %126 : vector<32x256xf32>
    %cst_54 = arith.constant 5.000000e-01 : f32
    %129 = vector.broadcast %cst_54 : f32 to vector<32x256xf32>
    %130 = arith.mulf %129, %128 : vector<32x256xf32>
    %131 = arith.mulf %118, %130 : vector<32x256xf32>
    %c0_55 = arith.constant 0 : index
    %c0_56 = arith.constant 0 : index
    %c0_57 = arith.constant 0 : index
    %132 = vector.load %arg13[%c0_55, %c0_56, %c0_57] : memref<2x256x128xbf16, #tpu.memory_space<vmem>>, vector<1x256x128xbf16>
    %133 = vector.shape_cast %132 : vector<1x256x128xbf16> to vector<256x128xbf16>
    %134 = arith.truncf %131 : vector<32x256xf32> to vector<32x256xbf16>
    %cst_58 = arith.constant dense<0.000000e+00> : vector<32x128xf32>
    %135 = tpu.matmul %134, %133, %cst_58 {dimension_numbers = #tpu.dot_dimension_numbers<[1], [0], [0], [1], [0, 0, 1, 1], [], []>} : vector<32x256xbf16>, vector<256x128xbf16>, vector<32x128xf32> -> vector<32x128xf32>
    %c0_59 = arith.constant 0 : index
    %c0_60 = arith.constant 0 : index
    %c0_61 = arith.constant 0 : index
    %136 = vector.load %arg14[%c0_59, %c0_60, %c0_61] : memref<2x1x128xf32, #tpu.memory_space<vmem>>, vector<1x1x128xf32>
    %137 = vector.shape_cast %136 : vector<1x1x128xf32> to vector<1x128xf32>
    %138 = vector.broadcast %137 : vector<1x128xf32> to vector<32x128xf32>
    %139 = arith.addf %135, %138 : vector<32x128xf32>
    %140 = arith.addf %110, %139 : vector<32x128xf32>
    %c0_62 = arith.constant 0 : index
    %c0_63 = arith.constant 0 : index
    %c0_64 = arith.constant 0 : index
    %141 = vector.load %arg15[%c0_62, %c0_63, %c0_64] : memref<2x1x128xf32, #tpu.memory_space<vmem>>, vector<1x1x128xf32>
    %142 = vector.shape_cast %141 : vector<1x1x128xf32> to vector<1x128xf32>
    %c0_65 = arith.constant 0 : index
    %c0_66 = arith.constant 0 : index
    %c0_67 = arith.constant 0 : index
    %143 = vector.load %arg16[%c0_65, %c0_66, %c0_67] : memref<2x1x128xf32, #tpu.memory_space<vmem>>, vector<1x1x128xf32>
    %144 = vector.shape_cast %143 : vector<1x1x128xf32> to vector<1x128xf32>
    %cst_68 = arith.constant dense<0.000000e+00> : vector<32xf32>
    %145 = vector.multi_reduction <add>, %140, %cst_68 [1] : vector<32x128xf32> to vector<32xf32>
    %146 = vector.shape_cast %145 : vector<32xf32> to vector<32x1xf32>
    %cst_69 = arith.constant 1.280000e+02 : f32
    %147 = vector.broadcast %cst_69 : f32 to vector<32x1xf32>
    %148 = arith.divf %146, %147 : vector<32x1xf32>
    %149 = vector.broadcast %148 : vector<32x1xf32> to vector<32x128xf32>
    %150 = arith.subf %140, %149 : vector<32x128xf32>
    %151 = arith.mulf %150, %150 : vector<32x128xf32>
    %cst_70 = arith.constant dense<0.000000e+00> : vector<32xf32>
    %152 = vector.multi_reduction <add>, %151, %cst_70 [1] : vector<32x128xf32> to vector<32xf32>
    %153 = vector.shape_cast %152 : vector<32xf32> to vector<32x1xf32>
    %cst_71 = arith.constant 1.280000e+02 : f32
    %154 = vector.broadcast %cst_71 : f32 to vector<32x1xf32>
    %155 = arith.divf %153, %154 : vector<32x1xf32>
    %cst_72 = arith.constant 9.99999996E-13 : f32
    %156 = vector.broadcast %cst_72 : f32 to vector<32x1xf32>
    %157 = arith.addf %155, %156 : vector<32x1xf32>
    %158 = math.rsqrt %157 : vector<32x1xf32>
    %159 = vector.broadcast %158 : vector<32x1xf32> to vector<32x128xf32>
    %160 = arith.mulf %150, %159 : vector<32x128xf32>
    %161 = vector.broadcast %142 : vector<1x128xf32> to vector<32x128xf32>
    %162 = arith.mulf %160, %161 : vector<32x128xf32>
    %163 = vector.broadcast %144 : vector<1x128xf32> to vector<32x128xf32>
    %164 = arith.addf %162, %163 : vector<32x128xf32>
    %c1 = arith.constant 1 : index
    %c0_73 = arith.constant 0 : index
    %c0_74 = arith.constant 0 : index
    %165 = vector.load %arg5[%c1, %c0_73, %c0_74] : memref<2x128x384xbf16, #tpu.memory_space<vmem>>, vector<1x128x384xbf16>
    %166 = vector.shape_cast %165 : vector<1x128x384xbf16> to vector<128x384xbf16>
    %167 = arith.truncf %164 : vector<32x128xf32> to vector<32x128xbf16>
    %cst_75 = arith.constant dense<0.000000e+00> : vector<32x384xf32>
    %168 = tpu.matmul %167, %166, %cst_75 {dimension_numbers = #tpu.dot_dimension_numbers<[1], [0], [0], [1], [0, 0, 1, 1], [], []>} : vector<32x128xbf16>, vector<128x384xbf16>, vector<32x384xf32> -> vector<32x384xf32>
    %c1_76 = arith.constant 1 : index
    %c0_77 = arith.constant 0 : index
    %c0_78 = arith.constant 0 : index
    %169 = vector.load %arg6[%c1_76, %c0_77, %c0_78] : memref<2x1x384xf32, #tpu.memory_space<vmem>>, vector<1x1x384xf32>
    %170 = vector.shape_cast %169 : vector<1x1x384xf32> to vector<1x384xf32>
    %171 = vector.broadcast %170 : vector<1x384xf32> to vector<32x384xf32>
    %172 = arith.addf %168, %171 : vector<32x384xf32>
    %173 = vector.extract_strided_slice %172 {offsets = [0, 0], sizes = [32, 32], strides = [1, 1]} : vector<32x384xf32> to vector<32x32xf32>
    %174 = vector.extract_strided_slice %172 {offsets = [0, 32], sizes = [32, 32], strides = [1, 1]} : vector<32x384xf32> to vector<32x32xf32>
    %175 = vector.extract_strided_slice %172 {offsets = [0, 64], sizes = [32, 32], strides = [1, 1]} : vector<32x384xf32> to vector<32x32xf32>
    %176 = vector.extract_strided_slice %172 {offsets = [0, 96], sizes = [32, 32], strides = [1, 1]} : vector<32x384xf32> to vector<32x32xf32>
    %177 = vector.extract_strided_slice %172 {offsets = [0, 128], sizes = [32, 32], strides = [1, 1]} : vector<32x384xf32> to vector<32x32xf32>
    %178 = vector.extract_strided_slice %172 {offsets = [0, 160], sizes = [32, 32], strides = [1, 1]} : vector<32x384xf32> to vector<32x32xf32>
    %179 = vector.extract_strided_slice %172 {offsets = [0, 192], sizes = [32, 32], strides = [1, 1]} : vector<32x384xf32> to vector<32x32xf32>
    %180 = vector.extract_strided_slice %172 {offsets = [0, 224], sizes = [32, 32], strides = [1, 1]} : vector<32x384xf32> to vector<32x32xf32>
    %181 = vector.extract_strided_slice %172 {offsets = [0, 256], sizes = [32, 32], strides = [1, 1]} : vector<32x384xf32> to vector<32x32xf32>
    %182 = vector.extract_strided_slice %172 {offsets = [0, 288], sizes = [32, 32], strides = [1, 1]} : vector<32x384xf32> to vector<32x32xf32>
    %183 = vector.extract_strided_slice %172 {offsets = [0, 320], sizes = [32, 32], strides = [1, 1]} : vector<32x384xf32> to vector<32x32xf32>
    %184 = vector.extract_strided_slice %172 {offsets = [0, 352], sizes = [32, 32], strides = [1, 1]} : vector<32x384xf32> to vector<32x32xf32>
    %185 = tpu.concatenate %173, %174, %175, %176, %177, %178, %179, %180, %181, %182, %183, %184 in 0 : vector<32x32xf32>, vector<32x32xf32>, vector<32x32xf32>, vector<32x32xf32>, vector<32x32xf32>, vector<32x32xf32>, vector<32x32xf32>, vector<32x32xf32>, vector<32x32xf32>, vector<32x32xf32>, vector<32x32xf32>, vector<32x32xf32> -> vector<384x32xf32>
    %186 = arith.truncf %185 : vector<384x32xf32> to vector<384x32xbf16>
    %187 = vector.extract_strided_slice %186 {offsets = [0, 0], sizes = [128, 32], strides = [1, 1]} : vector<384x32xbf16> to vector<128x32xbf16>
    %188 = vector.extract_strided_slice %186 {offsets = [128, 0], sizes = [128, 32], strides = [1, 1]} : vector<384x32xbf16> to vector<128x32xbf16>
    %189 = vector.extract_strided_slice %186 {offsets = [256, 0], sizes = [128, 32], strides = [1, 1]} : vector<384x32xbf16> to vector<128x32xbf16>
    "tpu.trace_start"() <{level = 10 : i32, message = "qd,kd->qk"}> : () -> ()
    %cst_79 = arith.constant dense<0.000000e+00> : vector<128x128xf32>
    %190 = tpu.matmul %187, %188, %cst_79 {dimension_numbers = #tpu.dot_dimension_numbers<[1], [1], [0], [0], [0, 0, 1, 0], [], []>} : vector<128x32xbf16>, vector<128x32xbf16>, vector<128x128xf32> -> vector<128x128xf32>
    "tpu.trace_stop"() : () -> ()
    %191 = arith.addf %190, %1 : vector<128x128xf32>
    %cst_80 = arith.constant dense<0xFF800000> : vector<128xf32>
    %192 = vector.multi_reduction <maximumf>, %191, %cst_80 [1] : vector<128x128xf32> to vector<128xf32>
    %193 = vector.shape_cast %192 : vector<128xf32> to vector<128x1xf32>
    %194 = vector.broadcast %193 : vector<128x1xf32> to vector<128x128xf32>
    %195 = arith.subf %191, %194 : vector<128x128xf32>
    %196 = math.exp %195 : vector<128x128xf32>
    %cst_81 = arith.constant dense<0.000000e+00> : vector<128xf32>
    %197 = vector.multi_reduction <add>, %196, %cst_81 [1] : vector<128x128xf32> to vector<128xf32>
    %198 = vector.shape_cast %197 : vector<128xf32> to vector<128x1xf32>
    %199 = tpu.reciprocal %198 {approx = true} : vector<128x1xf32> -> vector<128x1xf32>
    %200 = vector.broadcast %199 : vector<128x1xf32> to vector<128x128xf32>
    %201 = arith.mulf %196, %200 : vector<128x128xf32>
    %202 = arith.truncf %201 : vector<128x128xf32> to vector<128x128xbf16>
    %cst_82 = arith.constant dense<0.000000e+00> : vector<128x32xf32>
    %203 = tpu.matmul %202, %189, %cst_82 {dimension_numbers = #tpu.dot_dimension_numbers<[1], [0], [0], [1], [0, 0, 1, 1], [], []>} : vector<128x128xbf16>, vector<128x32xbf16>, vector<128x32xf32> -> vector<128x32xf32>
    %204 = arith.truncf %203 : vector<128x32xf32> to vector<128x32xbf16>
    %c1_83 = arith.constant 1 : index
    %c0_84 = arith.constant 0 : index
    %c0_85 = arith.constant 0 : index
    %205 = vector.load %arg7[%c1_83, %c0_84, %c0_85] : memref<2x128x128xbf16, #tpu.memory_space<vmem>>, vector<1x128x128xbf16>
    %206 = vector.shape_cast %205 : vector<1x128x128xbf16> to vector<128x128xbf16>
    %207 = vector.extract_strided_slice %204 {offsets = [0, 0], sizes = [32, 32], strides = [1, 1]} : vector<128x32xbf16> to vector<32x32xbf16>
    %208 = vector.extract_strided_slice %206 {offsets = [0, 0], sizes = [32, 128], strides = [1, 1]} : vector<128x128xbf16> to vector<32x128xbf16>
    %cst_86 = arith.constant dense<0.000000e+00> : vector<32x128xf32>
    %209 = tpu.matmul %207, %208, %cst_86 {dimension_numbers = #tpu.dot_dimension_numbers<[1], [0], [0], [1], [0, 0, 1, 1], [], []>} : vector<32x32xbf16>, vector<32x128xbf16>, vector<32x128xf32> -> vector<32x128xf32>
    %210 = vector.extract_strided_slice %204 {offsets = [32, 0], sizes = [32, 32], strides = [1, 1]} : vector<128x32xbf16> to vector<32x32xbf16>
    %211 = vector.extract_strided_slice %206 {offsets = [32, 0], sizes = [32, 128], strides = [1, 1]} : vector<128x128xbf16> to vector<32x128xbf16>
    %cst_87 = arith.constant dense<0.000000e+00> : vector<32x128xf32>
    %212 = tpu.matmul %210, %211, %cst_87 {dimension_numbers = #tpu.dot_dimension_numbers<[1], [0], [0], [1], [0, 0, 1, 1], [], []>} : vector<32x32xbf16>, vector<32x128xbf16>, vector<32x128xf32> -> vector<32x128xf32>
    %213 = arith.addf %209, %212 : vector<32x128xf32>
    %214 = vector.extract_strided_slice %204 {offsets = [64, 0], sizes = [32, 32], strides = [1, 1]} : vector<128x32xbf16> to vector<32x32xbf16>
    %215 = vector.extract_strided_slice %206 {offsets = [64, 0], sizes = [32, 128], strides = [1, 1]} : vector<128x128xbf16> to vector<32x128xbf16>
    %cst_88 = arith.constant dense<0.000000e+00> : vector<32x128xf32>
    %216 = tpu.matmul %214, %215, %cst_88 {dimension_numbers = #tpu.dot_dimension_numbers<[1], [0], [0], [1], [0, 0, 1, 1], [], []>} : vector<32x32xbf16>, vector<32x128xbf16>, vector<32x128xf32> -> vector<32x128xf32>
    %217 = arith.addf %213, %216 : vector<32x128xf32>
    %218 = vector.extract_strided_slice %204 {offsets = [96, 0], sizes = [32, 32], strides = [1, 1]} : vector<128x32xbf16> to vector<32x32xbf16>
    %219 = vector.extract_strided_slice %206 {offsets = [96, 0], sizes = [32, 128], strides = [1, 1]} : vector<128x128xbf16> to vector<32x128xbf16>
    %cst_89 = arith.constant dense<0.000000e+00> : vector<32x128xf32>
    %220 = tpu.matmul %218, %219, %cst_89 {dimension_numbers = #tpu.dot_dimension_numbers<[1], [0], [0], [1], [0, 0, 1, 1], [], []>} : vector<32x32xbf16>, vector<32x128xbf16>, vector<32x128xf32> -> vector<32x128xf32>
    %221 = arith.addf %217, %220 : vector<32x128xf32>
    %c1_90 = arith.constant 1 : index
    %c0_91 = arith.constant 0 : index
    %c0_92 = arith.constant 0 : index
    %222 = vector.load %arg8[%c1_90, %c0_91, %c0_92] : memref<2x1x128xf32, #tpu.memory_space<vmem>>, vector<1x1x128xf32>
    %223 = vector.shape_cast %222 : vector<1x1x128xf32> to vector<1x128xf32>
    %224 = vector.broadcast %223 : vector<1x128xf32> to vector<32x128xf32>
    %225 = arith.addf %221, %224 : vector<32x128xf32>
    %226 = arith.addf %164, %225 : vector<32x128xf32>
    %c1_93 = arith.constant 1 : index
    %c0_94 = arith.constant 0 : index
    %c0_95 = arith.constant 0 : index
    %227 = vector.load %arg9[%c1_93, %c0_94, %c0_95] : memref<2x1x128xf32, #tpu.memory_space<vmem>>, vector<1x1x128xf32>
    %228 = vector.shape_cast %227 : vector<1x1x128xf32> to vector<1x128xf32>
    %c1_96 = arith.constant 1 : index
    %c0_97 = arith.constant 0 : index
    %c0_98 = arith.constant 0 : index
    %229 = vector.load %arg10[%c1_96, %c0_97, %c0_98] : memref<2x1x128xf32, #tpu.memory_space<vmem>>, vector<1x1x128xf32>
    %230 = vector.shape_cast %229 : vector<1x1x128xf32> to vector<1x128xf32>
    %cst_99 = arith.constant dense<0.000000e+00> : vector<32xf32>
    %231 = vector.multi_reduction <add>, %226, %cst_99 [1] : vector<32x128xf32> to vector<32xf32>
    %232 = vector.shape_cast %231 : vector<32xf32> to vector<32x1xf32>
    %cst_100 = arith.constant 1.280000e+02 : f32
    %233 = vector.broadcast %cst_100 : f32 to vector<32x1xf32>
    %234 = arith.divf %232, %233 : vector<32x1xf32>
    %235 = vector.broadcast %234 : vector<32x1xf32> to vector<32x128xf32>
    %236 = arith.subf %226, %235 : vector<32x128xf32>
    %237 = arith.mulf %236, %236 : vector<32x128xf32>
    %cst_101 = arith.constant dense<0.000000e+00> : vector<32xf32>
    %238 = vector.multi_reduction <add>, %237, %cst_101 [1] : vector<32x128xf32> to vector<32xf32>
    %239 = vector.shape_cast %238 : vector<32xf32> to vector<32x1xf32>
    %cst_102 = arith.constant 1.280000e+02 : f32
    %240 = vector.broadcast %cst_102 : f32 to vector<32x1xf32>
    %241 = arith.divf %239, %240 : vector<32x1xf32>
    %cst_103 = arith.constant 9.99999996E-13 : f32
    %242 = vector.broadcast %cst_103 : f32 to vector<32x1xf32>
    %243 = arith.addf %241, %242 : vector<32x1xf32>
    %244 = math.rsqrt %243 : vector<32x1xf32>
    %245 = vector.broadcast %244 : vector<32x1xf32> to vector<32x128xf32>
    %246 = arith.mulf %236, %245 : vector<32x128xf32>
    %247 = vector.broadcast %228 : vector<1x128xf32> to vector<32x128xf32>
    %248 = arith.mulf %246, %247 : vector<32x128xf32>
    %249 = vector.broadcast %230 : vector<1x128xf32> to vector<32x128xf32>
    %250 = arith.addf %248, %249 : vector<32x128xf32>
    %c1_104 = arith.constant 1 : index
    %c0_105 = arith.constant 0 : index
    %c0_106 = arith.constant 0 : index
    %251 = vector.load %arg11[%c1_104, %c0_105, %c0_106] : memref<2x128x256xbf16, #tpu.memory_space<vmem>>, vector<1x128x256xbf16>
    %252 = vector.shape_cast %251 : vector<1x128x256xbf16> to vector<128x256xbf16>
    %253 = arith.truncf %250 : vector<32x128xf32> to vector<32x128xbf16>
    %cst_107 = arith.constant dense<0.000000e+00> : vector<32x256xf32>
    %254 = tpu.matmul %253, %252, %cst_107 {dimension_numbers = #tpu.dot_dimension_numbers<[1], [0], [0], [1], [0, 0, 1, 1], [], []>} : vector<32x128xbf16>, vector<128x256xbf16>, vector<32x256xf32> -> vector<32x256xf32>
    %c1_108 = arith.constant 1 : index
    %c0_109 = arith.constant 0 : index
    %c0_110 = arith.constant 0 : index
    %255 = vector.load %arg12[%c1_108, %c0_109, %c0_110] : memref<2x1x256xf32, #tpu.memory_space<vmem>>, vector<1x1x256xf32>
    %256 = vector.shape_cast %255 : vector<1x1x256xf32> to vector<1x256xf32>
    %257 = vector.broadcast %256 : vector<1x256xf32> to vector<32x256xf32>
    %258 = arith.addf %254, %257 : vector<32x256xf32>
    %259 = arith.mulf %258, %258 : vector<32x256xf32>
    %260 = arith.mulf %258, %259 : vector<32x256xf32>
    %cst_111 = arith.constant 4.471500e-02 : f32
    %261 = vector.broadcast %cst_111 : f32 to vector<32x256xf32>
    %262 = arith.mulf %261, %260 : vector<32x256xf32>
    %263 = arith.addf %258, %262 : vector<32x256xf32>
    %cst_112 = arith.constant 0.797884583 : f32
    %264 = vector.broadcast %cst_112 : f32 to vector<32x256xf32>
    %265 = arith.mulf %264, %263 : vector<32x256xf32>
    %266 = math.tanh %265 : vector<32x256xf32>
    %cst_113 = arith.constant 1.000000e+00 : f32
    %267 = vector.broadcast %cst_113 : f32 to vector<32x256xf32>
    %268 = arith.addf %267, %266 : vector<32x256xf32>
    %cst_114 = arith.constant 5.000000e-01 : f32
    %269 = vector.broadcast %cst_114 : f32 to vector<32x256xf32>
    %270 = arith.mulf %269, %268 : vector<32x256xf32>
    %271 = arith.mulf %258, %270 : vector<32x256xf32>
    %c1_115 = arith.constant 1 : index
    %c0_116 = arith.constant 0 : index
    %c0_117 = arith.constant 0 : index
    %272 = vector.load %arg13[%c1_115, %c0_116, %c0_117] : memref<2x256x128xbf16, #tpu.memory_space<vmem>>, vector<1x256x128xbf16>
    %273 = vector.shape_cast %272 : vector<1x256x128xbf16> to vector<256x128xbf16>
    %274 = arith.truncf %271 : vector<32x256xf32> to vector<32x256xbf16>
    %cst_118 = arith.constant dense<0.000000e+00> : vector<32x128xf32>
    %275 = tpu.matmul %274, %273, %cst_118 {dimension_numbers = #tpu.dot_dimension_numbers<[1], [0], [0], [1], [0, 0, 1, 1], [], []>} : vector<32x256xbf16>, vector<256x128xbf16>, vector<32x128xf32> -> vector<32x128xf32>
    %c1_119 = arith.constant 1 : index
    %c0_120 = arith.constant 0 : index
    %c0_121 = arith.constant 0 : index
    %276 = vector.load %arg14[%c1_119, %c0_120, %c0_121] : memref<2x1x128xf32, #tpu.memory_space<vmem>>, vector<1x1x128xf32>
    %277 = vector.shape_cast %276 : vector<1x1x128xf32> to vector<1x128xf32>
    %278 = vector.broadcast %277 : vector<1x128xf32> to vector<32x128xf32>
    %279 = arith.addf %275, %278 : vector<32x128xf32>
    %280 = arith.addf %250, %279 : vector<32x128xf32>
    %c1_122 = arith.constant 1 : index
    %c0_123 = arith.constant 0 : index
    %c0_124 = arith.constant 0 : index
    %281 = vector.load %arg15[%c1_122, %c0_123, %c0_124] : memref<2x1x128xf32, #tpu.memory_space<vmem>>, vector<1x1x128xf32>
    %282 = vector.shape_cast %281 : vector<1x1x128xf32> to vector<1x128xf32>
    %c1_125 = arith.constant 1 : index
    %c0_126 = arith.constant 0 : index
    %c0_127 = arith.constant 0 : index
    %283 = vector.load %arg16[%c1_125, %c0_126, %c0_127] : memref<2x1x128xf32, #tpu.memory_space<vmem>>, vector<1x1x128xf32>
    %284 = vector.shape_cast %283 : vector<1x1x128xf32> to vector<1x128xf32>
    %cst_128 = arith.constant dense<0.000000e+00> : vector<32xf32>
    %285 = vector.multi_reduction <add>, %280, %cst_128 [1] : vector<32x128xf32> to vector<32xf32>
    %286 = vector.shape_cast %285 : vector<32xf32> to vector<32x1xf32>
    %cst_129 = arith.constant 1.280000e+02 : f32
    %287 = vector.broadcast %cst_129 : f32 to vector<32x1xf32>
    %288 = arith.divf %286, %287 : vector<32x1xf32>
    %289 = vector.broadcast %288 : vector<32x1xf32> to vector<32x128xf32>
    %290 = arith.subf %280, %289 : vector<32x128xf32>
    %291 = arith.mulf %290, %290 : vector<32x128xf32>
    %cst_130 = arith.constant dense<0.000000e+00> : vector<32xf32>
    %292 = vector.multi_reduction <add>, %291, %cst_130 [1] : vector<32x128xf32> to vector<32xf32>
    %293 = vector.shape_cast %292 : vector<32xf32> to vector<32x1xf32>
    %cst_131 = arith.constant 1.280000e+02 : f32
    %294 = vector.broadcast %cst_131 : f32 to vector<32x1xf32>
    %295 = arith.divf %293, %294 : vector<32x1xf32>
    %cst_132 = arith.constant 9.99999996E-13 : f32
    %296 = vector.broadcast %cst_132 : f32 to vector<32x1xf32>
    %297 = arith.addf %295, %296 : vector<32x1xf32>
    %298 = math.rsqrt %297 : vector<32x1xf32>
    %299 = vector.broadcast %298 : vector<32x1xf32> to vector<32x128xf32>
    %300 = arith.mulf %290, %299 : vector<32x128xf32>
    %301 = vector.broadcast %282 : vector<1x128xf32> to vector<32x128xf32>
    %302 = arith.mulf %300, %301 : vector<32x128xf32>
    %303 = vector.broadcast %284 : vector<1x128xf32> to vector<32x128xf32>
    %304 = arith.addf %302, %303 : vector<32x128xf32>
    %c0_133 = arith.constant 0 : index
    %c0_134 = arith.constant 0 : index
    %305 = vector.load %arg17[%c0_133, %c0_134] : memref<128x128xbf16, #tpu.memory_space<vmem>>, vector<128x128xbf16>
    %306 = arith.truncf %304 : vector<32x128xf32> to vector<32x128xbf16>
    %cst_135 = arith.constant dense<0.000000e+00> : vector<32x128xf32>
    %307 = tpu.matmul %306, %305, %cst_135 {dimension_numbers = #tpu.dot_dimension_numbers<[1], [0], [0], [1], [0, 0, 1, 1], [], []>} : vector<32x128xbf16>, vector<128x128xbf16>, vector<32x128xf32> -> vector<32x128xf32>
    %c0_136 = arith.constant 0 : index
    %c0_137 = arith.constant 0 : index
    %308 = vector.load %arg18[%c0_136, %c0_137] : memref<1x128xf32, #tpu.memory_space<vmem>>, vector<1x128xf32>
    %309 = vector.broadcast %308 : vector<1x128xf32> to vector<32x128xf32>
    %310 = arith.addf %307, %309 : vector<32x128xf32>
    %c0_138 = arith.constant 0 : index
    %c0_139 = arith.constant 0 : index
    %311 = vector.load %arg19[%c0_138, %c0_139] : memref<32x128xf32, #tpu.memory_space<vmem>>, vector<32x128xf32>
    tpu.vector_store %arg19[%c0_138, %c0_139], %310 {strides = array<i32>} : memref<32x128xf32, #tpu.memory_space<vmem>>, vector<32x128xf32>,
    return
  }
  func.func @transform_0(%arg0: i32) -> (i32, i32) {
    %c0_i32 = arith.constant 0 : i32
    %c0_i32_0 = arith.constant 0 : i32
    return %arg0, %c0_i32 : i32, i32
  }
  func.func @transform_1(%arg0: i32) -> (i32, i32, i32) {
    %c0_i32 = arith.constant 0 : i32
    %c0_i32_0 = arith.constant 0 : i32
    %c0_i32_1 = arith.constant 0 : i32
    return %arg0, %c0_i32, %c0_i32_0 : i32, i32, i32
  }
  func.func @transform_2(%arg0: i32) -> (i32, i32) {
    %c0_i32 = arith.constant 0 : i32
    %c0_i32_0 = arith.constant 0 : i32
    %c0_i32_1 = arith.constant 0 : i32
    return %c0_i32, %c0_i32_0 : i32, i32
  }
  func.func @transform_3(%arg0: i32) -> (i32, i32) {
    %c0_i32 = arith.constant 0 : i32
    %c0_i32_0 = arith.constant 0 : i32
    %c0_i32_1 = arith.constant 0 : i32
    return %c0_i32, %c0_i32_0 : i32, i32
  }
  func.func @transform_4(%arg0: i32) -> (i32, i32, i32) {
    %c0_i32 = arith.constant 0 : i32
    %c0_i32_0 = arith.constant 0 : i32
    %c0_i32_1 = arith.constant 0 : i32
    %c0_i32_2 = arith.constant 0 : i32
    return %c0_i32, %c0_i32_0, %c0_i32_1 : i32, i32, i32
  }
  func.func @transform_5(%arg0: i32) -> (i32, i32, i32) {
    %c0_i32 = arith.constant 0 : i32
    %c0_i32_0 = arith.constant 0 : i32
    %c0_i32_1 = arith.constant 0 : i32
    %c0_i32_2 = arith.constant 0 : i32
    return %c0_i32, %c0_i32_0, %c0_i32_1 : i32, i32, i32
  }
  func.func @transform_6(%arg0: i32) -> (i32, i32, i32) {
    %c0_i32 = arith.constant 0 : i32
    %c0_i32_0 = arith.constant 0 : i32
    %c0_i32_1 = arith.constant 0 : i32
    %c0_i32_2 = arith.constant 0 : i32
    return %c0_i32, %c0_i32_0, %c0_i32_1 : i32, i32, i32
  }
  func.func @transform_7(%arg0: i32) -> (i32, i32, i32) {
    %c0_i32 = arith.constant 0 : i32
    %c0_i32_0 = arith.constant 0 : i32
    %c0_i32_1 = arith.constant 0 : i32
    %c0_i32_2 = arith.constant 0 : i32
    return %c0_i32, %c0_i32_0, %c0_i32_1 : i32, i32, i32
  }
  func.func @transform_8(%arg0: i32) -> (i32, i32, i32) {
    %c0_i32 = arith.constant 0 : i32
    %c0_i32_0 = arith.constant 0 : i32
    %c0_i32_1 = arith.constant 0 : i32
    %c0_i32_2 = arith.constant 0 : i32
    return %c0_i32, %c0_i32_0, %c0_i32_1 : i32, i32, i32
  }
  func.func @transform_9(%arg0: i32) -> (i32, i32, i32) {
    %c0_i32 = arith.constant 0 : i32
    %c0_i32_0 = arith.constant 0 : i32
    %c0_i32_1 = arith.constant 0 : i32
    %c0_i32_2 = arith.constant 0 : i32
    return %c0_i32, %c0_i32_0, %c0_i32_1 : i32, i32, i32
  }
  func.func @transform_10(%arg0: i32) -> (i32, i32, i32) {
    %c0_i32 = arith.constant 0 : i32
    %c0_i32_0 = arith.constant 0 : i32
    %c0_i32_1 = arith.constant 0 : i32
    %c0_i32_2 = arith.constant 0 : i32
    return %c0_i32, %c0_i32_0, %c0_i32_1 : i32, i32, i32
  }
  func.func @transform_11(%arg0: i32) -> (i32, i32, i32) {
    %c0_i32 = arith.constant 0 : i32
    %c0_i32_0 = arith.constant 0 : i32
    %c0_i32_1 = arith.constant 0 : i32
    %c0_i32_2 = arith.constant 0 : i32
    return %c0_i32, %c0_i32_0, %c0_i32_1 : i32, i32, i32
  }
  func.func @transform_12(%arg0: i32) -> (i32, i32, i32) {
    %c0_i32 = arith.constant 0 : i32
    %c0_i32_0 = arith.constant 0 : i32
    %c0_i32_1 = arith.constant 0 : i32
    %c0_i32_2 = arith.constant 0 : i32
    return %c0_i32, %c0_i32_0, %c0_i32_1 : i32, i32, i32
  }
  func.func @transform_13(%arg0: i32) -> (i32, i32, i32) {
    %c0_i32 = arith.constant 0 : i32
    %c0_i32_0 = arith.constant 0 : i32
    %c0_i32_1 = arith.constant 0 : i32
    %c0_i32_2 = arith.constant 0 : i32
    return %c0_i32, %c0_i32_0, %c0_i32_1 : i32, i32, i32
  }
  func.func @transform_14(%arg0: i32) -> (i32, i32, i32) {
    %c0_i32 = arith.constant 0 : i32
    %c0_i32_0 = arith.constant 0 : i32
    %c0_i32_1 = arith.constant 0 : i32
    %c0_i32_2 = arith.constant 0 : i32
    return %c0_i32, %c0_i32_0, %c0_i32_1 : i32, i32, i32
  }
  func.func @transform_15(%arg0: i32) -> (i32, i32, i32) {
    %c0_i32 = arith.constant 0 : i32
    %c0_i32_0 = arith.constant 0 : i32
    %c0_i32_1 = arith.constant 0 : i32
    %c0_i32_2 = arith.constant 0 : i32
    return %c0_i32, %c0_i32_0, %c0_i32_1 : i32, i32, i32
  }
  func.func @transform_16(%arg0: i32) -> (i32, i32) {
    %c0_i32 = arith.constant 0 : i32
    %c0_i32_0 = arith.constant 0 : i32
    %c0_i32_1 = arith.constant 0 : i32
    return %c0_i32, %c0_i32_0 : i32, i32
  }
  func.func @transform_17(%arg0: i32) -> (i32, i32) {
    %c0_i32 = arith.constant 0 : i32
    %c0_i32_0 = arith.constant 0 : i32
    %c0_i32_1 = arith.constant 0 : i32
    return %c0_i32, %c0_i32_0 : i32, i32
  }
  func.func @transform_18(%arg0: i32) -> (i32, i32) {
    %c0_i32 = arith.constant 0 : i32
    %c0_i32_0 = arith.constant 0 : i32
    return %arg0, %c0_i32 : i32, i32
  }
}

</mosaic_0001>

<bundles_post_ra>
// kernel: qa_model_forward.1
= control target key start
LH: loop header
LB: loop body
LE: loop exit
PB: predicated region body
PF: predicated region fallthrough
CT: control target
= control target key end

     0   :  { %v4997_v39 = vmov 0   ;;  %vm572_vm0 = vcmask 261120   ;;  %s4998_s20 = smov 32   ;;  %s4999_s21 = smov 64   ;;  %s6373_s0 = inlined_call_operand.vmem [shape: f32[32,128], index: 0, kind: input, shape index: {}]   ;;  %s6374_s4 = inlined_call_operand.vmem [shape: bf16[2,128,384], index: 4, kind: input, shape index: {}]   ;;  %s6375_s2 = inlined_call_operand.vmem [shape: f32[1,128], index: 2, kind: input, shape index: {}]   ;;  %s6376_s3 = inlined_call_operand.vmem [shape: f32[1,128], index: 3, kind: input, shape index: {}]   ;;  %s6377_s5 = inlined_call_operand.vmem [shape: f32[2,1,384], index: 5, kind: input, shape index: {}]   ;;  %s6378_s1 = inlined_call_operand.vmem [shape: f32[1,128,128], index: 1, kind: input, shape index: {}]   ;;  %s6379_s6 = inlined_call_operand.vmem [shape: bf16[2,128,128], index: 6, kind: input, shape index: {}]   ;;  %s6380_s7 = inlined_call_operand.vmem [shape: f32[2,1,128], index: 7, kind: input, shape index: {}]   ;;  %s6381_s10 = inlined_call_operand.vmem [shape: bf16[2,128,256], index: 10, kind: input, shape index: {}]   ;;  %s6382_s8 = inlined_call_operand.vmem [shape: f32[2,1,128], index: 8, kind: input, shape index: {}]   ;;  %s6383_s9 = inlined_call_operand.vmem [shape: f32[2,1,128], index: 9, kind: input, shape index: {}]   ;;  %s6384_s12 = inlined_call_operand.vmem [shape: bf16[2,256,128], index: 12, kind: input, shape index: {}]   ;;  %s6385_s11 = inlined_call_operand.vmem [shape: f32[2,1,256], index: 11, kind: input, shape index: {}]   ;;  %s6386_s13 = inlined_call_operand.vmem [shape: f32[2,1,128], index: 13, kind: input, shape index: {}]   ;;  %s6387_s14 = inlined_call_operand.vmem [shape: f32[2,1,128], index: 14, kind: input, shape index: {}]   ;;  %s6388_s15 = inlined_call_operand.vmem [shape: f32[2,1,128], index: 15, kind: input, shape index: {}]   ;;  %s6389_s16 = inlined_call_operand.vmem [shape: bf16[128,128], index: 16, kind: input, shape index: {}]   ;;  %s6390_s17 = inlined_call_operand.vmem [shape: f32[1,128], index: 17, kind: input, shape index: {}]   ;;  %s6391_s18 = inlined_call_operand.vmem [shape: f32[32,128], index: 18, kind: output, shape index: {}]  }
   0x1   :  { %6394 = sst [smem:[#allocation2_spill]] %s6373_s0  ;;  %358 = vmatprep.mubr.bf16.mxu0 %v4997_v39  ;;  %s5000_s22 = smov 96  }
   0x2   :  { %6395 = sst [smem:[#allocation3_spill]] %s6374_s4 }
   0x3   :  { %6396 = sst [smem:[#allocation4_spill]] %s6375_s2 }
   0x4   :  { %s6397_s29 = sld [smem:[#allocation2_spill]] }
   0x5   :  { %s6398_s23 = sld [smem:[#allocation3_spill]] }
   0x6   :  { %s6399_s30 = sld [smem:[#allocation4_spill]] }
   0xa   :  { %v76_v0 = vld [vmem:[%s6397_s29] sm:$0xff]  ;;  %v78_v1 = vld [vmem:[%s6397_s29 + $0x10] sm:$0xff]  ;;  %v77_v2 = vld [vmem:[%s6397_s29 + $0x8] sm:$0xff] }
   0xb   :  { %82 = vadd.xlane.f32.xlu0 %v76_v0  ;;  %86 = vadd.xlane.f32.xlu1 %v78_v1  ;;  %v79_v3 = vld [vmem:[%s6397_s29 + $0x18] sm:$0xff]  ;;  %v4615_v5 = vld [vmem:[%s6398_s23 + $0xa8] ss:$12 sps:$4 sm:$0xff]   ;;  %v4624_v28 = vld [vmem:[%s6398_s23 + $0x64] ss:$12 sps:$4 sm:$0xff]  }
   0xc   :  { %v4613_v4 = vld [vmem:[%s6398_s23 + $0xac] ss:$12 sps:$4 sm:$0xff]   ;;  %v4616_v22 = vld [vmem:[%s6398_s23 + $0x94] ss:$12 sps:$4 sm:$0xff]   ;;  %v4618_v23 = vld [vmem:[%s6398_s23 + $0xb0] ss:$12 sps:$4 sm:$0xff]  }
   0xd   :  { %326 = vmatprep.subr.bf16.mxu0 %v4613_v4  ;;  %v4619_v24 = vld [vmem:[%s6398_s23 + $0x90] ss:$12 sps:$4 sm:$0xff]   ;;  %4145 = vmatprep.subr.bf16.mxu1 %v4618_v23  ;;  %v4622_v26 = vld [vmem:[%s6398_s23 + $0x98] ss:$12 sps:$4 sm:$0xff]   ;;  %v4626_v29 = vld [vmem:[%s6398_s23 + $0x80] ss:$12 sps:$4 sm:$0xff]  }
   0xe   :  { %327 = vmatpush1.bf16.msra.mxu0 %v4615_v5  ;;  %4146 = vmatpush3.bf16.msra.mxu1 %v4618_v23  ;;  %v4620_v25 = vld [vmem:[%s6398_s23 + $0x7c] ss:$12 sps:$4 sm:$0xff]   ;;  %v4623_v27 = vld [vmem:[%s6398_s23 + $0x78] ss:$12 sps:$4 sm:$0xff]   ;;  %v4627_v30 = vld [vmem:[%s6398_s23 + $0x60] ss:$12 sps:$4 sm:$0xff]  }
   0xf   :  { %84 = vadd.xlane.f32.xlu0 %v77_v2  ;;  %88 = vadd.xlane.f32.xlu1 %v79_v3  ;;  %v4628_v31 = vld [vmem:[%s6398_s23 + $0x4c] ss:$12 sps:$4 sm:$0xff]   ;;  %v4630_v32 = vld [vmem:[%s6398_s23 + $0x68] ss:$12 sps:$4 sm:$0xff]   ;;  %v4634_v35 = vld [vmem:[%s6398_s23 + $0x50] ss:$12 sps:$4 sm:$0xff]  }
  0x10   :  { %328 = vmatprep.subr.bf16.mxu0 %v4616_v22  ;;  %4147 = vmatprep.subr.bf16.mxu1 %v4622_v26  ;;  %v4631_v33 = vld [vmem:[%s6398_s23 + $0x48] ss:$12 sps:$4 sm:$0xff]   ;;  %v4635_v36 = vld [vmem:[%s6398_s23 + $0x30] ss:$12 sps:$4 sm:$0xff]   ;;  %v4638_v38 = vld [vmem:[%s6398_s23 + $0x38] ss:$12 sps:$4 sm:$0xff]  }
  0x11   :  { %v4632_v34 = vld [vmem:[%s6398_s23 + $0x34] ss:$12 sps:$4 sm:$0xff]   ;;  %v4636_v37 = vld [vmem:[%s6398_s23 + $0x1c] ss:$12 sps:$4 sm:$0xff]   ;;  %v4639_v40 = vld [vmem:[%s6398_s23 + $0x18] ss:$12 sps:$4 sm:$0xff]  }
  0x12   :  { %329 = vmatpush1.bf16.msra.mxu0 %v4619_v24  ;;  %4148 = vmatpush3.bf16.msra.mxu1 %v4622_v26  ;;  %v4640_v41 = vld [vmem:[%s6398_s23 + $0x4] ss:$12 sps:$4 sm:$0xff]   ;;  %v4642_v42 = vld [vmem:[%s6398_s23 + $0x20] ss:$12 sps:$4 sm:$0xff]   ;;  %v4644_v44 = vld [vmem:[%s6398_s23 + $0x8] ss:$12 sps:$4 sm:$0xff]  }
  0x13   :  { %330 = vmatprep.subr.bf16.mxu0 %v4620_v25  ;;  %4149 = vmatprep.subr.bf16.mxu1 %v4626_v29  ;;  %v4643_v43 = vld [vmem:[%s6398_s23] ss:$12 sps:$4 sm:$0xff]  }
  0x14   :  { %v3676_v59 = vld [vmem:[%s6399_s30] ss:$0 sm:$0xff] }
  0x16   :  { %331 = vmatpush1.bf16.msra.mxu0 %v4623_v27  ;;  %4150 = vmatpush3.bf16.msra.mxu1 %v4626_v29 }
  0x17   :  { %332 = vmatprep.subr.bf16.mxu0 %v4624_v28  ;;  %4151 = vmatprep.subr.bf16.mxu1 %v4630_v32 }
  0x1a   :  { %333 = vmatpush1.bf16.msra.mxu0 %v4627_v30  ;;  %4152 = vmatpush3.bf16.msra.mxu1 %v4630_v32 }
  0x1b   :  { %334 = vmatprep.subr.bf16.mxu0 %v4628_v31  ;;  %4153 = vmatprep.subr.bf16.mxu1 %v4634_v35 }
  0x1e   :  { %335 = vmatpush1.bf16.msra.mxu0 %v4631_v33  ;;  %4154 = vmatpush3.bf16.msra.mxu1 %v4634_v35 }
  0x1f   :  { %336 = vmatprep.subr.bf16.mxu0 %v4632_v34  ;;  %4155 = vmatprep.subr.bf16.mxu1 %v4638_v38 }
  0x22   :  { %337 = vmatpush1.bf16.msra.mxu0 %v4635_v36  ;;  %4156 = vmatpush3.bf16.msra.mxu1 %v4638_v38 }
  0x23   :  { %338 = vmatprep.subr.bf16.mxu0 %v4636_v37  ;;  %4157 = vmatprep.subr.bf16.mxu1 %v4642_v42 }
  0x26   :  { %339 = vmatpush1.bf16.msra.mxu0 %v4639_v40  ;;  %4158 = vmatpush3.bf16.msra.mxu1 %v4642_v42 }
  0x27   :  { %340 = vmatprep.subr.bf16.mxu0 %v4640_v41  ;;  %4159 = vmatprep.subr.bf16.mxu1 %v4644_v44 }
  0x2a   :  { %341 = vmatpush1.bf16.msra.mxu0 %v4643_v43  ;;  %4160 = vmatpush3.bf16.msra.mxu1 %v4644_v44 }
  0x94   :  { %v83_v6 = vpop.xlane.xlu0 %82  ;;  %v87_v7 = vpop.xlane.xlu1 %86 }
  0x95   :  { %v91_v8 = vmul.f32 0.0078125, %v83_v6  ;;  %v93_v9 = vmul.f32 0.0078125, %v87_v7 }
  0x97   :  { %v5114_v10 = vsub.f32 %v76_v0, %v91_v8  ;;  %v5116_v11 = vsub.f32 %v78_v1, %v93_v9  ;;  %v3677_v0 = vld [vmem:[%s6376_s3] ss:$0 sm:$0xff] }
  0x98   :  { %v85_v12 = vpop.xlane.xlu0 %84  ;;  %v89_v13 = vpop.xlane.xlu1 %88 }
  0x99   :  { %v92_v14 = vmul.f32 0.0078125, %v85_v12  ;;  %v99_v15 = vmul.f32 %v5114_v10, %v5114_v10  ;;  %v94_v16 = vmul.f32 0.0078125, %v89_v13  ;;  %v101_v17 = vmul.f32 %v5116_v11, %v5116_v11 }
  0x9a   :  { %v183_v13 = vlaneseq }
  0x9b   :  { %103 = vadd.xlane.f32.xlu0 %v99_v15  ;;  %v5122_v18 = vsub.f32 %v77_v2, %v92_v14  ;;  %v5124_v19 = vsub.f32 %v79_v3, %v94_v16  ;;  %v181_v16 = vld [vmem:[%s6377_s5] sm:$0x7] }
  0x9c   :  { %v5220_v14 = vshrl.u32 %v183_v13, 7 }
  0x9d   :  { %v100_v20 = vmul.f32 %v5122_v18, %v5122_v18  ;;  %v102_v21 = vmul.f32 %v5124_v19, %v5124_v19 }
  0x9e   :  { %v5223_v15 = vsub.s32 0, %v5220_v14 }
  0x9f   :  { %107 = vadd.xlane.f32.xlu0 %v101_v17  ;;  %105 = vadd.xlane.f32.xlu1 %v100_v20  ;;  %v5229_v17 = vsub.s32 1, %v5220_v14  ;;  %v193_v20 = vsub.s32 2, %v5220_v14 }
  0xa1   :  { %v190_v22 = vrot.slane %v181_v16, %v5229_v17  ;;  %v194_v27 = vrot.slane %v181_v16, %v193_v20 }
  0xa3   :  { %109 = vadd.xlane.f32.xlu1 %v102_v21 }
 0x124   :  { %v104_v45 = vpop.xlane.xlu0 %103 }
 0x125   :  { %v111_v46 = vmul.f32 0.0078125, %v104_v45 }
 0x127   :  { %v115_v47 = vadd.f32 1e-12, %v111_v46 }
 0x128   :  { %v106_v48 = vpop.xlane.xlu1 %105  ;;  %v108_v49 = vpop.xlane.xlu0 %107 }
 0x129   :  { %4781 = vrsqrt.f32 %v115_v47  ;;  %v112_v50 = vmul.f32 0.0078125, %v106_v48  ;;  %v113_v51 = vmul.f32 0.0078125, %v108_v49 }
 0x12b   :  { %v116_v52 = vadd.f32 1e-12, %v112_v50  ;;  %v117_v53 = vadd.f32 1e-12, %v113_v51 }
 0x12c   :  { %v110_v54 = vpop.xlane.xlu1 %109 }
 0x12d   :  { %4783 = vrsqrt.f32 %v116_v52  ;;  %v114_v55 = vmul.f32 0.0078125, %v110_v54 }
 0x12e   :  { %4785 = vrsqrt.f32 %v117_v53 }
 0x12f   :  { %v118_v56 = vadd.f32 1e-12, %v114_v55 }
 0x131   :  { %4787 = vrsqrt.f32 %v118_v56 }
 0x136   :  { %v4782_v57 = vpop.eup %4781 }
 0x137   :  { %v123_v58 = vmul.f32 %v4782_v57, %v5114_v10 }
 0x139   :  { %v133_v63 = vmul.f32 %v3676_v59, %v123_v58 }
 0x13a   :  { %v4784_v60 = vpop.eup %4783 }
 0x13b   :  { %v4786_v61 = vpop.eup %4785  ;;  %v124_v62 = vmul.f32 %v4784_v60, %v5122_v18  ;;  %v5206_v4 = vadd.f32 %v3677_v0, %v133_v63 }
 0x13c   :  { %v125_v1 = vmul.f32 %v4786_v61, %v5116_v11 }
 0x13d   :  { %v134_v2 = vmul.f32 %v3676_v59, %v124_v62 }
 0x13e   :  { %v4788_v3 = vpop.eup %4787  ;;  %v135_v7 = vmul.f32 %v3676_v59, %v125_v1 }
 0x13f   :  { %v5208_v5 = vadd.f32 %v3677_v0, %v134_v2  ;;  %v126_v6 = vmul.f32 %v4788_v3, %v5124_v19  ;;  %v186_v19 = vrot.slane %v181_v16, %v5223_v15 }
 0x140   :  { %v5213_v10 = vadd.f32 %v3677_v0, %v135_v7 }
 0x141   :  { %v179_v8 = vpack.c.bf16 %v5208_v5, %v5206_v4  ;;  %v136_v9 = vmul.f32 %v3676_v59, %v126_v6 }
 0x143   :  { %359 = vmatmul.mubr.bf16.vlgmr.msra.gmra.mxu0 %v179_v8  ;;  %4161 = vmatprep.mubr.bf16.mxu1 %v179_v8  ;;  %v5215_v12 = vadd.f32 %v3677_v0, %v136_v9 }
 0x144   :  { %368 = vmatprep.mubr.bf16.mxu0 %v4997_v39 }
 0x145   :  { %v180_v11 = vpack.c.bf16 %v5215_v12, %v5213_v10 }
 0x147   :  { %4162 = vmatmul.mubr.bf16.vlgmr.msra.gmra.mxu1 %v180_v11 }
 0x14b   :  { %369 = vmatmul.mubr.bf16.gmra.mxu0 %v180_v11 }
 0x203   :  { %v360_v18 = vpop.f32.mrf.mxu0 }
 0x204   :  { %v361_v25 = vadd.f32 %v360_v18, %v186_v19 }
 0x205   :  { %v362_v21 = vpop.f32.mrf.mxu0 }
 0x206   :  { %v363_v30 = vadd.f32 %v362_v21, %v190_v22 }
 0x207   :  { %v364_v23 = vpop.f32.mrf.mxu0  ;;  %v4163_v24 = vpop.f32.mrf.mxu1 }
 0x208   :  { %v365_v26 = vadd.f32 %v364_v23, %v186_v19  ;;  %v422_v35 = vadd.f32 %v4163_v24, %v194_v27 }
 0x209   :  { %v366_v28 = vpop.f32.mrf.mxu0  ;;  %v413_v29 = vpop.f32.mrf.mxu1 }
 0x20a   :  { %v367_v31 = vadd.f32 %v366_v28, %v190_v22  ;;  %v548_v32 = vpack.c.bf16 %v365_v26, %v361_v25  ;;  %v414_v42 = vadd.f32 %v413_v29, %v194_v27  ;;  %v4463_v57 = vpack.i.bf16 %v365_v26, %v361_v25 }
 0x20b   :  { %v370_v33 = vpop.f32.mrf.mxu0  ;;  %v4164_v34 = vpop.f32.mrf.mxu1 }
 0x20c   :  { %v425_v36 = vadd.f32 %v4164_v34, %v194_v27  ;;  %4181 = vmatprep.mubr.msk.bf16.mxu0 %vm572_vm0, %v548_v32  ;;  %v4438_v37 = vpack.i.bf16 %v367_v31, %v363_v30  ;;  %v5237_v41 = vpack.c.bf16 %v367_v31, %v363_v30  ;;  %v5244_v47 = vadd.f32 %v370_v33, %v186_v19 }
 0x20d   :  { %v372_v38 = vpop.f32.mrf.mxu0  ;;  %v416_v40 = vpop.f32.mrf.mxu1 }
 0x20e   :  { %v417_v43 = vadd.f32 %v416_v40, %v194_v27  ;;  %4439 = vrot.lane.b32.xlu1 %v4438_v37, %s4998_s20  ;;  %v5240_v44 = vpack.i.bf16 %v425_v36, %v422_v35  ;;  %v5242_v46 = vpack.c.bf16 %v425_v36, %v422_v35  ;;  %v373_v52 = vadd.f32 %v372_v38, %v190_v22 }
 0x20f   :  { %v374_v45 = vpop.f32.mrf.mxu0 }
 0x210   :  { %v5246_v48 = vadd.f32 %v374_v45, %v186_v19  ;;  %v5248_v49 = vpack.i.bf16 %v417_v43, %v414_v42  ;;  %v5250_v51 = vpack.c.bf16 %v417_v43, %v414_v42 }
 0x211   :  { %v376_v50 = vpop.f32.mrf.mxu0 }
 0x212   :  { %v549_v53 = vpack.c.bf16 %v5246_v48, %v5244_v47  ;;  %v377_v54 = vadd.f32 %v376_v50, %v190_v22  ;;  %v4468_v58 = vpack.i.bf16 %v5246_v48, %v5244_v47 }
 0x214   :  { %v4443_v55 = vpack.i.bf16 %v377_v54, %v373_v52  ;;  %v5254_v56 = vpack.c.bf16 %v377_v54, %v373_v52 }
 0x216   :  { %4444 = vrot.lane.b32.xlu1 %v4443_v55, %s4999_s21  ;;  %4434 = vrot.lane.b32.xlu0 %v4443_v55, %s4998_s20 }
 0x21a   :  { %4449 = vrot.lane.b32.xlu1 %v4438_v37, %s4999_s21  ;;  %4454 = vrot.lane.b32.xlu0 %v4443_v55, %s5000_s22 }
 0x21e   :  { %4459 = vrot.lane.b32.xlu1 %v4438_v37, %s5000_s22  ;;  %4464 = vrot.lane.b32.xlu0 %v4463_v57, %s5000_s22 }
 0x222   :  { %4474 = vrot.lane.b32.xlu0 %v4463_v57, %s4999_s21  ;;  %4469 = vrot.lane.b32.xlu1 %v4468_v58, %s5000_s22 }
 0x226   :  { %4484 = vrot.lane.b32.xlu0 %v4463_v57, %s4998_s20  ;;  %4479 = vrot.lane.b32.xlu1 %v4468_v58, %s4999_s21  ;;  %v601_v57 = vsel %vm572_vm0, %v5254_v56, 0 }
 0x22a   :  { %4494 = vrot.lane.b32.xlu0 %v5240_v44, %s4998_s20  ;;  %4489 = vrot.lane.b32.xlu1 %v4468_v58, %s4998_s20  ;;  %v598_v58 = vsel %vm572_vm0, %v5237_v41, 0 }
 0x22e   :  { %4499 = vrot.lane.b32.xlu1 %v5248_v49, %s4998_s20 }
 0x280   :  { %v4440_v59 = vpop.permute.xlu1 %4439 }
 0x281   :  { %v4442_v0 = vunpack.i.h.bf16 %v4440_v59  ;;  %v4441_v1 = vunpack.i.l.bf16 %v4440_v59 }
 0x283   :  { %v562_v7 = vpack.c.bf16 %v4442_v0, %v4441_v1 }
 0x285   :  { %v616_v22 = vsel %vm572_vm0, %v562_v7, 0 }
 0x288   :  { %v4445_v60 = vpop.permute.xlu1 %4444  ;;  %v4435_v61 = vpop.permute.xlu0 %4434 }
 0x289   :  { %v4437_v62 = vunpack.i.h.bf16 %v4435_v61  ;;  %v4436_v63 = vunpack.i.l.bf16 %v4435_v61  ;;  %v4447_v13 = vunpack.i.h.bf16 %v4445_v60  ;;  %v4446_v16 = vunpack.i.l.bf16 %v4445_v60 }
 0x28b   :  { %v563_v2 = vpack.c.bf16 %v4437_v62, %v4436_v63  ;;  %v561_v21 = vpack.c.bf16 %v4447_v13, %v4446_v16 }
 0x28c   :  { %v4450_v3 = vpop.permute.xlu1 %4449  ;;  %v4455_v6 = vpop.permute.xlu0 %4454 }
 0x28d   :  { %4413 = vmatprep.subr.msk.bf16.mxu0 %vm572_vm0, %v563_v2  ;;  %v619_v8 = vsel %vm572_vm0, %v563_v2, 0  ;;  %v4452_v25 = vunpack.i.h.bf16 %v4450_v3  ;;  %v4451_v26 = vunpack.i.l.bf16 %v4450_v3  ;;  %v613_v32 = vsel %vm572_vm0, %v561_v21, 0 }
 0x28e   :  { %4166 = vmatpush3.bf16.xpose.msra.mxu0 %v619_v8  ;;  %v4457_v37 = vunpack.i.h.bf16 %v4455_v6  ;;  %v4456_v38 = vunpack.i.l.bf16 %v4455_v6 }
 0x28f   :  { %4414 = vmatprep.subr.msk.bf16.mxu0 %vm572_vm0, %v562_v7  ;;  %v560_v31 = vpack.c.bf16 %v4452_v25, %v4451_v26 }
 0x290   :  { %v4460_v9 = vpop.permute.xlu1 %4459  ;;  %v4465_v11 = vpop.permute.xlu0 %4464  ;;  %v559_v42 = vpack.c.bf16 %v4457_v37, %v4456_v38  ;;  %v65_v37 = vld [vmem:[%s6378_s1 + $0x28] sm:$0xff] }
 0x291   :  { %v610_v43 = vsel %vm572_vm0, %v560_v31, 0  ;;  %v4462_v45 = vunpack.i.h.bf16 %v4460_v9  ;;  %v4461_v50 = vunpack.i.l.bf16 %v4460_v9  ;;  %v4467_v59 = vunpack.i.h.bf16 %v4465_v11 }
 0x292   :  { %v607_v54 = vsel %vm572_vm0, %v559_v42, 0  ;;  %v4466_v60 = vunpack.i.l.bf16 %v4465_v11  ;;  %v62_v11 = vld [vmem:[%s6378_s1 + $0x10] sm:$0xff] }
 0x293   :  { %v558_v52 = vpack.c.bf16 %v4462_v45, %v4461_v50  ;;  %v71_v50 = vld [vmem:[%s6378_s1 + $0x58] sm:$0xff] }
 0x294   :  { %v4475_v18 = vpop.permute.xlu0 %4474  ;;  %v4470_v19 = vpop.permute.xlu1 %4469  ;;  %v550_v61 = vpack.c.bf16 %v4467_v59, %v4466_v60  ;;  %v69_v59 = vld [vmem:[%s6378_s1 + $0x48] sm:$0xff] }
 0x295   :  { %v604_v55 = vsel %vm572_vm0, %v558_v52, 0  ;;  %v4472_v62 = vunpack.i.h.bf16 %v4470_v19  ;;  %v4477_v63 = vunpack.i.h.bf16 %v4475_v18  ;;  %v4476_v0 = vunpack.i.l.bf16 %v4475_v18 }
 0x296   :  { %4168 = vmatpush3.bf16.xpose.msra.mxu0 %v616_v22  ;;  %v61_v22 = vld [vmem:[%s6378_s1 + $0x8] sm:$0xff] }
 0x297   :  { %4415 = vmatprep.subr.msk.bf16.mxu0 %vm572_vm0, %v561_v21  ;;  %v552_v2 = vpack.c.bf16 %v4477_v63, %v4476_v0  ;;  %v75_v0 = vld [vmem:[%s6378_s1 + $0x78] sm:$0xff] }
 0x298   :  { %v4485_v23 = vpop.permute.xlu0 %4484  ;;  %v4480_v24 = vpop.permute.xlu1 %4479 }
 0x299   :  { %v4481_v3 = vunpack.i.l.bf16 %v4480_v24  ;;  %v4487_v6 = vunpack.i.h.bf16 %v4485_v23  ;;  %v4486_v7 = vunpack.i.l.bf16 %v4485_v23 }
 0x29b   :  { %v554_v47 = vpack.c.bf16 %v4487_v6, %v4486_v7  ;;  %v73_v7 = vld [vmem:[%s6378_s1 + $0x68] sm:$0xff] }
 0x29c   :  { %v4495_v27 = vpop.permute.xlu0 %4494  ;;  %v4490_v28 = vpop.permute.xlu1 %4489 }
 0x29d   :  { %v4497_v29 = vunpack.i.h.bf16 %v4495_v27  ;;  %v4496_v30 = vunpack.i.l.bf16 %v4495_v27  ;;  %v4492_v48 = vunpack.i.h.bf16 %v4490_v28 }
 0x29e   :  { %4170 = vmatpush3.bf16.xpose.msra.mxu0 %v613_v32 }
 0x29f   :  { %v571_v33 = vpack.c.bf16 %v4497_v29, %v4496_v30  ;;  %4416 = vmatprep.subr.msk.bf16.mxu0 %vm572_vm0, %v560_v31  ;;  %v66_v29 = vld [vmem:[%s6378_s1 + $0x30] sm:$0xff]  ;;  %v67_v31 = vld [vmem:[%s6378_s1 + $0x38] sm:$0xff] }
 0x2a0   :  { %v4500_v34 = vpop.permute.xlu1 %4499 }
 0x2a1   :  { %v4502_v35 = vunpack.i.h.bf16 %v4500_v34  ;;  %v4501_v36 = vunpack.i.l.bf16 %v4500_v34  ;;  %4197 = vmatprep.subr.bf16.mxu1 %v571_v33 }
 0x2a2   :  { %4198 = vmatpush3.bf16.msra.mxu1 %v571_v33 }
 0x2a3   :  { %v570_v40 = vpack.c.bf16 %v4502_v35, %v4501_v36  ;;  %v64_v35 = vld [vmem:[%s6378_s1 + $0x20] sm:$0xff] }
 0x2a5   :  { %4199 = vmatprep.subr.bf16.mxu1 %v570_v40 }
 0x2a6   :  { %4200 = vmatpush3.bf16.msra.mxu1 %v570_v40  ;;  %4172 = vmatpush3.bf16.xpose.msra.mxu0 %v610_v43  ;;  %v70_v43 = vld [vmem:[%s6378_s1 + $0x50] sm:$0xff] }
 0x2a7   :  { %4417 = vmatprep.subr.msk.bf16.mxu0 %vm572_vm0, %v559_v42 }
 0x2ae   :  { %4174 = vmatpush3.bf16.xpose.msra.mxu0 %v607_v54 }
 0x2af   :  { %4418 = vmatprep.subr.msk.bf16.mxu0 %vm572_vm0, %v558_v52 }
 0x2b6   :  { %4176 = vmatpush3.bf16.xpose.msra.mxu0 %v604_v55 }
 0x2b7   :  { %4419 = vmatprep.subr.msk.bf16.mxu0 %vm572_vm0, %v5254_v56  ;;  %v4471_v56 = vunpack.i.l.bf16 %v4470_v19  ;;  %v60_v19 = vld [vmem:[%s6378_s1] sm:$0xff] }
 0x2b9   :  { %v551_v1 = vpack.c.bf16 %v4472_v62, %v4471_v56  ;;  %v74_v56 = vld [vmem:[%s6378_s1 + $0x70] sm:$0xff] }
 0x2be   :  { %4178 = vmatpush3.bf16.xpose.msra.mxu0 %v601_v57  ;;  %v68_v57 = vld [vmem:[%s6378_s1 + $0x40] sm:$0xff] }
 0x2bf   :  { %4420 = vmatprep.subr.msk.bf16.mxu0 %vm572_vm0, %v5237_v41  ;;  %v4482_v41 = vunpack.i.h.bf16 %v4480_v24  ;;  %v63_v24 = vld [vmem:[%s6378_s1 + $0x18] sm:$0xff] }
 0x2c1   :  { %v553_v8 = vpack.c.bf16 %v4482_v41, %v4481_v3  ;;  %v72_v3 = vld [vmem:[%s6378_s1 + $0x60] sm:$0xff] }
 0x2c6   :  { %4180 = vmatpush3.bf16.xpose.msra.mxu0 %v598_v58 }
 0x2cd   :  { %4182 = vmatmul.mubr.msk.bf16.vlgmr.msra.gmra.mxu0 %vm572_vm0, %v549_v53  ;;  %v4491_v53 = vunpack.i.l.bf16 %v4490_v28 }
 0x2ce   :  { %4185 = vmatprep.mubr.msk.bf16.mxu0 %vm572_vm0, %v550_v61 }
 0x2cf   :  { %v555_v9 = vpack.c.bf16 %v4492_v48, %v4491_v53 }
 0x2d5   :  { %4186 = vmatmul.mubr.msk.bf16.gmra.mxu0 %vm572_vm0, %v551_v1 }
 0x2d6   :  { %4189 = vmatprep.mubr.msk.bf16.mxu0 %vm572_vm0, %v552_v2 }
 0x2dd   :  { %4190 = vmatmul.mubr.msk.bf16.gmra.mxu0 %vm572_vm0, %v553_v8 }
 0x2de   :  { %4193 = vmatprep.mubr.msk.bf16.mxu0 %vm572_vm0, %v554_v47 }
 0x2e5   :  { %4194 = vmatmul.mubr.msk.bf16.gmra.mxu0 %vm572_vm0, %v555_v9 }
 0x2e6   :  { %1490 = vmatprep.mubr.bf16.mxu0 %v4997_v39 }
 0x38d   :  { %v4183_v13 = vpop.f32.mrf.mxu0 }
 0x38e   :  { %v5307_v16 = vadd.f32 %v4183_v13, %v62_v11 }
 0x38f   :  { %v655_v18 = vpop.f32.mrf.mxu0 }
 0x390   :  { %722 = vmax.xlane.f32.xlu0 %v5307_v16  ;;  %v5316_v23 = vadd.f32 %v655_v18, %v60_v19 }
 0x391   :  { %v4184_v21 = vpop.f32.mrf.mxu0 }
 0x392   :  { %v5324_v28 = vadd.f32 %v4184_v21, %v63_v24 }
 0x393   :  { %v658_v25 = vpop.f32.mrf.mxu0 }
 0x394   :  { %v5321_v26 = vadd.f32 %v658_v25, %v61_v22  ;;  %718 = vmax.xlane.f32.xlu0 %v5316_v23 }
 0x395   :  { %v4187_v27 = vpop.f32.mrf.mxu0 }
 0x396   :  { %720 = vmax.xlane.f32.xlu1 %v5321_v26  ;;  %v5334_v33 = vadd.f32 %v4187_v27, %v66_v29 }
 0x397   :  { %v671_v30 = vpop.f32.mrf.mxu0 }
 0x398   :  { %724 = vmax.xlane.f32.xlu0 %v5324_v28  ;;  %v672_v40 = vadd.f32 %v671_v30, %v64_v35 }
 0x399   :  { %v4188_v32 = vpop.f32.mrf.mxu0 }
 0x39a   :  { %v5336_v34 = vadd.f32 %v4188_v32, %v67_v31 }
 0x39b   :  { %v674_v36 = vpop.f32.mrf.mxu0 }
 0x39c   :  { %732 = vmax.xlane.f32.xlu1 %v5336_v34  ;;  %730 = vmax.xlane.f32.xlu0 %v5334_v33  ;;  %v5346_v42 = vadd.f32 %v674_v36, %v65_v37 }
 0x39d   :  { %v4191_v38 = vpop.f32.mrf.mxu0 }
 0x39e   :  { %v5355_v54 = vadd.f32 %v4191_v38, %v70_v43 }
 0x39f   :  { %v687_v45 = vpop.f32.mrf.mxu0 }
 0x3a0   :  { %728 = vmax.xlane.f32.xlu1 %v5346_v42  ;;  %726 = vmax.xlane.f32.xlu0 %v672_v40  ;;  %v5367_v61 = vadd.f32 %v687_v45, %v68_v57 }
 0x3a1   :  { %v4192_v52 = vpop.f32.mrf.mxu0 }
 0x3a2   :  { %v5357_v55 = vadd.f32 %v4192_v52, %v71_v50 }
 0x3a3   :  { %v690_v58 = vpop.f32.mrf.mxu0 }
 0x3a4   :  { %740 = vmax.xlane.f32.xlu1 %v5357_v55  ;;  %738 = vmax.xlane.f32.xlu0 %v5355_v54  ;;  %v5369_v62 = vadd.f32 %v690_v58, %v69_v59 }
 0x3a5   :  { %v4195_v60 = vpop.f32.mrf.mxu0 }
 0x3a6   :  { %v5379_v2 = vadd.f32 %v4195_v60, %v74_v56 }
 0x3a7   :  { %v703_v63 = vpop.f32.mrf.mxu0 }
 0x3a8   :  { %736 = vmax.xlane.f32.xlu1 %v5369_v62  ;;  %734 = vmax.xlane.f32.xlu0 %v5367_v61  ;;  %v5391_v8 = vadd.f32 %v703_v63, %v72_v3 }
 0x3a9   :  { %v4196_v1 = vpop.f32.mrf.mxu0 }
 0x3aa   :  { %v5381_v41 = vadd.f32 %v4196_v1, %v75_v0 }
 0x3ab   :  { %v706_v6 = vpop.f32.mrf.mxu0 }
 0x3ac   :  { %748 = vmax.xlane.f32.xlu1 %v5381_v41  ;;  %746 = vmax.xlane.f32.xlu0 %v5379_v2  ;;  %v5393_v47 = vadd.f32 %v706_v6, %v73_v7 }
 0x3b0   :  { %744 = vmax.xlane.f32.xlu1 %v5393_v47  ;;  %742 = vmax.xlane.f32.xlu0 %v5391_v8 }
 0x3c1   :  { %4509 = vrot.lane.b32.xlu1 %v5248_v49, %s4999_s21 }
 0x3c6   :  { %4504 = vrot.lane.b32.xlu0 %v5240_v44, %s4999_s21 }
 0x419   :  { %v723_v48 = vpop.xlane.xlu0 %722 }
 0x41a   :  { %v752_v53 = vsub.f32 %v5307_v16, %v723_v48 }
 0x41c   :  { %v770_v9 = vmul.f32 1.442695, %v752_v53 }
 0x41d   :  { %v719_v11 = vpop.xlane.xlu0 %718 }
 0x41e   :  { %4789 = vpow2.f32 %v770_v9  ;;  %v750_v13 = vsub.f32 %v5316_v23, %v719_v11 }
 0x41f   :  { %v721_v18 = vpop.xlane.xlu1 %720 }
 0x420   :  { %v766_v19 = vmul.f32 1.442695, %v750_v13  ;;  %v751_v22 = vsub.f32 %v5321_v26, %v721_v18 }
 0x421   :  { %v725_v21 = vpop.xlane.xlu0 %724 }
 0x422   :  { %4791 = vpow2.f32 %v766_v19  ;;  %v753_v24 = vsub.f32 %v5324_v28, %v725_v21  ;;  %v768_v30 = vmul.f32 1.442695, %v751_v22 }
 0x424   :  { %v772_v25 = vmul.f32 1.442695, %v753_v24 }
 0x425   :  { %v733_v27 = vpop.xlane.xlu1 %732  ;;  %v731_v29 = vpop.xlane.xlu0 %730 }
 0x426   :  { %4793 = vpow2.f32 %v772_v25  ;;  %v757_v23 = vsub.f32 %v5336_v34, %v733_v27  ;;  %v756_v11 = vsub.f32 %v5334_v33, %v731_v29 }
 0x427   :  { %4795 = vpow2.f32 %v768_v30 }
 0x428   :  { %v780_v28 = vmul.f32 1.442695, %v757_v23  ;;  %v778_v13 = vmul.f32 1.442695, %v756_v11 }
 0x429   :  { %v729_v31 = vpop.xlane.xlu1 %728  ;;  %v727_v16 = vpop.xlane.xlu0 %726 }
 0x42a   :  { %v754_v32 = vsub.f32 %v672_v40, %v727_v16  ;;  %v755_v43 = vsub.f32 %v5346_v42, %v729_v31 }
 0x42b   :  { %v5405_v35 = vpop.eup %4789 }
 0x42c   :  { %v774_v36 = vmul.f32 1.442695, %v754_v32  ;;  %802 = vadd.xlane.f32.xlu0 %v5405_v35  ;;  %v776_v52 = vmul.f32 1.442695, %v755_v43 }
 0x42d   :  { %v741_v37 = vpop.xlane.xlu1 %740  ;;  %v739_v26 = vpop.xlane.xlu0 %738 }
 0x42e   :  { %4797 = vpow2.f32 %v774_v36  ;;  %v760_v19 = vsub.f32 %v5355_v54, %v739_v26 }
 0x42f   :  { %v5409_v38 = vpop.eup %4791  ;;  %4799 = vpow2.f32 %v780_v28 }
 0x430   :  { %798 = vadd.xlane.f32.xlu1 %v5409_v38  ;;  %4801 = vpow2.f32 %v776_v52  ;;  %v786_v22 = vmul.f32 1.442695, %v760_v19 }
 0x431   :  { %v737_v45 = vpop.xlane.xlu1 %736  ;;  %v735_v50 = vpop.xlane.xlu0 %734  ;;  %4803 = vpow2.f32 %v778_v13 }
 0x432   :  { %v758_v18 = vsub.f32 %v5367_v61, %v735_v50 }
 0x433   :  { %v5413_v40 = vpop.eup %4793 }
 0x434   :  { %804 = vadd.xlane.f32.xlu1 %v5413_v40  ;;  %v5416_v58 = vpop.eup %4795  ;;  %v782_v21 = vmul.f32 1.442695, %v758_v18 }
 0x435   :  { %v749_v34 = vpop.xlane.xlu1 %748  ;;  %v747_v57 = vpop.xlane.xlu0 %746 }
 0x436   :  { %4805 = vpow2.f32 %v782_v21  ;;  %v764_v54 = vsub.f32 %v5379_v2, %v747_v57  ;;  %v765_v31 = vsub.f32 %v5381_v41, %v749_v34 }
 0x437   :  { %4807 = vpow2.f32 %v786_v22 }
 0x438   :  { %800 = vadd.xlane.f32.xlu1 %v5416_v58  ;;  %v794_v30 = vmul.f32 1.442695, %v764_v54  ;;  %v796_v2 = vmul.f32 1.442695, %v765_v31 }
 0x439   :  { %v745_v59 = vpop.xlane.xlu1 %744  ;;  %v743_v42 = vpop.xlane.xlu0 %742 }
 0x43a   :  { %v762_v25 = vsub.f32 %v5391_v8, %v743_v42  ;;  %v763_v33 = vsub.f32 %v5393_v47, %v745_v59 }
 0x43b   :  { %v5419_v60 = vpop.eup %4797 }
 0x43c   :  { %806 = vadd.xlane.f32.xlu1 %v5419_v60  ;;  %v5422_v7 = vpop.eup %4799  ;;  %v790_v27 = vmul.f32 1.442695, %v762_v25  ;;  %v792_v29 = vmul.f32 1.442695, %v763_v33 }
 0x43d   :  { %v4510_v56 = vpop.permute.xlu1 %4509  ;;  %v4505_v63 = vpop.permute.xlu0 %4504 }
 0x43e   :  { %v4507_v0 = vunpack.i.h.bf16 %v4505_v63  ;;  %v4512_v1 = vunpack.i.h.bf16 %v4510_v56  ;;  %v4511_v3 = vunpack.i.l.bf16 %v4510_v56  ;;  %v4506_v6 = vunpack.i.l.bf16 %v4505_v63  ;;  %v5427_v9 = vpop.eup %4801 }
 0x43f   :  { %v5438_v61 = vpop.eup %4803 }
 0x440   :  { %v569_v48 = vpack.c.bf16 %v4507_v0, %v4506_v6  ;;  %812 = vadd.xlane.f32.xlu1 %v5422_v7  ;;  %v568_v53 = vpack.c.bf16 %v4512_v1, %v4511_v3 }
 0x442   :  { %4514 = vrot.lane.b32.xlu0 %v5240_v44, %s5000_s22  ;;  %4201 = vmatprep.subr.bf16.mxu1 %v569_v48  ;;  %v761_v44 = vsub.f32 %v5357_v55, %v741_v37  ;;  %v759_v55 = vsub.f32 %v5369_v62, %v737_v45 }
 0x443   :  { %4202 = vmatpush3.bf16.msra.mxu1 %v569_v48 }
 0x444   :  { %808 = vadd.xlane.f32.xlu1 %v5427_v9  ;;  %4203 = vmatprep.subr.bf16.mxu1 %v568_v53  ;;  %v788_v24 = vmul.f32 1.442695, %v761_v44  ;;  %v784_v47 = vmul.f32 1.442695, %v759_v55 }
 0x446   :  { %4809 = vpow2.f32 %v788_v24 }
 0x447   :  { %4204 = vmatpush3.bf16.msra.mxu1 %v568_v53  ;;  %4811 = vpow2.f32 %v790_v27 }
 0x448   :  { %4813 = vpow2.f32 %v792_v29 }
 0x449   :  { %4815 = vpow2.f32 %v794_v30 }
 0x44a   :  { %4817 = vpow2.f32 %v784_v47 }
 0x44b   :  { %4819 = vpow2.f32 %v796_v2 }
 0x455   :  { %4519 = vrot.lane.b32.xlu1 %v5248_v49, %s5000_s22  ;;  %v5442_v49 = vpop.eup %4805 }
 0x456   :  { %v5446_v8 = vpop.eup %4807 }
 0x457   :  { %v5450_v16 = vpop.eup %4809 }
 0x458   :  { %v5453_v32 = vpop.eup %4811 }
 0x459   :  { %v5456_v62 = vpop.eup %4813 }
 0x45a   :  { %v5459_v23 = vpop.eup %4815 }
 0x45b   :  { %v5461_v41 = vpop.eup %4817 }
 0x45c   :  { %v5465_v36 = vpop.eup %4819 }
 0x461   :  { %810 = vadd.xlane.f32.xlu0 %v5438_v61 }
 0x465   :  { %814 = vadd.xlane.f32.xlu0 %v5442_v49 }
 0x469   :  { %818 = vadd.xlane.f32.xlu0 %v5446_v8 }
 0x46d   :  { %820 = vadd.xlane.f32.xlu0 %v5450_v16 }
 0x471   :  { %822 = vadd.xlane.f32.xlu0 %v5453_v32 }
 0x475   :  { %824 = vadd.xlane.f32.xlu0 %v5456_v62 }
 0x479   :  { %826 = vadd.xlane.f32.xlu0 %v5459_v23  ;;  %816 = vadd.xlane.f32.xlu1 %v5461_v41 }
 0x47d   :  { %828 = vadd.xlane.f32.xlu1 %v5465_v36 }
 0x4b5   :  { %v803_v37 = vpop.xlane.xlu0 %802 }
 0x4b9   :  { %v799_v26 = vpop.xlane.xlu1 %798  ;;  %v4515_v28 = vpop.permute.xlu0 %4514 }
 0x4ba   :  { %v4517_v43 = vunpack.i.h.bf16 %v4515_v28  ;;  %v4516_v45 = vunpack.i.l.bf16 %v4515_v28  ;;  %4821 = vrcp.f32 %v799_v26 }
 0x4bc   :  { %v567_v50 = vpack.c.bf16 %v4517_v43, %v4516_v45 }
 0x4bd   :  { %v805_v52 = vpop.xlane.xlu1 %804 }
 0x4be   :  { %4205 = vmatprep.subr.bf16.mxu1 %v567_v50 }
 0x4bf   :  { %4206 = vmatpush3.bf16.msra.mxu1 %v567_v50 }
 0x4c1   :  { %v801_v34 = vpop.xlane.xlu1 %800 }
 0x4c2   :  { %4823 = vrcp.f32 %v801_v34 }
 0x4c3   :  { %4825 = vrcp.f32 %v805_v52 }
 0x4c4   :  { %4827 = vrcp.f32 %v803_v37 }
 0x4c5   :  { %v807_v57 = vpop.xlane.xlu1 %806 }
 0x4c7   :  { %v4822_v42 = vpop.eup %4821 }
 0x4c8   :  { %v846_v0 = vmul.f32 %v4822_v42, %v5409_v38 }
 0x4c9   :  { %v813_v59 = vpop.xlane.xlu1 %812 }
 0x4cd   :  { %v809_v56 = vpop.xlane.xlu1 %808 }
 0x4ce   :  { %4829 = vrcp.f32 %v809_v56 }
 0x4cf   :  { %v4824_v63 = vpop.eup %4823  ;;  %4831 = vrcp.f32 %v807_v57 }
 0x4d0   :  { %v847_v1 = vmul.f32 %v4824_v63, %v5416_v58  ;;  %v4826_v13 = vpop.eup %4825  ;;  %4833 = vrcp.f32 %v813_v59 }
 0x4d1   :  { %v4520_v3 = vpop.permute.xlu1 %4519  ;;  %v4828_v18 = vpop.eup %4827  ;;  %v849_v38 = vmul.f32 %v4826_v13, %v5413_v40 }
 0x4d2   :  { %v862_v6 = vpack.c.bf16 %v847_v1, %v846_v0  ;;  %v4522_v48 = vunpack.i.h.bf16 %v4520_v3  ;;  %v4521_v53 = vunpack.i.l.bf16 %v4520_v3  ;;  %v848_v44 = vmul.f32 %v4828_v18, %v5405_v35 }
 0x4d4   :  { %4213 = vmatprep.mubr.bf16.mxu1 %v862_v6  ;;  %v566_v11 = vpack.c.bf16 %v4522_v48, %v4521_v53  ;;  %v863_v24 = vpack.c.bf16 %v849_v38, %v848_v44  ;;  %v4649_v38 = vld [vmem:[%s6379_s6 + $0x28] sm:$0xff]   ;;  %v4650_v44 = vld [vmem:[%s6379_s6 + $0x20] sm:$0xff]  }
 0x4d6   :  { %4207 = vmatprep.subr.bf16.mxu1 %v566_v11 }
 0x4d7   :  { %4208 = vmatpush3.bf16.msra.mxu1 %v566_v11 }
 0x4d8   :  { %4209 = vmatprep.subr.bf16.mxu1 %v5242_v46 }
 0x4db   :  { %v4830_v19 = vpop.eup %4829  ;;  %4210 = vmatpush3.bf16.msra.mxu1 %v5242_v46 }
 0x4dc   :  { %v4832_v21 = vpop.eup %4831  ;;  %4211 = vmatprep.subr.bf16.mxu1 %v5250_v51  ;;  %v851_v58 = vmul.f32 %v4830_v19, %v5427_v9  ;;  %v4648_v19 = vld [vmem:[%s6379_s6] sm:$0xff]  }
 0x4dd   :  { %v850_v22 = vmul.f32 %v4832_v21, %v5419_v60  ;;  %v4834_v54 = vpop.eup %4833 }
 0x4de   :  { %v853_v35 = vmul.f32 %v4834_v54, %v5422_v7 }
 0x4df   :  { %4212 = vmatpush3.bf16.msra.mxu1 %v5250_v51  ;;  %v864_v25 = vpack.c.bf16 %v851_v58, %v850_v22  ;;  %v4651_v22 = vld [vmem:[%s6379_s6 + $0x38] sm:$0xff]  }
 0x4e2   :  { %4214 = vmatmul.mubr.bf16.vlgmr.msra.gmra.mxu1 %v863_v24 }
 0x4e3   :  { %4217 = vmatprep.mubr.bf16.mxu1 %v864_v25 }
 0x4ea   :  { %v811_v33 = vpop.xlane.xlu0 %810 }
 0x4eb   :  { %4835 = vrcp.f32 %v811_v33 }
 0x4ee   :  { %v815_v46 = vpop.xlane.xlu0 %814 }
 0x4ef   :  { %4837 = vrcp.f32 %v815_v46 }
 0x4f2   :  { %v819_v27 = vpop.xlane.xlu0 %818 }
 0x4f3   :  { %4839 = vrcp.f32 %v819_v27 }
 0x4f6   :  { %v821_v29 = vpop.xlane.xlu0 %820 }
 0x4f7   :  { %4841 = vrcp.f32 %v821_v29 }
 0x4f8   :  { %v4836_v40 = vpop.eup %4835 }
 0x4f9   :  { %v852_v9 = vmul.f32 %v4836_v40, %v5438_v61  ;;  %v4652_v40 = vld [vmem:[%s6379_s6 + $0x30] sm:$0xff]  }
 0x4fa   :  { %v823_v55 = vpop.xlane.xlu0 %822 }
 0x4fb   :  { %v865_v51 = vpack.c.bf16 %v853_v35, %v852_v9 }
 0x4fc   :  { %v4838_v2 = vpop.eup %4837 }
 0x4fd   :  { %4218 = vmatmul.mubr.bf16.gmra.mxu1 %v865_v51  ;;  %v854_v45 = vmul.f32 %v4838_v2, %v5442_v49 }
 0x4fe   :  { %v825_v60 = vpop.xlane.xlu0 %824 }
 0x4ff   :  { %4843 = vrcp.f32 %v825_v60 }
 0x500   :  { %4845 = vrcp.f32 %v823_v55  ;;  %v4840_v37 = vpop.eup %4839 }
 0x501   :  { %v856_v34 = vmul.f32 %v4840_v37, %v5446_v8  ;;  %v4645_v8 = vld [vmem:[%s6379_s6 + $0x18] sm:$0xff]  }
 0x502   :  { %v817_v30 = vpop.xlane.xlu1 %816  ;;  %v827_v31 = vpop.xlane.xlu0 %826  ;;  %4229 = vmatprep.subr.bf16.mxu1 %v4645_v8 }
 0x503   :  { %4847 = vrcp.f32 %v817_v30  ;;  %4230 = vmatpush3.bf16.msra.mxu1 %v4645_v8 }
 0x504   :  { %v4842_v61 = vpop.eup %4841 }
 0x505   :  { %v857_v43 = vmul.f32 %v4842_v61, %v5450_v16 }
 0x506   :  { %v829_v47 = vpop.xlane.xlu1 %828 }
 0x507   :  { %4849 = vrcp.f32 %v829_v47  ;;  %v867_v42 = vpack.c.bf16 %v857_v43, %v856_v34 }
 0x508   :  { %4851 = vrcp.f32 %v827_v31 }
 0x50c   :  { %v4844_v26 = vpop.eup %4843 }
 0x50d   :  { %v4846_v7 = vpop.eup %4845  ;;  %v859_v52 = vmul.f32 %v4844_v26, %v5456_v62  ;;  %v4647_v62 = vld [vmem:[%s6379_s6 + $0x8] sm:$0xff]  }
 0x50e   :  { %v858_v59 = vmul.f32 %v4846_v7, %v5453_v32  ;;  %v4646_v32 = vld [vmem:[%s6379_s6 + $0x10] sm:$0xff]  }
 0x50f   :  { %4231 = vmatprep.subr.bf16.mxu1 %v4646_v32 }
 0x510   :  { %v4848_v28 = vpop.eup %4847  ;;  %v868_v63 = vpack.c.bf16 %v859_v52, %v858_v59  ;;  %4232 = vmatpush3.bf16.msra.mxu1 %v4646_v32 }
 0x511   :  { %v855_v50 = vmul.f32 %v4848_v28, %v5461_v41  ;;  %4237 = vmatprep.subr.bf16.mxu1 %v4647_v62 }
 0x513   :  { %v866_v57 = vpack.c.bf16 %v855_v50, %v854_v45 }
 0x514   :  { %v4850_v56 = vpop.eup %4849 }
 0x515   :  { %4221 = vmatprep.mubr.bf16.mxu1 %v866_v57  ;;  %v4852_v0 = vpop.eup %4851  ;;  %v861_v16 = vmul.f32 %v4850_v56, %v5465_v36 }
 0x516   :  { %4222 = vmatmul.mubr.bf16.gmra.mxu1 %v867_v42  ;;  %v860_v49 = vmul.f32 %v4852_v0, %v5459_v23 }
 0x517   :  { %4225 = vmatprep.mubr.bf16.mxu1 %v868_v63 }
 0x518   :  { %v869_v1 = vpack.c.bf16 %v861_v16, %v860_v49 }
 0x51e   :  { %4226 = vmatmul.mubr.bf16.gmra.mxu1 %v869_v1  ;;  %v3726_v1 = vld [vmem:[%s6380_s7] ss:$0 sm:$0xff] }
 0x5a2   :  { %v4215_v23 = vpop.f32.mrf.mxu1 }
 0x5a4   :  { %v904_v41 = vpop.f32.mrf.mxu1 }
 0x5a6   :  { %v4216_v36 = vpop.f32.mrf.mxu1 }
 0x5a7   :  { %v968_v58 = vpack.c.bf16 %v4216_v36, %v4215_v23 }
 0x5a8   :  { %v907_v3 = vpop.f32.mrf.mxu1 }
 0x5a9   :  { %v967_v21 = vpack.c.bf16 %v907_v3, %v904_v41 }
 0x5bd   :  { %v4219_v6 = vpop.f32.mrf.mxu1 }
 0x5bf   :  { %v920_v48 = vpop.f32.mrf.mxu1 }
 0x5c1   :  { %v4220_v53 = vpop.f32.mrf.mxu1 }
 0x5c2   :  { %v970_v18 = vpack.c.bf16 %v4220_v53, %v4219_v6 }
 0x5c3   :  { %v923_v11 = vpop.f32.mrf.mxu1 }
 0x5c4   :  { %v969_v13 = vpack.c.bf16 %v923_v11, %v920_v48 }
 0x5c6   :  { %4233 = vmatprep.mubr.msk.bf16.mxu1 %vm572_vm0, %v969_v13 }
 0x5c7   :  { %4234 = vmatmul.mubr.msk.bf16.vlgmr.msra.gmra.mxu1 %vm572_vm0, %v970_v18 }
 0x5c8   :  { %4238 = vmatpush3.bf16.msra.mxu1 %v4647_v62  ;;  %4241 = vmatprep.mubr.msk.bf16.mxu1 %vm572_vm0, %v967_v21  ;;  %v4653_v21 = vld [vmem:[%s6381_s10 + $0x70] ss:$8 sps:$4 sm:$0xff]  }
 0x5c9   :  { %4239 = vmatprep.subr.bf16.mxu1 %v4648_v19 }
 0x5cc   :  { %4240 = vmatpush3.bf16.msra.mxu1 %v4648_v19 }
 0x5cd   :  { %4245 = vmatprep.subr.bf16.mxu1 %v4649_v38 }
 0x5cf   :  { %4242 = vmatmul.mubr.msk.bf16.vlgmr.msra.gmra.mxu1 %vm572_vm0, %v968_v58 }
 0x5d0   :  { %4246 = vmatpush3.bf16.msra.mxu1 %v4649_v38 }
 0x5d1   :  { %4247 = vmatprep.subr.bf16.mxu1 %v4650_v44 }
 0x5d4   :  { %4248 = vmatpush3.bf16.msra.mxu1 %v4650_v44 }
 0x5d5   :  { %4253 = vmatprep.subr.bf16.mxu1 %v4651_v22 }
 0x5d6   :  { %v4223_v24 = vpop.f32.mrf.mxu1 }
 0x5d8   :  { %v936_v25 = vpop.f32.mrf.mxu1 }
 0x5da   :  { %v4224_v33 = vpop.f32.mrf.mxu1 }
 0x5db   :  { %v972_v54 = vpack.c.bf16 %v4224_v33, %v4223_v24 }
 0x5dc   :  { %v939_v46 = vpop.f32.mrf.mxu1 }
 0x5dd   :  { %v971_v27 = vpack.c.bf16 %v939_v46, %v936_v25 }
 0x5de   :  { %v4227_v29 = vpop.f32.mrf.mxu1 }
 0x5df   :  { %4249 = vmatprep.mubr.msk.bf16.mxu1 %vm572_vm0, %v971_v27 }
 0x5e0   :  { %v952_v9 = vpop.f32.mrf.mxu1  ;;  %4250 = vmatmul.mubr.msk.bf16.vlgmr.msra.gmra.mxu1 %vm572_vm0, %v972_v54 }
 0x5e1   :  { %4254 = vmatpush3.bf16.msra.mxu1 %v4651_v22 }
 0x5e2   :  { %v4228_v35 = vpop.f32.mrf.mxu1  ;;  %4255 = vmatprep.subr.bf16.mxu1 %v4652_v40 }
 0x5e3   :  { %v974_v60 = vpack.c.bf16 %v4228_v35, %v4227_v29  ;;  %v4658_v35 = vld [vmem:[%s6381_s10 + $0x64] ss:$8 sps:$4 sm:$0xff]  }
 0x5e4   :  { %v955_v55 = vpop.f32.mrf.mxu1 }
 0x5e5   :  { %v973_v51 = vpack.c.bf16 %v955_v55, %v952_v9  ;;  %4256 = vmatpush3.bf16.msra.mxu1 %v4652_v40  ;;  %v4656_v55 = vld [vmem:[%s6381_s10 + $0x60] ss:$8 sps:$4 sm:$0xff]  }
 0x5e7   :  { %4257 = vmatprep.mubr.msk.bf16.mxu1 %vm572_vm0, %v973_v51  ;;  %v4661_v51 = vld [vmem:[%s6381_s10 + $0x54] ss:$8 sps:$4 sm:$0xff]  }
 0x5e8   :  { %4258 = vmatmul.mubr.msk.bf16.vlgmr.msra.gmra.mxu1 %vm572_vm0, %v974_v60  ;;  %v4659_v60 = vld [vmem:[%s6381_s10 + $0x50] ss:$8 sps:$4 sm:$0xff]  }
 0x687   :  { %v4235_v30 = vpop.f32.mrf.mxu1 }
 0x689   :  { %v1043_v47 = vpop.f32.mrf.mxu1 }
 0x68b   :  { %v4236_v31 = vpop.f32.mrf.mxu1 }
 0x68d   :  { %v1046_v2 = vpop.f32.mrf.mxu1 }
 0x68f   :  { %v4243_v37 = vpop.f32.mrf.mxu1 }
 0x690   :  { %v1119_v52 = vadd.f32 %v4243_v37, %v4235_v30  ;;  %v4664_v30 = vld [vmem:[%s6381_s10 + $0x44] ss:$8 sps:$4 sm:$0xff]  }
 0x691   :  { %v1110_v61 = vpop.f32.mrf.mxu1  ;;  %v4670_v37 = vld [vmem:[%s6381_s10 + $0x24] ss:$8 sps:$4 sm:$0xff]  }
 0x692   :  { %v1111_v34 = vadd.f32 %v1110_v61, %v1043_v47  ;;  %v4662_v47 = vld [vmem:[%s6381_s10 + $0x40] ss:$8 sps:$4 sm:$0xff]  }
 0x693   :  { %v4244_v26 = vpop.f32.mrf.mxu1  ;;  %v4668_v61 = vld [vmem:[%s6381_s10 + $0x20] ss:$8 sps:$4 sm:$0xff]  }
 0x694   :  { %v1122_v63 = vadd.f32 %v4244_v26, %v4236_v31  ;;  %v4667_v31 = vld [vmem:[%s6381_s10 + $0x34] ss:$8 sps:$4 sm:$0xff]  }
 0x695   :  { %v1113_v7 = vpop.f32.mrf.mxu1  ;;  %v4673_v26 = vld [vmem:[%s6381_s10 + $0x14] ss:$8 sps:$4 sm:$0xff]  }
 0x696   :  { %v1114_v0 = vadd.f32 %v1113_v7, %v1046_v2  ;;  %v4665_v2 = vld [vmem:[%s6381_s10 + $0x30] ss:$8 sps:$4 sm:$0xff]  }
 0x697   :  { %v4671_v7 = vld [vmem:[%s6381_s10 + $0x10] ss:$8 sps:$4 sm:$0xff]  }
 0x6a0   :  { %v4251_v28 = vpop.f32.mrf.mxu1 }
 0x6a1   :  { %v1194_v59 = vadd.f32 %v4251_v28, %v1119_v52  ;;  %v4676_v28 = vld [vmem:[%s6381_s10 + $0x4] ss:$8 sps:$4 sm:$0xff]  }
 0x6a2   :  { %v1177_v43 = vpop.f32.mrf.mxu1 }
 0x6a3   :  { %v1192_v42 = vadd.f32 %v1177_v43, %v1111_v34  ;;  %v4674_v43 = vld [vmem:[%s6381_s10] ss:$8 sps:$4 sm:$0xff]  }
 0x6a4   :  { %v4252_v45 = vpop.f32.mrf.mxu1 }
 0x6a5   :  { %v1195_v32 = vadd.f32 %v4252_v45, %v1122_v63 }
 0x6a6   :  { %v1180_v50 = vpop.f32.mrf.mxu1 }
 0x6a7   :  { %v1193_v62 = vadd.f32 %v1180_v50, %v1114_v0 }
 0x6a8   :  { %v4259_v57 = vpop.f32.mrf.mxu1 }
 0x6a9   :  { %v1265_v16 = vadd.f32 %v4259_v57, %v1194_v59 }
 0x6aa   :  { %v1248_v56 = vpop.f32.mrf.mxu1 }
 0x6ab   :  { %v1263_v49 = vadd.f32 %v1248_v56, %v1192_v42  ;;  %v1276_v36 = vadd.f32 %v3726_v1, %v1265_v16 }
 0x6ac   :  { %v4260_v8 = vpop.f32.mrf.mxu1 }
 0x6ad   :  { %v1274_v23 = vadd.f32 %v3726_v1, %v1263_v49  ;;  %v1266_v3 = vadd.f32 %v4260_v8, %v1195_v32  ;;  %v1280_v13 = vadd.f32 %v1276_v36, %v5213_v10  ;;  %v3727_v32 = vld [vmem:[%s6382_s8] ss:$0 sm:$0xff] }
 0x6ae   :  { %v1251_v41 = vpop.f32.mrf.mxu1 }
 0x6af   :  { %v1264_v6 = vadd.f32 %v1251_v41, %v1193_v62  ;;  %v1278_v48 = vadd.f32 %v1274_v23, %v5206_v4  ;;  %v1277_v11 = vadd.f32 %v3726_v1, %v1266_v3  ;;  %v4655_v4 = vld [vmem:[%s6381_s10 + $0x74] ss:$8 sps:$4 sm:$0xff]   ;;  %v3728_v3 = vld [vmem:[%s6383_s9] ss:$0 sm:$0xff] }
 0x6b0   :  { %1458 = vmatprep.subr.bf16.mxu0 %v4655_v4 }
 0x6b1   :  { %v1275_v53 = vadd.f32 %v3726_v1, %v1264_v6  ;;  %1284 = vadd.xlane.f32.xlu0 %v1278_v48  ;;  %v1281_v19 = vadd.f32 %v1277_v11, %v5215_v12  ;;  %1459 = vmatpush1.bf16.msra.mxu0 %v4653_v21 }
 0x6b2   :  { %1460 = vmatprep.subr.bf16.mxu0 %v4658_v35  ;;  %v4690_v35 = vld [vmem:[%s6384_s12 + $0x8] sm:$0xff]  }
 0x6b3   :  { %v1279_v18 = vadd.f32 %v1275_v53, %v5208_v5 }
 0x6b5   :  { %1288 = vadd.xlane.f32.xlu0 %v1280_v13  ;;  %1286 = vadd.xlane.f32.xlu1 %v1279_v18 }
 0x6b6   :  { %1461 = vmatpush1.bf16.msra.mxu0 %v4656_v55  ;;  %v4691_v55 = vld [vmem:[%s6384_s12 + $0x40] sm:$0xff]  }
 0x6b7   :  { %1462 = vmatprep.subr.bf16.mxu0 %v4661_v51  ;;  %v4692_v51 = vld [vmem:[%s6384_s12] sm:$0xff]  }
 0x6b9   :  { %1290 = vadd.xlane.f32.xlu1 %v1281_v19 }
 0x6ba   :  { %1463 = vmatpush1.bf16.msra.mxu0 %v4659_v60  ;;  %v1366_v60 = vld [vmem:[%s6385_s11] sm:$0x3] }
 0x6bb   :  { %1464 = vmatprep.subr.bf16.mxu0 %v4664_v30  ;;  %v1371_v30 = vrot.slane %v1366_v60, %v5223_v15 }
 0x6be   :  { %1465 = vmatpush1.bf16.msra.mxu0 %v4662_v47  ;;  %v1375_v47 = vrot.slane %v1366_v60, %v5229_v17 }
 0x6bf   :  { %1466 = vmatprep.subr.bf16.mxu0 %v4667_v31 }
 0x6c2   :  { %1467 = vmatpush1.bf16.msra.mxu0 %v4665_v2 }
 0x6c3   :  { %1468 = vmatprep.subr.bf16.mxu0 %v4670_v37 }
 0x6c6   :  { %1469 = vmatpush1.bf16.msra.mxu0 %v4668_v61 }
 0x6c7   :  { %1470 = vmatprep.subr.bf16.mxu0 %v4673_v26 }
 0x6ca   :  { %1471 = vmatpush1.bf16.msra.mxu0 %v4671_v7 }
 0x6cb   :  { %1472 = vmatprep.subr.bf16.mxu0 %v4676_v28 }
 0x6ce   :  { %1473 = vmatpush1.bf16.msra.mxu0 %v4674_v43 }
 0x73a   :  { %v1285_v38 = vpop.xlane.xlu0 %1284 }
 0x73b   :  { %v1292_v58 = vmul.f32 0.0078125, %v1285_v38 }
 0x73d   :  { %v5533_v10 = vsub.f32 %v1278_v48, %v1292_v58 }
 0x73e   :  { %v1289_v5 = vpop.xlane.xlu0 %1288  ;;  %v1287_v44 = vpop.xlane.xlu1 %1286 }
 0x73f   :  { %v1294_v22 = vmul.f32 0.0078125, %v1289_v5  ;;  %v1293_v24 = vmul.f32 0.0078125, %v1287_v44  ;;  %v1300_v12 = vmul.f32 %v5533_v10, %v5533_v10  ;;  %v4677_v5 = vld [vmem:[%s6384_s12 + $0x78] sm:$0xff]  }
 0x740   :  { %v4678_v44 = vld [vmem:[%s6384_s12 + $0x38] sm:$0xff]   ;;  %4021 = vmatprep.subr.bf16.mxu1 %v4677_v5 }
 0x741   :  { %v5537_v25 = vsub.f32 %v1280_v13, %v1294_v22  ;;  %v1297_v33 = vsub.f32 %v1279_v18, %v1293_v24  ;;  %1304 = vadd.xlane.f32.xlu0 %v1300_v12  ;;  %4022 = vmatpush3.bf16.msra.mxu1 %v4678_v44  ;;  %v4679_v22 = vld [vmem:[%s6384_s12 + $0x70] sm:$0xff]   ;;  %v4681_v12 = vld [vmem:[%s6384_s12 + $0x68] sm:$0xff]  }
 0x742   :  { %v1291_v46 = vpop.xlane.xlu1 %1290  ;;  %v4680_v24 = vld [vmem:[%s6384_s12 + $0x30] sm:$0xff]   ;;  %4023 = vmatprep.subr.bf16.mxu1 %v4679_v22 }
 0x743   :  { %v1295_v27 = vmul.f32 0.0078125, %v1291_v46  ;;  %v1302_v54 = vmul.f32 %v5537_v25, %v5537_v25  ;;  %v1301_v29 = vmul.f32 %v1297_v33, %v1297_v33  ;;  %v4684_v46 = vld [vmem:[%s6384_s12 + $0x20] sm:$0xff]  }
 0x745   :  { %v1299_v40 = vsub.f32 %v1281_v19, %v1295_v27  ;;  %1308 = vadd.xlane.f32.xlu0 %v1302_v54  ;;  %1306 = vadd.xlane.f32.xlu1 %v1301_v29  ;;  %v4685_v27 = vld [vmem:[%s6384_s12 + $0x58] sm:$0xff]   ;;  %v4687_v29 = vld [vmem:[%s6384_s12 + $0x50] sm:$0xff]  }
 0x746   :  { %4024 = vmatpush3.bf16.msra.mxu1 %v4680_v24  ;;  %v4686_v54 = vld [vmem:[%s6384_s12 + $0x18] sm:$0xff]  }
 0x747   :  { %v1303_v9 = vmul.f32 %v1299_v40, %v1299_v40  ;;  %4025 = vmatprep.subr.bf16.mxu1 %v4681_v12 }
 0x749   :  { %1310 = vadd.xlane.f32.xlu1 %v1303_v9  ;;  %v4689_v9 = vld [vmem:[%s6384_s12 + $0x48] sm:$0xff]  }
 0x7ca   :  { %v1305_v45 = vpop.xlane.xlu0 %1304 }
 0x7cb   :  { %v1312_v50 = vmul.f32 0.0078125, %v1305_v45 }
 0x7cd   :  { %v1316_v52 = vadd.f32 1e-12, %v1312_v50 }
 0x7ce   :  { %v1309_v34 = vpop.xlane.xlu0 %1308  ;;  %v1307_v57 = vpop.xlane.xlu1 %1306 }
 0x7cf   :  { %4853 = vrsqrt.f32 %v1316_v52  ;;  %v1314_v59 = vmul.f32 0.0078125, %v1309_v34  ;;  %v1313_v42 = vmul.f32 0.0078125, %v1307_v57 }
 0x7d1   :  { %v1317_v56 = vadd.f32 1e-12, %v1313_v42  ;;  %v1318_v63 = vadd.f32 1e-12, %v1314_v59 }
 0x7d2   :  { %v1311_v0 = vpop.xlane.xlu1 %1310 }
 0x7d3   :  { %v1315_v16 = vmul.f32 0.0078125, %v1311_v0  ;;  %4855 = vrsqrt.f32 %v1317_v56 }
 0x7d4   :  { %4857 = vrsqrt.f32 %v1318_v63 }
 0x7d5   :  { %v1319_v49 = vadd.f32 1e-12, %v1315_v16 }
 0x7d7   :  { %4859 = vrsqrt.f32 %v1319_v49 }
 0x7dc   :  { %v4854_v1 = vpop.eup %4853 }
 0x7dd   :  { %v1324_v8 = vmul.f32 %v4854_v1, %v5533_v10 }
 0x7df   :  { %v1334_v41 = vmul.f32 %v3727_v32, %v1324_v8 }
 0x7e0   :  { %v4856_v62 = vpop.eup %4855 }
 0x7e1   :  { %v1325_v23 = vmul.f32 %v4856_v62, %v1297_v33  ;;  %v4858_v36 = vpop.eup %4857  ;;  %v5590_v11 = vadd.f32 %v3728_v3, %v1334_v41  ;;  %v4683_v33 = vld [vmem:[%s6384_s12 + $0x60] sm:$0xff]  }
 0x7e2   :  { %v1326_v18 = vmul.f32 %v4858_v36, %v5537_v25  ;;  %v4682_v25 = vld [vmem:[%s6384_s12 + $0x28] sm:$0xff]  }
 0x7e3   :  { %v1335_v48 = vmul.f32 %v3727_v32, %v1325_v23  ;;  %4026 = vmatpush3.bf16.msra.mxu1 %v4682_v25 }
 0x7e4   :  { %v4860_v6 = vpop.eup %4859  ;;  %v1336_v4 = vmul.f32 %v3727_v32, %v1326_v18  ;;  %4027 = vmatprep.subr.bf16.mxu1 %v4683_v33 }
 0x7e5   :  { %v1327_v53 = vmul.f32 %v4860_v6, %v1299_v40  ;;  %v5592_v13 = vadd.f32 %v3728_v3, %v1335_v48  ;;  %v4688_v40 = vld [vmem:[%s6384_s12 + $0x10] sm:$0xff]  }
 0x7e6   :  { %v5600_v58 = vadd.f32 %v3728_v3, %v1336_v4 }
 0x7e7   :  { %v1364_v19 = vpack.c.bf16 %v5592_v13, %v5590_v11  ;;  %v1337_v21 = vmul.f32 %v3727_v32, %v1327_v53  ;;  %4028 = vmatpush3.bf16.msra.mxu1 %v4684_v46 }
 0x7e8   :  { %4029 = vmatprep.subr.bf16.mxu1 %v4685_v27 }
 0x7e9   :  { %1491 = vmatmul.mubr.bf16.vlgmr.msra.gmra.mxu0 %v1364_v19  ;;  %v5598_v38 = vadd.f32 %v3728_v3, %v1337_v21 }
 0x7ea   :  { %1500 = vmatprep.mubr.bf16.mxu0 %v4997_v39 }
 0x7eb   :  { %v1365_v10 = vpack.c.bf16 %v5598_v38, %v5600_v58  ;;  %4030 = vmatpush3.bf16.msra.mxu1 %v4686_v54 }
 0x7ec   :  { %4031 = vmatprep.subr.bf16.mxu1 %v4687_v29 }
 0x7ef   :  { %4032 = vmatpush3.bf16.msra.mxu1 %v4688_v40 }
 0x7f0   :  { %4033 = vmatprep.subr.bf16.mxu1 %v4689_v9 }
 0x7f1   :  { %1501 = vmatmul.mubr.bf16.gmra.mxu0 %v1365_v10 }
 0x7f2   :  { %2054 = vmatprep.mubr.bf16.mxu0 %v4997_v39 }
 0x7f3   :  { %4034 = vmatpush3.bf16.msra.mxu1 %v4690_v35 }
 0x7f4   :  { %4035 = vmatprep.subr.bf16.mxu1 %v4691_v55 }
 0x7f7   :  { %4036 = vmatpush3.bf16.msra.mxu1 %v4692_v51 }
 0x8a9   :  { %v1492_v31 = vpop.f32.mrf.mxu0 }
 0x8aa   :  { %v5658_v2 = vadd.f32 %v1492_v31, %v1371_v30 }
 0x8ab   :  { %v1494_v37 = vpop.f32.mrf.mxu0 }
 0x8ac   :  { %v1511_v61 = vmul.f32 %v5658_v2, %v5658_v2  ;;  %v5662_v26 = vadd.f32 %v1494_v37, %v1375_v47 }
 0x8ad   :  { %v1496_v7 = vpop.f32.mrf.mxu0 }
 0x8ae   :  { %v1519_v28 = vmul.f32 %v1511_v61, %v5658_v2  ;;  %v1512_v43 = vmul.f32 %v5662_v26, %v5662_v26  ;;  %v5667_v45 = vadd.f32 %v1496_v7, %v1371_v30 }
 0x8af   :  { %v1498_v50 = vpop.f32.mrf.mxu0 }
 0x8b0   :  { %v1527_v52 = vmul.f32 0.044715, %v1519_v28  ;;  %v1520_v34 = vmul.f32 %v1512_v43, %v5662_v26  ;;  %v1513_v57 = vmul.f32 %v5667_v45, %v5667_v45  ;;  %v5672_v59 = vadd.f32 %v1498_v50, %v1375_v47 }
 0x8b1   :  { %v1502_v42 = vpop.f32.mrf.mxu0 }
 0x8b2   :  { %v1535_v56 = vadd.f32 %v1527_v52, %v5658_v2  ;;  %v1528_v63 = vmul.f32 0.044715, %v1520_v34  ;;  %v1521_v0 = vmul.f32 %v1513_v57, %v5667_v45  ;;  %v1514_v16 = vmul.f32 %v5672_v59, %v5672_v59 }
 0x8b3   :  { %v5678_v49 = vadd.f32 %v1502_v42, %v1371_v30  ;;  %v1504_v1 = vpop.f32.mrf.mxu0 }
 0x8b4   :  { %v1543_v8 = vmul.f32 0.7978846, %v1535_v56  ;;  %v1536_v32 = vadd.f32 %v1528_v63, %v5662_v26  ;;  %v1529_v62 = vmul.f32 0.044715, %v1521_v0  ;;  %v1522_v23 = vmul.f32 %v1514_v16, %v5672_v59 }
 0x8b5   :  { %v1515_v41 = vmul.f32 %v5678_v49, %v5678_v49  ;;  %v5684_v36 = vadd.f32 %v1504_v1, %v1375_v47  ;;  %v1506_v3 = vpop.f32.mrf.mxu0 }
 0x8b6   :  { %v1544_v6 = vmul.f32 0.7978846, %v1536_v32  ;;  %v1537_v48 = vadd.f32 %v1529_v62, %v5667_v45  ;;  %v1530_v53 = vmul.f32 0.044715, %v1522_v23  ;;  %4861 = vtanh.f32 %v1543_v8 }
 0x8b7   :  { %v1523_v18 = vmul.f32 %v1515_v41, %v5678_v49  ;;  %v1516_v19 = vmul.f32 %v5684_v36, %v5684_v36  ;;  %v1507_v21 = vadd.f32 %v1506_v3, %v1371_v30  ;;  %v1508_v4 = vpop.f32.mrf.mxu0 }
 0x8b8   :  { %4863 = vtanh.f32 %v1544_v6  ;;  %v1545_v10 = vmul.f32 0.7978846, %v1537_v48  ;;  %v1538_v5 = vadd.f32 %v1530_v53, %v5672_v59  ;;  %v1509_v44 = vadd.f32 %v1508_v4, %v1375_v47 }
 0x8b9   :  { %v1531_v22 = vmul.f32 0.044715, %v1523_v18  ;;  %v1524_v24 = vmul.f32 %v1516_v19, %v5684_v36  ;;  %v1517_v12 = vmul.f32 %v1507_v21, %v1507_v21 }
 0x8ba   :  { %4865 = vtanh.f32 %v1545_v10  ;;  %v1546_v25 = vmul.f32 0.7978846, %v1538_v5  ;;  %v1518_v33 = vmul.f32 %v1509_v44, %v1509_v44 }
 0x8bb   :  { %v1539_v46 = vadd.f32 %v1531_v22, %v5678_v49  ;;  %v1532_v27 = vmul.f32 0.044715, %v1524_v24  ;;  %v1525_v54 = vmul.f32 %v1517_v12, %v1507_v21 }
 0x8bc   :  { %4867 = vtanh.f32 %v1546_v25  ;;  %v1526_v29 = vmul.f32 %v1518_v33, %v1509_v44  ;;  %v3745_v33 = vld [vmem:[%s6386_s13] ss:$0 sm:$0xff] }
 0x8bd   :  { %v1547_v40 = vmul.f32 0.7978846, %v1539_v46  ;;  %v1540_v9 = vadd.f32 %v1532_v27, %v5684_v36  ;;  %v1533_v35 = vmul.f32 0.044715, %v1525_v54 }
 0x8be   :  { %v1534_v55 = vmul.f32 0.044715, %v1526_v29 }
 0x8bf   :  { %4869 = vtanh.f32 %v1547_v40  ;;  %v1548_v51 = vmul.f32 0.7978846, %v1540_v9  ;;  %v1541_v60 = vadd.f32 %v1533_v35, %v1507_v21 }
 0x8c0   :  { %v1542_v30 = vadd.f32 %v1534_v55, %v1509_v44 }
 0x8c1   :  { %4871 = vtanh.f32 %v1548_v51  ;;  %v1549_v47 = vmul.f32 0.7978846, %v1541_v60 }
 0x8c2   :  { %v1550_v31 = vmul.f32 0.7978846, %v1542_v30 }
 0x8c3   :  { %4873 = vtanh.f32 %v1549_v47  ;;  %v4862_v37 = vpop.eup %4861 }
 0x8c4   :  { %4875 = vtanh.f32 %v1550_v31  ;;  %v1559_v43 = vadd.f32 1.0, %v4862_v37 }
 0x8c5   :  { %v4864_v61 = vpop.eup %4863 }
 0x8c6   :  { %v1560_v7 = vadd.f32 1.0, %v4864_v61  ;;  %v1567_v56 = vmul.f32 0.5, %v1559_v43 }
 0x8c7   :  { %v4866_v28 = vpop.eup %4865 }
 0x8c8   :  { %v1561_v50 = vadd.f32 1.0, %v4866_v28  ;;  %v1568_v42 = vmul.f32 0.5, %v1560_v7  ;;  %v1575_v62 = vmul.f32 %v1567_v56, %v5658_v2 }
 0x8c9   :  { %v4868_v52 = vpop.eup %4867 }
 0x8ca   :  { %v1569_v34 = vmul.f32 0.5, %v1561_v50  ;;  %v1562_v57 = vadd.f32 1.0, %v4868_v52  ;;  %v1576_v8 = vmul.f32 %v1568_v42, %v5662_v26 }
 0x8cc   :  { %v4870_v63 = vpop.eup %4869  ;;  %v1570_v0 = vmul.f32 0.5, %v1562_v57  ;;  %v1577_v16 = vmul.f32 %v1569_v34, %v5667_v45 }
 0x8cd   :  { %v1563_v41 = vadd.f32 1.0, %v4870_v63 }
 0x8ce   :  { %v4872_v1 = vpop.eup %4871  ;;  %v1578_v32 = vmul.f32 %v1570_v0, %v5672_v59  ;;  %v1615_v53 = vpack.c.bf16 %v1577_v16, %v1575_v62  ;;  %v4696_v62 = vld [vmem:[%s6398_s23 + $0x150] ss:$12 sps:$4 sm:$0xff]  }
 0x8cf   :  { %v1564_v23 = vadd.f32 1.0, %v4872_v1  ;;  %v1571_v10 = vmul.f32 0.5, %v1563_v41  ;;  %v4702_v41 = vld [vmem:[%s6398_s23 + $0x170] ss:$12 sps:$4 sm:$0xff]  }
 0x8d0   :  { %v4874_v3 = vpop.eup %4873  ;;  %v1616_v6 = vpack.c.bf16 %v1578_v32, %v1576_v8  ;;  %v4698_v32 = vld [vmem:[%s6398_s23 + $0x154] ss:$12 sps:$4 sm:$0xff]   ;;  %4261 = vmatprep.subr.bf16.mxu1 %v4702_v41 }
 0x8d1   :  { %v4876_v48 = vpop.eup %4875  ;;  %v1565_v18 = vadd.f32 1.0, %v4874_v3  ;;  %v1572_v4 = vmul.f32 0.5, %v1564_v23  ;;  %v1579_v2 = vmul.f32 %v1571_v10, %v5678_v49  ;;  %v4701_v23 = vld [vmem:[%s6398_s23 + $0x13c] ss:$12 sps:$4 sm:$0xff]   ;;  %v4699_v3 = vld [vmem:[%s6398_s23 + $0x138] ss:$12 sps:$4 sm:$0xff]  }
 0x8d2   :  { %1754 = vmatprep.mubr.bf16.mxu1 %v1616_v6  ;;  %v1566_v19 = vadd.f32 1.0, %v4876_v48  ;;  %v4705_v6 = vld [vmem:[%s6398_s23 + $0x124] ss:$12 sps:$4 sm:$0xff]   ;;  %v4713_v10 = vld [vmem:[%s6398_s23 + $0xf4] ss:$12 sps:$4 sm:$0xff]  }
 0x8d3   :  { %1755 = vmatmul.mubr.bf16.vlgmr.msra.gmra.mxu1 %v1615_v53  ;;  %v1573_v45 = vmul.f32 0.5, %v1565_v18  ;;  %v1580_v26 = vmul.f32 %v1572_v4, %v5684_v36  ;;  %v4706_v48 = vld [vmem:[%s6398_s23 + $0x158] ss:$12 sps:$4 sm:$0xff]   ;;  %v4703_v53 = vld [vmem:[%s6398_s23 + $0x120] ss:$12 sps:$4 sm:$0xff]  }
 0x8d4   :  { %v1574_v5 = vmul.f32 0.5, %v1566_v19  ;;  %4262 = vmatpush3.bf16.msra.mxu1 %v4702_v41  ;;  %v4709_v18 = vld [vmem:[%s6398_s23 + $0x10c] ss:$12 sps:$4 sm:$0xff]   ;;  %v4707_v4 = vld [vmem:[%s6398_s23 + $0x108] ss:$12 sps:$4 sm:$0xff]  }
 0x8d5   :  { %v1581_v22 = vmul.f32 %v1573_v45, %v1507_v21  ;;  %4263 = vmatprep.subr.bf16.mxu1 %v4706_v48  ;;  %v4710_v19 = vld [vmem:[%s6398_s23 + $0x140] ss:$12 sps:$4 sm:$0xff]   ;;  %v4714_v45 = vld [vmem:[%s6398_s23 + $0x128] ss:$12 sps:$4 sm:$0xff]  }
 0x8d6   :  { %v1582_v59 = vmul.f32 %v1574_v5, %v1509_v44  ;;  %v4711_v5 = vld [vmem:[%s6398_s23 + $0xf0] ss:$12 sps:$4 sm:$0xff]  }
 0x8d7   :  { %v1617_v12 = vpack.c.bf16 %v1581_v22, %v1579_v2  ;;  %v4717_v22 = vld [vmem:[%s6398_s23 + $0xdc] ss:$12 sps:$4 sm:$0xff]   ;;  %v4721_v2 = vld [vmem:[%s6398_s23 + $0xc4] ss:$12 sps:$4 sm:$0xff]  }
 0x8d8   :  { %v1618_v24 = vpack.c.bf16 %v1582_v59, %v1580_v26  ;;  %4264 = vmatpush3.bf16.msra.mxu1 %v4706_v48  ;;  %v4718_v26 = vld [vmem:[%s6398_s23 + $0x110] ss:$12 sps:$4 sm:$0xff]   ;;  %v4715_v59 = vld [vmem:[%s6398_s23 + $0xd8] ss:$12 sps:$4 sm:$0xff]  }
 0x8d9   :  { %4265 = vmatprep.subr.bf16.mxu1 %v4710_v19 }
 0x8da   :  { %1762 = vmatprep.mubr.bf16.mxu1 %v1618_v24  ;;  %v4722_v24 = vld [vmem:[%s6398_s23 + $0xf8] ss:$12 sps:$4 sm:$0xff]  }
 0x8db   :  { %1763 = vmatmul.mubr.bf16.gmra.mxu1 %v1617_v12  ;;  %v4719_v12 = vld [vmem:[%s6398_s23 + $0xc0] ss:$12 sps:$4 sm:$0xff]  }
 0x8dc   :  { %4266 = vmatpush3.bf16.msra.mxu1 %v4710_v19 }
 0x8dd   :  { %4267 = vmatprep.subr.bf16.mxu1 %v4714_v45 }
 0x8e0   :  { %4268 = vmatpush3.bf16.msra.mxu1 %v4714_v45 }
 0x8e1   :  { %4269 = vmatprep.subr.bf16.mxu1 %v4718_v26 }
 0x8e4   :  { %4270 = vmatpush3.bf16.msra.mxu1 %v4718_v26 }
 0x8e5   :  { %4271 = vmatprep.subr.bf16.mxu1 %v4722_v24 }
 0x8e8   :  { %4272 = vmatpush3.bf16.msra.mxu1 %v4722_v24 }
 0x993   :  { %v4037_v25 = vpop.f32.mrf.mxu1 }
 0x995   :  { %v4038_v46 = vpop.f32.mrf.mxu1 }
 0x996   :  { %v4039_v27 = vadd.f32 %v4038_v46, %v4037_v25  ;;  %v4723_v25 = vld [vmem:[%s6398_s23 + $0xe0] ss:$12 sps:$4 sm:$0xff]  }
 0x997   :  { %v4040_v54 = vpop.f32.mrf.mxu1  ;;  %4273 = vmatprep.subr.bf16.mxu1 %v4723_v25 }
 0x998   :  { %v1757_v29 = vadd.f32 %v4039_v27, %v3745_v33  ;;  %4274 = vmatpush3.bf16.msra.mxu1 %v4723_v25 }
 0x999   :  { %v4041_v40 = vpop.f32.mrf.mxu1 }
 0x99a   :  { %v4042_v21 = vadd.f32 %v4041_v40, %v4040_v54  ;;  %v1771_v36 = vadd.f32 %v1757_v29, %v5590_v11  ;;  %v4693_v11 = vld [vmem:[%s6398_s23 + $0x168] ss:$12 sps:$4 sm:$0xff]  }
 0x99b   :  { %v4043_v44 = vpop.f32.mrf.mxu1 }
 0x99c   :  { %v1760_v9 = vadd.f32 %v4042_v21, %v3745_v33  ;;  %1777 = vadd.xlane.f32.xlu0 %v1771_v36 }
 0x99d   :  { %v4044_v49 = vpop.f32.mrf.mxu1 }
 0x99e   :  { %v4045_v35 = vadd.f32 %v4044_v49, %v4043_v44  ;;  %v1772_v55 = vadd.f32 %v1760_v9, %v5592_v13  ;;  %v4695_v13 = vld [vmem:[%s6398_s23 + $0x16c] ss:$12 sps:$4 sm:$0xff]  }
 0x99f   :  { %v4046_v51 = vpop.f32.mrf.mxu1  ;;  %2022 = vmatprep.subr.bf16.mxu0 %v4695_v13 }
 0x9a0   :  { %v1765_v60 = vadd.f32 %v4045_v35, %v3745_v33  ;;  %1779 = vadd.xlane.f32.xlu1 %v1772_v55  ;;  %2023 = vmatpush1.bf16.msra.mxu0 %v4693_v11 }
 0x9a1   :  { %v4047_v30 = vpop.f32.mrf.mxu1  ;;  %2024 = vmatprep.subr.bf16.mxu0 %v4698_v32 }
 0x9a2   :  { %v4048_v47 = vadd.f32 %v4047_v30, %v4046_v51  ;;  %v1773_v31 = vadd.f32 %v1765_v60, %v5600_v58  ;;  %v3762_v30 = vld [vmem:[%s6387_s14] ss:$0 sm:$0xff] }
 0x9a4   :  { %v1768_v37 = vadd.f32 %v4048_v47, %v3745_v33  ;;  %1781 = vadd.xlane.f32.xlu0 %v1773_v31  ;;  %2025 = vmatpush1.bf16.msra.mxu0 %v4696_v62  ;;  %v4724_v33 = vld [vmem:[%s6398_s23 + $0xc8] ss:$12 sps:$4 sm:$0xff]  }
 0x9a5   :  { %2026 = vmatprep.subr.bf16.mxu0 %v4701_v23  ;;  %4275 = vmatprep.subr.bf16.mxu1 %v4724_v33 }
 0x9a6   :  { %v1774_v61 = vadd.f32 %v1768_v37, %v5598_v38  ;;  %4276 = vmatpush3.bf16.msra.mxu1 %v4724_v33 }
 0x9a8   :  { %1783 = vadd.xlane.f32.xlu1 %v1774_v61  ;;  %2027 = vmatpush1.bf16.msra.mxu0 %v4699_v3 }
 0x9a9   :  { %2028 = vmatprep.subr.bf16.mxu0 %v4705_v6 }
 0x9ac   :  { %2029 = vmatpush1.bf16.msra.mxu0 %v4703_v53 }
 0x9ad   :  { %2030 = vmatprep.subr.bf16.mxu0 %v4709_v18 }
 0x9b0   :  { %2031 = vmatpush1.bf16.msra.mxu0 %v4707_v4 }
 0x9b1   :  { %2032 = vmatprep.subr.bf16.mxu0 %v4713_v10 }
 0x9b4   :  { %2033 = vmatpush1.bf16.msra.mxu0 %v4711_v5 }
 0x9b5   :  { %2034 = vmatprep.subr.bf16.mxu0 %v4717_v22 }
 0x9b8   :  { %2035 = vmatpush1.bf16.msra.mxu0 %v4715_v59 }
 0x9b9   :  { %2036 = vmatprep.subr.bf16.mxu0 %v4721_v2 }
 0x9bc   :  { %2037 = vmatpush1.bf16.msra.mxu0 %v4719_v12 }
 0xa25   :  { %v1778_v7 = vpop.xlane.xlu0 %1777 }
 0xa26   :  { %v1785_v28 = vmul.f32 0.0078125, %v1778_v7 }
 0xa28   :  { %v5713_v43 = vsub.f32 %v1771_v36, %v1785_v28 }
 0xa29   :  { %v1780_v58 = vpop.xlane.xlu1 %1779 }
 0xa2a   :  { %v1786_v50 = vmul.f32 0.0078125, %v1780_v58  ;;  %v1793_v38 = vmul.f32 %v5713_v43, %v5713_v43 }
 0xa2c   :  { %v5717_v52 = vsub.f32 %v1772_v55, %v1786_v50  ;;  %1797 = vadd.xlane.f32.xlu0 %v1793_v38 }
 0xa2d   :  { %v1782_v34 = vpop.xlane.xlu0 %1781 }
 0xa2e   :  { %v1787_v57 = vmul.f32 0.0078125, %v1782_v34  ;;  %v1794_v42 = vmul.f32 %v5717_v52, %v5717_v52 }
 0xa30   :  { %v5721_v56 = vsub.f32 %v1773_v31, %v1787_v57  ;;  %1799 = vadd.xlane.f32.xlu1 %v1794_v42 }
 0xa31   :  { %v1784_v63 = vpop.xlane.xlu1 %1783 }
 0xa32   :  { %v1788_v0 = vmul.f32 0.0078125, %v1784_v63  ;;  %v1795_v16 = vmul.f32 %v5721_v56, %v5721_v56 }
 0xa34   :  { %v5725_v1 = vsub.f32 %v1774_v61, %v1788_v0  ;;  %1801 = vadd.xlane.f32.xlu0 %v1795_v16  ;;  %v3763_v61 = vld [vmem:[%s6388_s15] ss:$0 sm:$0xff] }
 0xa36   :  { %v1796_v8 = vmul.f32 %v5725_v1, %v5725_v1 }
 0xa38   :  { %1803 = vadd.xlane.f32.xlu1 %v1796_v8 }
 0xab5   :  { %v1798_v46 = vpop.xlane.xlu0 %1797 }
 0xab6   :  { %v1805_v27 = vmul.f32 0.0078125, %v1798_v46 }
 0xab8   :  { %v1809_v54 = vadd.f32 1e-12, %v1805_v27 }
 0xab9   :  { %v1800_v29 = vpop.xlane.xlu1 %1799 }
 0xaba   :  { %4877 = vrsqrt.f32 %v1809_v54  ;;  %v1806_v40 = vmul.f32 0.0078125, %v1800_v29 }
 0xabc   :  { %v1810_v21 = vadd.f32 1e-12, %v1806_v40 }
 0xabd   :  { %v1802_v36 = vpop.xlane.xlu0 %1801 }
 0xabe   :  { %4879 = vrsqrt.f32 %v1810_v21  ;;  %v1807_v44 = vmul.f32 0.0078125, %v1802_v36 }
 0xac0   :  { %v1811_v9 = vadd.f32 1e-12, %v1807_v44 }
 0xac1   :  { %v1804_v49 = vpop.xlane.xlu1 %1803 }
 0xac2   :  { %4881 = vrsqrt.f32 %v1811_v9  ;;  %v1808_v35 = vmul.f32 0.0078125, %v1804_v49 }
 0xac4   :  { %v1812_v55 = vadd.f32 1e-12, %v1808_v35 }
 0xac6   :  { %4883 = vrsqrt.f32 %v1812_v55 }
 0xac7   :  { %v4878_v51 = vpop.eup %4877 }
 0xac8   :  { %v1817_v60 = vmul.f32 %v4878_v51, %v5713_v43 }
 0xaca   :  { %v1827_v37 = vmul.f32 %v3762_v30, %v1817_v60 }
 0xacb   :  { %v4880_v47 = vpop.eup %4879 }
 0xacc   :  { %v1818_v31 = vmul.f32 %v4880_v47, %v5717_v52  ;;  %v5803_v7 = vadd.f32 %v3763_v61, %v1827_v37 }
 0xace   :  { %v1828_v11 = vmul.f32 %v3762_v30, %v1818_v31 }
 0xacf   :  { %v4882_v13 = vpop.eup %4881 }
 0xad0   :  { %v5805_v28 = vadd.f32 %v3763_v61, %v1828_v11  ;;  %v1819_v43 = vmul.f32 %v4882_v13, %v5721_v56  ;;  %v3796_v56 = vld [vmem:[%s6377_s5 + $0x3] sm:$0x7] }
 0xad1   :  { %v1882_v16 = vrot.slane %v3796_v56, %v5223_v15  ;;  %v1886_v8 = vrot.slane %v3796_v56, %v5229_v17  ;;  %v1890_v5 = vrot.slane %v3796_v56, %v193_v20 }
 0xad2   :  { %v1874_v58 = vpack.c.bf16 %v5805_v28, %v5803_v7  ;;  %v1829_v52 = vmul.f32 %v3762_v30, %v1819_v43 }
 0xad3   :  { %v4884_v50 = vpop.eup %4883 }
 0xad4   :  { %2055 = vmatmul.mubr.bf16.vlgmr.msra.gmra.mxu0 %v1874_v58  ;;  %4277 = vmatprep.mubr.bf16.mxu1 %v1874_v58  ;;  %v1820_v38 = vmul.f32 %v4884_v50, %v5725_v1  ;;  %v5812_v57 = vadd.f32 %v3763_v61, %v1829_v52 }
 0xad5   :  { %2064 = vmatprep.mubr.bf16.mxu0 %v4997_v39 }
 0xad6   :  { %v1830_v34 = vmul.f32 %v3762_v30, %v1820_v38 }
 0xad8   :  { %v5814_v42 = vadd.f32 %v3763_v61, %v1830_v34 }
 0xada   :  { %v1875_v63 = vpack.c.bf16 %v5814_v42, %v5812_v57 }
 0xadc   :  { %2065 = vmatmul.mubr.bf16.gmra.mxu0 %v1875_v63  ;;  %4278 = vmatmul.mubr.bf16.vlgmr.msra.gmra.mxu1 %v1875_v63 }
 0xb94   :  { %v2056_v0 = vpop.f32.mrf.mxu0 }
 0xb95   :  { %v2057_v62 = vadd.f32 %v2056_v0, %v1882_v16 }
 0xb96   :  { %v2058_v1 = vpop.f32.mrf.mxu0 }
 0xb97   :  { %v2059_v3 = vadd.f32 %v2058_v1, %v1886_v8 }
 0xb98   :  { %v2060_v32 = vpop.f32.mrf.mxu0 }
 0xb99   :  { %v2061_v23 = vadd.f32 %v2060_v32, %v1882_v16 }
 0xb9a   :  { %v2062_v41 = vpop.f32.mrf.mxu0 }
 0xb9b   :  { %v2063_v6 = vadd.f32 %v2062_v41, %v1886_v8  ;;  %v2244_v48 = vpack.c.bf16 %v2061_v23, %v2057_v62  ;;  %v4553_v49 = vpack.i.bf16 %v2061_v23, %v2057_v62 }
 0xb9c   :  { %v2066_v53 = vpop.f32.mrf.mxu0  ;;  %v4279_v18 = vpop.f32.mrf.mxu1 }
 0xb9d   :  { %4297 = vmatprep.mubr.msk.bf16.mxu0 %vm572_vm0, %v2244_v48  ;;  %v4528_v19 = vpack.i.bf16 %v2063_v6, %v2059_v3  ;;  %v5824_v45 = vpack.c.bf16 %v2063_v6, %v2059_v3  ;;  %v5829_v59 = vadd.f32 %v2066_v53, %v1882_v16  ;;  %v2118_v29 = vadd.f32 %v4279_v18, %v1890_v5 }
 0xb9e   :  { %v2068_v4 = vpop.f32.mrf.mxu0  ;;  %v2109_v10 = vpop.f32.mrf.mxu1 }
 0xb9f   :  { %4529 = vrot.lane.b32.xlu1 %v4528_v19, %s4998_s20  ;;  %v2069_v33 = vadd.f32 %v2068_v4, %v1886_v8  ;;  %v2110_v40 = vadd.f32 %v2109_v10, %v1890_v5 }
 0xba0   :  { %v2070_v22 = vpop.f32.mrf.mxu0  ;;  %v4280_v26 = vpop.f32.mrf.mxu1 }
 0xba1   :  { %v5831_v2 = vadd.f32 %v2070_v22, %v1882_v16  ;;  %v2121_v24 = vadd.f32 %v4280_v26, %v1890_v5 }
 0xba2   :  { %v2072_v12 = vpop.f32.mrf.mxu0  ;;  %v2112_v25 = vpop.f32.mrf.mxu1 }
 0xba3   :  { %v2245_v46 = vpack.c.bf16 %v5831_v2, %v5829_v59  ;;  %v2073_v27 = vadd.f32 %v2072_v12, %v1886_v8  ;;  %v2113_v54 = vadd.f32 %v2112_v25, %v1890_v5  ;;  %v5839_v36 = vpack.i.bf16 %v2121_v24, %v2118_v29 }
 0xba4   :  { %v5843_v44 = vpack.c.bf16 %v2121_v24, %v2118_v29  ;;  %v4558_v35 = vpack.i.bf16 %v5831_v2, %v5829_v59 }
 0xba5   :  { %v4533_v21 = vpack.i.bf16 %v2073_v27, %v2069_v33  ;;  %v5835_v14 = vpack.c.bf16 %v2073_v27, %v2069_v33  ;;  %v5837_v20 = vpack.i.bf16 %v2113_v54, %v2110_v40  ;;  %v5845_v9 = vpack.c.bf16 %v2113_v54, %v2110_v40 }
 0xba7   :  { %4534 = vrot.lane.b32.xlu1 %v4533_v21, %s4999_s21  ;;  %4524 = vrot.lane.b32.xlu0 %v4533_v21, %s4998_s20 }
 0xbab   :  { %4539 = vrot.lane.b32.xlu1 %v4528_v19, %s4999_s21  ;;  %4544 = vrot.lane.b32.xlu0 %v4533_v21, %s5000_s22 }
 0xbaf   :  { %4549 = vrot.lane.b32.xlu1 %v4528_v19, %s5000_s22  ;;  %4554 = vrot.lane.b32.xlu0 %v4553_v49, %s5000_s22 }
 0xbb3   :  { %4564 = vrot.lane.b32.xlu0 %v4553_v49, %s4999_s21  ;;  %4559 = vrot.lane.b32.xlu1 %v4558_v35, %s5000_s22 }
 0xbb7   :  { %4574 = vrot.lane.b32.xlu0 %v4553_v49, %s4998_s20  ;;  %4569 = vrot.lane.b32.xlu1 %v4558_v35, %s4999_s21 }
 0xbbb   :  { %4584 = vrot.lane.b32.xlu0 %v5839_v36, %s4998_s20  ;;  %4579 = vrot.lane.b32.xlu1 %v4558_v35, %s4998_s20 }
 0xbbf   :  { %4589 = vrot.lane.b32.xlu0 %v5839_v36, %s4999_s21  ;;  %4594 = vrot.lane.b32.xlu1 %v5837_v20, %s4998_s20 }
 0xc11   :  { %v4530_v55 = vpop.permute.xlu1 %4529 }
 0xc12   :  { %v4532_v31 = vunpack.i.h.bf16 %v4530_v55  ;;  %v4531_v37 = vunpack.i.l.bf16 %v4530_v55  ;;  %v2296_v55 = vsel %vm572_vm0, %v5835_v14, 0 }
 0xc14   :  { %v2258_v43 = vpack.c.bf16 %v4532_v31, %v4531_v37 }
 0xc16   :  { %v2311_v16 = vsel %vm572_vm0, %v2258_v43, 0 }
 0xc19   :  { %v4525_v51 = vpop.permute.xlu0 %4524  ;;  %v4535_v60 = vpop.permute.xlu1 %4534 }
 0xc1a   :  { %v4527_v30 = vunpack.i.h.bf16 %v4525_v51  ;;  %v4526_v47 = vunpack.i.l.bf16 %v4525_v51  ;;  %v4537_v52 = vunpack.i.h.bf16 %v4535_v60  ;;  %v4536_v34 = vunpack.i.l.bf16 %v4535_v60 }
 0xc1b   :  { %v2293_v51 = vsel %vm572_vm0, %v5824_v45, 0 }
 0xc1c   :  { %v2259_v61 = vpack.c.bf16 %v4527_v30, %v4526_v47  ;;  %v2257_v0 = vpack.c.bf16 %v4537_v52, %v4536_v34 }
 0xc1d   :  { %v4545_v11 = vpop.permute.xlu0 %4544  ;;  %v4540_v13 = vpop.permute.xlu1 %4539 }
 0xc1e   :  { %4421 = vmatprep.subr.msk.bf16.mxu0 %vm572_vm0, %v2259_v61  ;;  %v2314_v58 = vsel %vm572_vm0, %v2259_v61, 0  ;;  %v4542_v32 = vunpack.i.h.bf16 %v4540_v13  ;;  %v4541_v62 = vunpack.i.l.bf16 %v4540_v13  ;;  %v2308_v53 = vsel %vm572_vm0, %v2257_v0, 0 }
 0xc1f   :  { %4282 = vmatpush3.bf16.xpose.msra.mxu0 %v2314_v58  ;;  %v4547_v24 = vunpack.i.h.bf16 %v4545_v11  ;;  %v4546_v12 = vunpack.i.l.bf16 %v4545_v11 }
 0xc20   :  { %4422 = vmatprep.subr.msk.bf16.mxu0 %vm572_vm0, %v2258_v43  ;;  %v2256_v48 = vpack.c.bf16 %v4542_v32, %v4541_v62  ;;  %v4983_v32 = vld [vmem:[%s6378_s1 + $0x18] sm:$0xff] }
 0xc21   :  { %v4555_v50 = vpop.permute.xlu0 %4554  ;;  %v4550_v38 = vpop.permute.xlu1 %4549  ;;  %v2255_v27 = vpack.c.bf16 %v4547_v24, %v4546_v12  ;;  %v4988_v12 = vld [vmem:[%s6378_s1 + $0x38] sm:$0xff] }
 0xc22   :  { %v2305_v54 = vsel %vm572_vm0, %v2256_v48, 0  ;;  %v4552_v29 = vunpack.i.h.bf16 %v4550_v38  ;;  %v4551_v40 = vunpack.i.l.bf16 %v4550_v38  ;;  %v4557_v60 = vunpack.i.h.bf16 %v4555_v50 }
 0xc23   :  { %v2302_v49 = vsel %vm572_vm0, %v2255_v27, 0  ;;  %v4556_v30 = vunpack.i.l.bf16 %v4555_v50 }
 0xc24   :  { %v2254_v21 = vpack.c.bf16 %v4552_v29, %v4551_v40  ;;  %v4990_v40 = vld [vmem:[%s6378_s1 + $0x58] sm:$0xff] }
 0xc25   :  { %v5867_v63 = vpop.permute.xlu0 %4564  ;;  %v5869_v56 = vpop.permute.xlu1 %4559  ;;  %v2246_v47 = vpack.c.bf16 %v4557_v60, %v4556_v30  ;;  %v4992_v60 = vld [vmem:[%s6378_s1 + $0x48] sm:$0xff] }
 0xc26   :  { %v2299_v35 = vsel %vm572_vm0, %v2254_v21, 0  ;;  %v4561_v31 = vunpack.i.l.bf16 %v5869_v56  ;;  %v4566_v37 = vunpack.i.l.bf16 %v5867_v63 }
 0xc27   :  { %4284 = vmatpush3.bf16.xpose.msra.mxu0 %v2311_v16 }
 0xc28   :  { %4423 = vmatprep.subr.msk.bf16.mxu0 %vm572_vm0, %v2257_v0 }
 0xc29   :  { %v5873_v1 = vpop.permute.xlu0 %4574  ;;  %v5875_v8 = vpop.permute.xlu1 %4569 }
 0xc2a   :  { %v4572_v59 = vunpack.i.h.bf16 %v5875_v8  ;;  %v4571_v2 = vunpack.i.l.bf16 %v5875_v8  ;;  %v4576_v13 = vunpack.i.l.bf16 %v5873_v1 }
 0xc2c   :  { %v2249_v43 = vpack.c.bf16 %v4572_v59, %v4571_v2  ;;  %v4995_v59 = vld [vmem:[%s6378_s1 + $0x60] sm:$0xff] }
 0xc2d   :  { %v4585_v23 = vpop.permute.xlu0 %4584  ;;  %v5877_v41 = vpop.permute.xlu1 %4579 }
 0xc2e   :  { %v4587_v3 = vunpack.i.h.bf16 %v4585_v23  ;;  %v4586_v6 = vunpack.i.l.bf16 %v4585_v23  ;;  %v4582_v50 = vunpack.i.h.bf16 %v5877_v41  ;;  %v4581_v38 = vunpack.i.l.bf16 %v5877_v41 }
 0xc2f   :  { %4286 = vmatpush3.bf16.xpose.msra.mxu0 %v2308_v53 }
 0xc30   :  { %v2267_v18 = vpack.c.bf16 %v4587_v3, %v4586_v6  ;;  %4424 = vmatprep.subr.msk.bf16.mxu0 %vm572_vm0, %v2256_v48  ;;  %v2251_v52 = vpack.c.bf16 %v4582_v50, %v4581_v38  ;;  %v4984_v3 = vld [vmem:[%s6378_s1 + $0x8] sm:$0xff]  ;;  %v4985_v48 = vld [vmem:[%s6378_s1 + $0x30] sm:$0xff] }
 0xc31   :  { %v4590_v19 = vpop.permute.xlu0 %4589  ;;  %v4595_v4 = vpop.permute.xlu1 %4594 }
 0xc32   :  { %v4592_v10 = vunpack.i.h.bf16 %v4590_v19  ;;  %v4591_v5 = vunpack.i.l.bf16 %v4590_v19  ;;  %v4597_v22 = vunpack.i.h.bf16 %v4595_v4  ;;  %v4596_v26 = vunpack.i.l.bf16 %v4595_v4  ;;  %4397 = vmatprep.subr.bf16.mxu1 %v2267_v18  ;;  %v4986_v4 = vld [vmem:[%s6378_s1 + $0x20] sm:$0xff] }
 0xc33   :  { %4405 = vmatpush3.bf16.msra.mxu1 %v2267_v18 }
 0xc34   :  { %v2266_v25 = vpack.c.bf16 %v4597_v22, %v4596_v26  ;;  %v2265_v33 = vpack.c.bf16 %v4592_v10, %v4591_v5  ;;  %v4987_v22 = vld [vmem:[%s6378_s1 + $0x28] sm:$0xff] }
 0xc36   :  { %4398 = vmatprep.subr.bf16.mxu1 %v2266_v25 }
 0xc37   :  { %4406 = vmatpush3.bf16.msra.mxu1 %v2266_v25  ;;  %4288 = vmatpush3.bf16.xpose.msra.mxu0 %v2305_v54  ;;  %v4989_v54 = vld [vmem:[%s6378_s1 + $0x50] sm:$0xff] }
 0xc38   :  { %4399 = vmatprep.subr.bf16.mxu1 %v2265_v33  ;;  %4425 = vmatprep.subr.msk.bf16.mxu0 %vm572_vm0, %v2255_v27 }
 0xc3b   :  { %4407 = vmatpush3.bf16.msra.mxu1 %v2265_v33 }
 0xc3f   :  { %4290 = vmatpush3.bf16.xpose.msra.mxu0 %v2302_v49 }
 0xc40   :  { %4426 = vmatprep.subr.msk.bf16.mxu0 %vm572_vm0, %v2254_v21 }
 0xc47   :  { %4292 = vmatpush3.bf16.xpose.msra.mxu0 %v2299_v35 }
 0xc48   :  { %4427 = vmatprep.subr.msk.bf16.mxu0 %vm572_vm0, %v5835_v14  ;;  %v4562_v14 = vunpack.i.h.bf16 %v5869_v56 }
 0xc4a   :  { %v2247_v61 = vpack.c.bf16 %v4562_v14, %v4561_v31  ;;  %v4993_v31 = vld [vmem:[%s6378_s1 + $0x70] sm:$0xff] }
 0xc4f   :  { %4294 = vmatpush3.bf16.xpose.msra.mxu0 %v2296_v55  ;;  %v4991_v55 = vld [vmem:[%s6378_s1 + $0x40] sm:$0xff] }
 0xc50   :  { %4428 = vmatprep.subr.msk.bf16.mxu0 %vm572_vm0, %v5824_v45  ;;  %v4567_v45 = vunpack.i.h.bf16 %v5867_v63  ;;  %v4981_v63 = vld [vmem:[%s6378_s1 + $0x10] sm:$0xff] }
 0xc52   :  { %v2248_v11 = vpack.c.bf16 %v4567_v45, %v4566_v37  ;;  %v4994_v37 = vld [vmem:[%s6378_s1 + $0x78] sm:$0xff] }
 0xc57   :  { %4296 = vmatpush3.bf16.xpose.msra.mxu0 %v2293_v51 }
 0xc58   :  { %4313 = vmatprep.subr.bf16.mxu0 %v2267_v18 }
 0xc5e   :  { %4298 = vmatmul.mubr.msk.bf16.vlgmr.msra.gmra.mxu0 %vm572_vm0, %v2245_v46  ;;  %v4577_v46 = vunpack.i.h.bf16 %v5873_v1  ;;  %v4982_v1 = vld [vmem:[%s6378_s1] sm:$0xff] }
 0xc5f   :  { %4301 = vmatprep.mubr.msk.bf16.mxu0 %vm572_vm0, %v2246_v47  ;;  %4314 = vmatpush3.bf16.msra.mxu0 %v2267_v18 }
 0xc60   :  { %4315 = vmatprep.subr.bf16.mxu0 %v2266_v25  ;;  %v2250_v58 = vpack.c.bf16 %v4577_v46, %v4576_v13  ;;  %v4996_v46 = vld [vmem:[%s6378_s1 + $0x68] sm:$0xff] }
 0xc63   :  { %4316 = vmatpush3.bf16.msra.mxu0 %v2266_v25 }
 0xc64   :  { %4317 = vmatprep.subr.bf16.mxu0 %v2265_v33 }
 0xc66   :  { %4302 = vmatmul.mubr.msk.bf16.gmra.mxu0 %vm572_vm0, %v2247_v61 }
 0xc67   :  { %4305 = vmatprep.mubr.msk.bf16.mxu0 %vm572_vm0, %v2248_v11  ;;  %4318 = vmatpush3.bf16.msra.mxu0 %v2265_v33 }
 0xc6e   :  { %4306 = vmatmul.mubr.msk.bf16.gmra.mxu0 %vm572_vm0, %v2249_v43 }
 0xc6f   :  { %4309 = vmatprep.mubr.msk.bf16.mxu0 %vm572_vm0, %v2250_v58 }
 0xc76   :  { %4310 = vmatmul.mubr.msk.bf16.gmra.mxu0 %vm572_vm0, %v2251_v52 }
 0xd1e   :  { %v4299_v34 = vpop.f32.mrf.mxu0 }
 0xd1f   :  { %v5917_v56 = vadd.f32 %v4981_v63, %v4299_v34 }
 0xd20   :  { %v2350_v0 = vpop.f32.mrf.mxu0 }
 0xd21   :  { %2417 = vmax.xlane.f32.xlu0 %v5917_v56  ;;  %v5923_v8 = vadd.f32 %v4982_v1, %v2350_v0 }
 0xd22   :  { %v4300_v16 = vpop.f32.mrf.mxu0 }
 0xd23   :  { %v5928_v62 = vadd.f32 %v4983_v32, %v4300_v16 }
 0xd24   :  { %v2353_v23 = vpop.f32.mrf.mxu0 }
 0xd25   :  { %2419 = vmax.xlane.f32.xlu1 %v5928_v62  ;;  %2413 = vmax.xlane.f32.xlu0 %v5923_v8  ;;  %v5935_v6 = vadd.f32 %v4984_v3, %v2353_v23 }
 0xd26   :  { %v4303_v41 = vpop.f32.mrf.mxu0 }
 0xd27   :  { %v5940_v53 = vadd.f32 %v4985_v48, %v4303_v41 }
 0xd28   :  { %v2366_v18 = vpop.f32.mrf.mxu0 }
 0xd29   :  { %2415 = vmax.xlane.f32.xlu1 %v5935_v6  ;;  %2425 = vmax.xlane.f32.xlu0 %v5940_v53  ;;  %v5947_v10 = vadd.f32 %v4986_v4, %v2366_v18 }
 0xd2a   :  { %v4304_v19 = vpop.f32.mrf.mxu0 }
 0xd2b   :  { %v5958_v25 = vadd.f32 %v4988_v12, %v4304_v19 }
 0xd2c   :  { %v2369_v5 = vpop.f32.mrf.mxu0 }
 0xd2d   :  { %v5952_v26 = vadd.f32 %v4987_v22, %v2369_v5  ;;  %2421 = vmax.xlane.f32.xlu0 %v5947_v10 }
 0xd2e   :  { %v4307_v24 = vpop.f32.mrf.mxu0 }
 0xd2f   :  { %2423 = vmax.xlane.f32.xlu1 %v5952_v26  ;;  %v5965_v29 = vadd.f32 %v4989_v54, %v4307_v24 }
 0xd30   :  { %v2382_v33 = vpop.f32.mrf.mxu0 }
 0xd31   :  { %2427 = vmax.xlane.f32.xlu0 %v5958_v25  ;;  %v5977_v51 = vadd.f32 %v4991_v55, %v2382_v33 }
 0xd32   :  { %v4308_v27 = vpop.f32.mrf.mxu0 }
 0xd33   :  { %v5970_v21 = vadd.f32 %v4990_v40, %v4308_v27 }
 0xd34   :  { %v2385_v49 = vpop.f32.mrf.mxu0 }
 0xd35   :  { %2435 = vmax.xlane.f32.xlu1 %v5970_v21  ;;  %2433 = vmax.xlane.f32.xlu0 %v5965_v29  ;;  %v5982_v30 = vadd.f32 %v4992_v60, %v2385_v49 }
 0xd36   :  { %v4311_v35 = vpop.f32.mrf.mxu0 }
 0xd37   :  { %v5989_v45 = vadd.f32 %v4993_v31, %v4311_v35 }
 0xd38   :  { %v2398_v47 = vpop.f32.mrf.mxu0 }
 0xd39   :  { %2431 = vmax.xlane.f32.xlu1 %v5982_v30  ;;  %2429 = vmax.xlane.f32.xlu0 %v5977_v51  ;;  %v6001_v2 = vadd.f32 %v4995_v59, %v2398_v47 }
 0xd3a   :  { %v4312_v14 = vpop.f32.mrf.mxu0 }
 0xd3b   :  { %v5994_v61 = vadd.f32 %v4994_v37, %v4312_v14 }
 0xd3c   :  { %v2401_v11 = vpop.f32.mrf.mxu0 }
 0xd3d   :  { %2443 = vmax.xlane.f32.xlu1 %v5994_v61  ;;  %2441 = vmax.xlane.f32.xlu0 %v5989_v45  ;;  %v6006_v13 = vadd.f32 %v4996_v46, %v2401_v11 }
 0xd41   :  { %2439 = vmax.xlane.f32.xlu1 %v6006_v13  ;;  %2437 = vmax.xlane.f32.xlu0 %v6001_v2 }
 0xd57   :  { %4599 = vrot.lane.b32.xlu0 %v5837_v20, %s4999_s21 }
 0xdaa   :  { %v2418_v43 = vpop.xlane.xlu0 %2417 }
 0xdab   :  { %v2447_v58 = vsub.f32 %v5917_v56, %v2418_v43 }
 0xdad   :  { %v2465_v50 = vmul.f32 1.442695, %v2447_v58 }
 0xdae   :  { %v2420_v38 = vpop.xlane.xlu1 %2419  ;;  %v2414_v52 = vpop.xlane.xlu0 %2413 }
 0xdaf   :  { %4885 = vpow2.f32 %v2465_v50  ;;  %v2448_v34 = vsub.f32 %v5928_v62, %v2420_v38  ;;  %v2445_v63 = vsub.f32 %v5923_v8, %v2414_v52 }
 0xdb1   :  { %v2467_v0 = vmul.f32 1.442695, %v2448_v34  ;;  %v2461_v16 = vmul.f32 1.442695, %v2445_v63 }
 0xdb2   :  { %v2416_v1 = vpop.xlane.xlu1 %2415  ;;  %v2426_v32 = vpop.xlane.xlu0 %2425 }
 0xdb3   :  { %4887 = vpow2.f32 %v2467_v0  ;;  %v2446_v23 = vsub.f32 %v5935_v6, %v2416_v1  ;;  %v2451_v41 = vsub.f32 %v5940_v53, %v2426_v32 }
 0xdb4   :  { %4889 = vpow2.f32 %v2461_v16 }
 0xdb5   :  { %v2463_v3 = vmul.f32 1.442695, %v2446_v23  ;;  %v2473_v56 = vmul.f32 1.442695, %v2451_v41 }
 0xdb6   :  { %v2422_v48 = vpop.xlane.xlu0 %2421 }
 0xdb7   :  { %4891 = vpow2.f32 %v2463_v3  ;;  %v2449_v18 = vsub.f32 %v5947_v10, %v2422_v48 }
 0xdb8   :  { %4893 = vpow2.f32 %v2473_v56  ;;  %v2424_v19 = vpop.xlane.xlu1 %2423 }
 0xdb9   :  { %v2469_v62 = vmul.f32 1.442695, %v2449_v18  ;;  %v2450_v6 = vsub.f32 %v5952_v26, %v2424_v19 }
 0xdba   :  { %v2428_v8 = vpop.xlane.xlu0 %2427 }
 0xdbb   :  { %4895 = vpow2.f32 %v2469_v62  ;;  %v2452_v4 = vsub.f32 %v5958_v25, %v2428_v8  ;;  %v2471_v12 = vmul.f32 1.442695, %v2450_v6 }
 0xdbc   :  { %v6019_v5 = vpop.eup %4885 }
 0xdbd   :  { %v2475_v22 = vmul.f32 1.442695, %v2452_v4  ;;  %2497 = vadd.xlane.f32.xlu1 %v6019_v5 }
 0xdbe   :  { %v2434_v53 = vpop.xlane.xlu0 %2433  ;;  %v2436_v27 = vpop.xlane.xlu1 %2435 }
 0xdbf   :  { %4897 = vpow2.f32 %v2475_v22  ;;  %v2455_v10 = vsub.f32 %v5965_v29, %v2434_v53  ;;  %v2456_v55 = vsub.f32 %v5970_v21, %v2436_v27 }
 0xdc0   :  { %v6023_v24 = vpop.eup %4887  ;;  %4899 = vpow2.f32 %v2471_v12 }
 0xdc1   :  { %v6026_v33 = vpop.eup %4889  ;;  %2499 = vadd.xlane.f32.xlu0 %v6023_v24  ;;  %v2481_v26 = vmul.f32 1.442695, %v2455_v10 }
 0xdc2   :  { %2493 = vadd.xlane.f32.xlu1 %v6026_v33  ;;  %v2430_v25 = vpop.xlane.xlu0 %2429  ;;  %v2432_v47 = vpop.xlane.xlu1 %2431 }
 0xdc3   :  { %v2453_v40 = vsub.f32 %v5977_v51, %v2430_v25  ;;  %4901 = vpow2.f32 %v2481_v26  ;;  %v2483_v51 = vmul.f32 1.442695, %v2456_v55  ;;  %v2454_v37 = vsub.f32 %v5982_v30, %v2432_v47 }
 0xdc4   :  { %v6030_v54 = vpop.eup %4891 }
 0xdc5   :  { %v6033_v49 = vpop.eup %4893  ;;  %v2477_v60 = vmul.f32 1.442695, %v2453_v40  ;;  %v2479_v43 = vmul.f32 1.442695, %v2454_v37 }
 0xdc6   :  { %2495 = vadd.xlane.f32.xlu1 %v6030_v54  ;;  %2505 = vadd.xlane.f32.xlu0 %v6033_v49  ;;  %v2442_v29 = vpop.xlane.xlu0 %2441  ;;  %v2444_v38 = vpop.xlane.xlu1 %2443 }
 0xdc7   :  { %4903 = vpow2.f32 %v2477_v60  ;;  %v2459_v16 = vsub.f32 %v5989_v45, %v2442_v29 }
 0xdc8   :  { %v6037_v35 = vpop.eup %4895  ;;  %4905 = vpow2.f32 %v2483_v51 }
 0xdc9   :  { %4907 = vpow2.f32 %v2479_v43  ;;  %v2489_v32 = vmul.f32 1.442695, %v2459_v16 }
 0xdca   :  { %2501 = vadd.xlane.f32.xlu1 %v6037_v35  ;;  %v2438_v14 = vpop.xlane.xlu0 %2437  ;;  %v2440_v63 = vpop.xlane.xlu1 %2439 }
 0xdcb   :  { %v2458_v0 = vsub.f32 %v6006_v13, %v2440_v63  ;;  %v2457_v41 = vsub.f32 %v6001_v2, %v2438_v14  ;;  %v2460_v13 = vsub.f32 %v5994_v61, %v2444_v38 }
 0xdcc   :  { %v6041_v31 = vpop.eup %4897 }
 0xdcd   :  { %v6045_v21 = vpop.eup %4899  ;;  %v2487_v1 = vmul.f32 1.442695, %v2458_v0  ;;  %v2485_v45 = vmul.f32 1.442695, %v2457_v41  ;;  %v2491_v3 = vmul.f32 1.442695, %v2460_v13 }
 0xdce   :  { %2507 = vadd.xlane.f32.xlu1 %v6041_v31  ;;  %v4600_v11 = vpop.permute.xlu0 %4599 }
 0xdcf   :  { %v4602_v59 = vunpack.i.h.bf16 %v4600_v11  ;;  %v4601_v46 = vunpack.i.l.bf16 %v4600_v11  ;;  %4909 = vpow2.f32 %v2487_v1 }
 0xdd0   :  { %v6048_v50 = vpop.eup %4901  ;;  %4911 = vpow2.f32 %v2489_v32 }
 0xdd1   :  { %v2264_v58 = vpack.c.bf16 %v4602_v59, %v4601_v46  ;;  %4913 = vpow2.f32 %v2485_v45 }
 0xdd2   :  { %2503 = vadd.xlane.f32.xlu1 %v6045_v21  ;;  %4915 = vpow2.f32 %v2491_v3 }
 0xdd3   :  { %4319 = vmatprep.subr.bf16.mxu0 %v2264_v58  ;;  %4400 = vmatprep.subr.bf16.mxu1 %v2264_v58 }
 0xdd4   :  { %4320 = vmatpush3.bf16.msra.mxu0 %v2264_v58  ;;  %4408 = vmatpush3.bf16.msra.mxu1 %v2264_v58  ;;  %v6051_v30 = vpop.eup %4903 }
 0xdd5   :  { %v6056_v52 = vpop.eup %4905 }
 0xdd6   :  { %2513 = vadd.xlane.f32.xlu1 %v6048_v50  ;;  %v6059_v34 = vpop.eup %4907 }
 0xdda   :  { %2509 = vadd.xlane.f32.xlu1 %v6051_v30 }
 0xddc   :  { %4609 = vrot.lane.b32.xlu0 %v5837_v20, %s5000_s22  ;;  %v6066_v20 = vpop.eup %4909 }
 0xddd   :  { %v6069_v23 = vpop.eup %4911 }
 0xdde   :  { %2515 = vadd.xlane.f32.xlu1 %v6056_v52  ;;  %v6074_v56 = vpop.eup %4913 }
 0xde2   :  { %2511 = vadd.xlane.f32.xlu1 %v6059_v34 }
 0xdf3   :  { %4604 = vrot.lane.b32.xlu1 %v5839_v36, %s5000_s22  ;;  %v6077_v36 = vpop.eup %4915 }
 0xdfb   :  { %2519 = vadd.xlane.f32.xlu0 %v6066_v20 }
 0xdff   :  { %2521 = vadd.xlane.f32.xlu0 %v6069_v23 }
 0xe17   :  { %2517 = vadd.xlane.f32.xlu1 %v6074_v56 }
 0xe1b   :  { %2523 = vadd.xlane.f32.xlu1 %v6077_v36 }
 0xe46   :  { %v2498_v48 = vpop.xlane.xlu1 %2497 }
 0xe4a   :  { %v2500_v10 = vpop.xlane.xlu0 %2499 }
 0xe4b   :  { %v2494_v18 = vpop.xlane.xlu1 %2493 }
 0xe4c   :  { %4917 = vrcp.f32 %v2494_v18 }
 0xe4f   :  { %v2496_v62 = vpop.xlane.xlu1 %2495  ;;  %v2506_v26 = vpop.xlane.xlu0 %2505 }
 0xe50   :  { %4919 = vrcp.f32 %v2496_v62 }
 0xe53   :  { %v2502_v2 = vpop.xlane.xlu1 %2501 }
 0xe54   :  { %4921 = vrcp.f32 %v2502_v2 }
 0xe57   :  { %v2508_v19 = vpop.xlane.xlu1 %2507 }
 0xe59   :  { %v4918_v61 = vpop.eup %4917 }
 0xe5a   :  { %v2541_v6 = vmul.f32 %v4918_v61, %v6026_v33  ;;  %v4610_v33 = vpop.permute.xlu0 %4609 }
 0xe5b   :  { %v2504_v8 = vpop.xlane.xlu1 %2503  ;;  %v4612_v51 = vunpack.i.h.bf16 %v4610_v33  ;;  %v4611_v37 = vunpack.i.l.bf16 %v4610_v33 }
 0xe5c   :  { %4923 = vrcp.f32 %v2504_v8 }
 0xe5d   :  { %v4920_v4 = vpop.eup %4919  ;;  %4925 = vrcp.f32 %v2498_v48  ;;  %v2262_v43 = vpack.c.bf16 %v4612_v51, %v4611_v37 }
 0xe5e   :  { %v2542_v22 = vmul.f32 %v4920_v4, %v6030_v54  ;;  %4927 = vrcp.f32 %v2500_v10  ;;  %v4731_v10 = vld [vmem:[%s6379_s6 + $0x78] sm:$0xff]  }
 0xe5f   :  { %v2514_v53 = vpop.xlane.xlu1 %2513  ;;  %4929 = vrcp.f32 %v2506_v26 }
 0xe60   :  { %v2557_v12 = vpack.c.bf16 %v2542_v22, %v2541_v6  ;;  %4931 = vrcp.f32 %v2508_v19 }
 0xe61   :  { %v4922_v27 = vpop.eup %4921 }
 0xe62   :  { %4329 = vmatprep.mubr.bf16.mxu0 %v2557_v12  ;;  %v2545_v55 = vmul.f32 %v4922_v27, %v6037_v35  ;;  %v4725_v12 = vld [vmem:[%s6379_s6 + $0x58] sm:$0xff]  }
 0xe63   :  { %v2510_v25 = vpop.xlane.xlu1 %2509 }
 0xe67   :  { %v2516_v40 = vpop.xlane.xlu1 %2515 }
 0xe69   :  { %v4924_v29 = vpop.eup %4923 }
 0xe6a   :  { %v2546_v60 = vmul.f32 %v4924_v29, %v6045_v21  ;;  %v4926_v35 = vpop.eup %4925 }
 0xe6b   :  { %v2512_v47 = vpop.xlane.xlu1 %2511  ;;  %v4928_v21 = vpop.eup %4927  ;;  %v2543_v41 = vmul.f32 %v4926_v35, %v6019_v5 }
 0xe6c   :  { %v2559_v14 = vpack.c.bf16 %v2546_v60, %v2545_v55  ;;  %4933 = vrcp.f32 %v2512_v47  ;;  %v4930_v58 = vpop.eup %4929  ;;  %v2544_v16 = vmul.f32 %v4928_v21, %v6023_v24 }
 0xe6d   :  { %4935 = vrcp.f32 %v2510_v25  ;;  %v4932_v38 = vpop.eup %4931  ;;  %v2547_v13 = vmul.f32 %v4930_v58, %v6033_v49 }
 0xe6e   :  { %4333 = vmatprep.mubr.bf16.mxu1 %v2559_v14  ;;  %4937 = vrcp.f32 %v2516_v40  ;;  %v2548_v1 = vmul.f32 %v4932_v38, %v6041_v31  ;;  %v2558_v45 = vpack.c.bf16 %v2544_v16, %v2543_v41 }
 0xe6f   :  { %v4605_v54 = vpop.permute.xlu1 %4604  ;;  %4939 = vrcp.f32 %v2514_v53 }
 0xe70   :  { %v4607_v11 = vunpack.i.h.bf16 %v4605_v54  ;;  %v4606_v59 = vunpack.i.l.bf16 %v4605_v54  ;;  %v2560_v3 = vpack.c.bf16 %v2548_v1, %v2547_v13 }
 0xe72   :  { %v2263_v46 = vpack.c.bf16 %v4607_v11, %v4606_v59  ;;  %v4730_v11 = vld [vmem:[%s6379_s6 + $0x60] sm:$0xff]   ;;  %v4732_v59 = vld [vmem:[%s6379_s6 + $0x70] sm:$0xff]  }
 0xe74   :  { %4321 = vmatprep.subr.bf16.mxu0 %v2263_v46  ;;  %4401 = vmatprep.subr.bf16.mxu1 %v2263_v46 }
 0xe75   :  { %4322 = vmatpush3.bf16.msra.mxu0 %v2263_v46  ;;  %4409 = vmatpush3.bf16.msra.mxu1 %v2263_v46 }
 0xe76   :  { %4323 = vmatprep.subr.bf16.mxu0 %v2262_v43  ;;  %4402 = vmatprep.subr.bf16.mxu1 %v2262_v43 }
 0xe79   :  { %4324 = vmatpush3.bf16.msra.mxu0 %v2262_v43  ;;  %4410 = vmatpush3.bf16.msra.mxu1 %v2262_v43  ;;  %v4934_v63 = vpop.eup %4933 }
 0xe7a   :  { %4325 = vmatprep.subr.bf16.mxu0 %v5843_v44  ;;  %4403 = vmatprep.subr.bf16.mxu1 %v5843_v44  ;;  %v4936_v0 = vpop.eup %4935  ;;  %v2550_v32 = vmul.f32 %v4934_v63, %v6059_v34 }
 0xe7b   :  { %v4938_v48 = vpop.eup %4937 }
 0xe7c   :  { %v4940_v24 = vpop.eup %4939  ;;  %v2552_v31 = vmul.f32 %v4938_v48, %v6056_v52 }
 0xe7d   :  { %4326 = vmatpush3.bf16.msra.mxu0 %v5843_v44  ;;  %4411 = vmatpush3.bf16.msra.mxu1 %v5843_v44  ;;  %v2549_v44 = vmul.f32 %v4936_v0, %v6051_v30  ;;  %v2551_v5 = vmul.f32 %v4940_v24, %v6048_v50 }
 0xe7e   :  { %4327 = vmatprep.subr.bf16.mxu0 %v5845_v9  ;;  %4404 = vmatprep.subr.bf16.mxu1 %v5845_v9 }
 0xe7f   :  { %v2561_v18 = vpack.c.bf16 %v2550_v32, %v2549_v44  ;;  %v2562_v34 = vpack.c.bf16 %v2552_v31, %v2551_v5 }
 0xe81   :  { %4328 = vmatpush3.bf16.msra.mxu0 %v5845_v9  ;;  %4412 = vmatpush3.bf16.msra.mxu1 %v5845_v9 }
 0xe82   :  { %4345 = vmatprep.subr.bf16.mxu1 %v4725_v12 }
 0xe84   :  { %4330 = vmatmul.mubr.bf16.vlgmr.msra.gmra.mxu0 %v2558_v45  ;;  %4334 = vmatmul.mubr.bf16.vlgmr.msra.gmra.mxu1 %v2560_v3  ;;  %v2520_v49 = vpop.xlane.xlu0 %2519 }
 0xe85   :  { %4337 = vmatprep.mubr.bf16.mxu1 %v2561_v18  ;;  %4941 = vrcp.f32 %v2520_v49  ;;  %4346 = vmatpush3.bf16.msra.mxu1 %v4725_v12 }
 0xe88   :  { %v2522_v62 = vpop.xlane.xlu0 %2521 }
 0xe8c   :  { %4338 = vmatmul.mubr.bf16.gmra.mxu1 %v2562_v34 }
 0xe92   :  { %v4942_v2 = vpop.eup %4941 }
 0xe93   :  { %v2554_v8 = vmul.f32 %v4942_v2, %v6066_v20  ;;  %v4727_v20 = vld [vmem:[%s6379_s6 + $0x50] sm:$0xff]  }
 0xe94   :  { %4347 = vmatprep.subr.bf16.mxu1 %v4727_v20 }
 0xe95   :  { %4348 = vmatpush3.bf16.msra.mxu1 %v4727_v20 }
 0xea0   :  { %v2518_v9 = vpop.xlane.xlu1 %2517 }
 0xea1   :  { %4943 = vrcp.f32 %v2518_v9 }
 0xea2   :  { %4945 = vrcp.f32 %v2522_v62 }
 0xea4   :  { %v2524_v30 = vpop.xlane.xlu1 %2523 }
 0xea5   :  { %4947 = vrcp.f32 %v2524_v30 }
 0xeae   :  { %v4944_v19 = vpop.eup %4943 }
 0xeaf   :  { %v2553_v61 = vmul.f32 %v4944_v19, %v6074_v56  ;;  %v4946_v4 = vpop.eup %4945  ;;  %v4726_v56 = vld [vmem:[%s6379_s6 + $0x48] sm:$0xff]  }
 0xeb0   :  { %v2555_v50 = vmul.f32 %v4946_v4, %v6069_v23  ;;  %4353 = vmatprep.subr.bf16.mxu0 %v4726_v56  ;;  %v4728_v23 = vld [vmem:[%s6379_s6 + $0x40] sm:$0xff]  }
 0xeb1   :  { %v2563_v52 = vpack.c.bf16 %v2554_v8, %v2553_v61  ;;  %4354 = vmatpush3.bf16.msra.mxu0 %v4726_v56  ;;  %v3862_v4 = vld [vmem:[%s6380_s7 + $0x1] ss:$0 sm:$0xff] }
 0xeb2   :  { %v4948_v6 = vpop.eup %4947  ;;  %4355 = vmatprep.subr.bf16.mxu0 %v4728_v23 }
 0xeb3   :  { %4341 = vmatprep.mubr.bf16.mxu1 %v2563_v52  ;;  %v2556_v22 = vmul.f32 %v4948_v6, %v6077_v36  ;;  %v4729_v36 = vld [vmem:[%s6379_s6 + $0x68] sm:$0xff]  }
 0xeb4   :  { %4361 = vmatprep.subr.bf16.mxu1 %v4729_v36 }
 0xeb5   :  { %v2564_v53 = vpack.c.bf16 %v2556_v22, %v2555_v50  ;;  %4356 = vmatpush3.bf16.msra.mxu0 %v4728_v23 }
 0xeb6   :  { %4369 = vmatprep.subr.bf16.mxu0 %v4731_v10 }
 0xeb7   :  { %4342 = vmatmul.mubr.bf16.gmra.mxu1 %v2564_v53 }
 0xf44   :  { %v4331_v25 = vpop.f32.mrf.mxu0  ;;  %v4335_v27 = vpop.f32.mrf.mxu1 }
 0xf46   :  { %v2599_v26 = vpop.f32.mrf.mxu0  ;;  %v2615_v40 = vpop.f32.mrf.mxu1 }
 0xf48   :  { %v4332_v29 = vpop.f32.mrf.mxu0  ;;  %v4336_v55 = vpop.f32.mrf.mxu1 }
 0xf49   :  { %v2663_v54 = vpack.c.bf16 %v4332_v29, %v4331_v25  ;;  %v2665_v51 = vpack.c.bf16 %v4336_v55, %v4335_v27 }
 0xf4a   :  { %v2602_v60 = vpop.f32.mrf.mxu0  ;;  %v2618_v47 = vpop.f32.mrf.mxu1 }
 0xf4b   :  { %v2662_v14 = vpack.c.bf16 %v2602_v60, %v2599_v26  ;;  %v2664_v33 = vpack.c.bf16 %v2618_v47, %v2615_v40  ;;  %v4733_v60 = vld [vmem:[%s6381_s10 + $0xf0] ss:$8 sps:$4 sm:$0xff]  }
 0xf4c   :  { %v4339_v37 = vpop.f32.mrf.mxu1 }
 0xf4d   :  { %4349 = vmatprep.mubr.msk.bf16.mxu1 %vm572_vm0, %v2664_v33  ;;  %4357 = vmatprep.mubr.msk.bf16.mxu0 %vm572_vm0, %v2662_v14 }
 0xf4e   :  { %v2631_v46 = vpop.f32.mrf.mxu1  ;;  %4350 = vmatmul.mubr.msk.bf16.vlgmr.msra.gmra.mxu1 %vm572_vm0, %v2665_v51  ;;  %4358 = vmatmul.mubr.msk.bf16.vlgmr.msra.gmra.mxu0 %vm572_vm0, %v2663_v54 }
 0xf4f   :  { %4362 = vmatpush3.bf16.msra.mxu1 %v4729_v36  ;;  %4370 = vmatpush3.bf16.msra.mxu0 %v4731_v10 }
 0xf50   :  { %v4340_v43 = vpop.f32.mrf.mxu1  ;;  %4363 = vmatprep.subr.bf16.mxu1 %v4730_v11  ;;  %4371 = vmatprep.subr.bf16.mxu0 %v4732_v59 }
 0xf51   :  { %v2667_v58 = vpack.c.bf16 %v4340_v43, %v4339_v37 }
 0xf52   :  { %v2634_v35 = vpop.f32.mrf.mxu1 }
 0xf53   :  { %v2666_v21 = vpack.c.bf16 %v2634_v35, %v2631_v46  ;;  %4364 = vmatpush3.bf16.msra.mxu1 %v4730_v11  ;;  %4372 = vmatpush3.bf16.msra.mxu0 %v4732_v59 }
 0xf55   :  { %4365 = vmatprep.mubr.msk.bf16.mxu1 %vm572_vm0, %v2666_v21 }
 0xf56   :  { %4366 = vmatmul.mubr.msk.bf16.vlgmr.msra.gmra.mxu1 %vm572_vm0, %v2667_v58 }
 0xf57   :  { %3191 = vmatprep.mubr.bf16.mxu1 %v4997_v39 }
 0xf77   :  { %v4343_v38 = vpop.f32.mrf.mxu1 }
 0xf79   :  { %v2647_v63 = vpop.f32.mrf.mxu1 }
 0xf7b   :  { %v4344_v0 = vpop.f32.mrf.mxu1 }
 0xf7c   :  { %v2669_v32 = vpack.c.bf16 %v4344_v0, %v4343_v38  ;;  %v4738_v38 = vld [vmem:[%s6381_s10 + $0xe4] ss:$8 sps:$4 sm:$0xff]   ;;  %v4741_v0 = vld [vmem:[%s6381_s10 + $0xd4] ss:$8 sps:$4 sm:$0xff]  }
 0xf7d   :  { %v2650_v16 = vpop.f32.mrf.mxu1 }
 0xf7e   :  { %v2668_v1 = vpack.c.bf16 %v2650_v16, %v2647_v63  ;;  %v4736_v63 = vld [vmem:[%s6381_s10 + $0xe0] ss:$8 sps:$4 sm:$0xff]   ;;  %v4739_v16 = vld [vmem:[%s6381_s10 + $0xd0] ss:$8 sps:$4 sm:$0xff]  }
 0xf80   :  { %4373 = vmatprep.mubr.msk.bf16.mxu0 %vm572_vm0, %v2668_v1  ;;  %v4744_v1 = vld [vmem:[%s6381_s10 + $0xc4] ss:$8 sps:$4 sm:$0xff]  }
 0xf81   :  { %4374 = vmatmul.mubr.msk.bf16.vlgmr.msra.gmra.mxu0 %vm572_vm0, %v2669_v32  ;;  %v4742_v32 = vld [vmem:[%s6381_s10 + $0xc0] ss:$8 sps:$4 sm:$0xff]  }
0x100e   :  { %v4351_v41 = vpop.f32.mrf.mxu1  ;;  %v4359_v45 = vpop.f32.mrf.mxu0 }
0x100f   :  { %v2815_v19 = vadd.f32 %v4359_v45, %v4351_v41  ;;  %v4747_v41 = vld [vmem:[%s6381_s10 + $0xb4] ss:$8 sps:$4 sm:$0xff]   ;;  %v4748_v45 = vld [vmem:[%s6381_s10 + $0xa0] ss:$8 sps:$4 sm:$0xff]  }
0x1010   :  { %v2739_v13 = vpop.f32.mrf.mxu1  ;;  %v2806_v48 = vpop.f32.mrf.mxu0 }
0x1011   :  { %v2807_v49 = vadd.f32 %v2806_v48, %v2739_v13  ;;  %v4745_v13 = vld [vmem:[%s6381_s10 + $0xb0] ss:$8 sps:$4 sm:$0xff]  }
0x1012   :  { %v4352_v44 = vpop.f32.mrf.mxu1  ;;  %v4360_v24 = vpop.f32.mrf.mxu0  ;;  %v4751_v48 = vld [vmem:[%s6381_s10 + $0x90] ss:$8 sps:$4 sm:$0xff]  }
0x1013   :  { %v2818_v12 = vadd.f32 %v4360_v24, %v4352_v44  ;;  %v4750_v44 = vld [vmem:[%s6381_s10 + $0xa4] ss:$8 sps:$4 sm:$0xff]   ;;  %v4754_v24 = vld [vmem:[%s6381_s10 + $0x80] ss:$8 sps:$4 sm:$0xff]  }
0x1014   :  { %v2742_v3 = vpop.f32.mrf.mxu1  ;;  %v2809_v5 = vpop.f32.mrf.mxu0 }
0x1015   :  { %v2810_v61 = vadd.f32 %v2809_v5, %v2742_v3  ;;  %v4753_v3 = vld [vmem:[%s6381_s10 + $0x94] ss:$8 sps:$4 sm:$0xff]  }
0x1016   :  { %v4367_v18 = vpop.f32.mrf.mxu1 }
0x1017   :  { %v2890_v6 = vadd.f32 %v4367_v18, %v2815_v19  ;;  %v4756_v18 = vld [vmem:[%s6381_s10 + $0x84] ss:$8 sps:$4 sm:$0xff]  }
0x1018   :  { %v2873_v31 = vpop.f32.mrf.mxu1 }
0x1019   :  { %v2888_v9 = vadd.f32 %v2873_v31, %v2807_v49 }
0x101a   :  { %v4368_v34 = vpop.f32.mrf.mxu1 }
0x101b   :  { %v2891_v36 = vadd.f32 %v4368_v34, %v2818_v12 }
0x101c   :  { %v2876_v30 = vpop.f32.mrf.mxu1 }
0x101d   :  { %v2889_v50 = vadd.f32 %v2876_v30, %v2810_v61 }
0x1041   :  { %v4375_v62 = vpop.f32.mrf.mxu0 }
0x1042   :  { %v2961_v56 = vadd.f32 %v4375_v62, %v2890_v6 }
0x1043   :  { %v2944_v2 = vpop.f32.mrf.mxu0 }
0x1044   :  { %v2959_v8 = vadd.f32 %v2944_v2, %v2888_v9  ;;  %v2973_v25 = vadd.f32 %v3862_v4, %v2961_v56  ;;  %v3866_v56 = vld [vmem:[%s6383_s9 + $0x1] ss:$0 sm:$0xff] }
0x1045   :  { %v4376_v52 = vpop.f32.mrf.mxu0 }
0x1046   :  { %v2971_v22 = vadd.f32 %v3862_v4, %v2959_v8  ;;  %v2962_v27 = vadd.f32 %v4376_v52, %v2891_v36  ;;  %v2977_v29 = vadd.f32 %v2973_v25, %v5812_v57 }
0x1047   :  { %v2947_v53 = vpop.f32.mrf.mxu0 }
0x1048   :  { %v2960_v20 = vadd.f32 %v2947_v53, %v2889_v50  ;;  %v2975_v23 = vadd.f32 %v2971_v22, %v5803_v7  ;;  %v2974_v40 = vadd.f32 %v3862_v4, %v2962_v27  ;;  %v4735_v7 = vld [vmem:[%s6381_s10 + $0xf4] ss:$8 sps:$4 sm:$0xff]   ;;  %v3865_v50 = vld [vmem:[%s6382_s8 + $0x1] ss:$0 sm:$0xff] }
0x1049   :  { %3159 = vmatprep.subr.bf16.mxu1 %v4735_v7 }
0x104a   :  { %v2972_v10 = vadd.f32 %v3862_v4, %v2960_v20  ;;  %2983 = vadd.xlane.f32.xlu1 %v2975_v23  ;;  %v2978_v55 = vadd.f32 %v2974_v40, %v5814_v42  ;;  %3160 = vmatpush1.bf16.msra.mxu1 %v4733_v60 }
0x104b   :  { %3161 = vmatprep.subr.bf16.mxu1 %v4738_v38  ;;  %v3883_v38 = vld [vmem:[%s6385_s11 + $0x2] sm:$0x3] }
0x104c   :  { %v2976_v26 = vadd.f32 %v2972_v10, %v5805_v28 }
0x104e   :  { %2985 = vadd.xlane.f32.xlu1 %v2976_v26  ;;  %3162 = vmatpush1.bf16.msra.mxu1 %v4736_v63  ;;  %v3072_v63 = vrot.slane %v3883_v38, %v5223_v15 }
0x104f   :  { %3163 = vmatprep.subr.bf16.mxu1 %v4741_v0  ;;  %v3076_v0 = vrot.slane %v3883_v38, %v5229_v17 }
0x1052   :  { %2987 = vadd.xlane.f32.xlu1 %v2977_v29  ;;  %3164 = vmatpush1.bf16.msra.mxu1 %v4739_v16 }
0x1053   :  { %3165 = vmatprep.subr.bf16.mxu1 %v4744_v1 }
0x1056   :  { %2989 = vadd.xlane.f32.xlu1 %v2978_v55  ;;  %3166 = vmatpush1.bf16.msra.mxu1 %v4742_v32 }
0x1057   :  { %3167 = vmatprep.subr.bf16.mxu1 %v4747_v41 }
0x105a   :  { %3168 = vmatpush1.bf16.msra.mxu1 %v4745_v13 }
0x105b   :  { %3169 = vmatprep.subr.bf16.mxu1 %v4750_v44 }
0x105e   :  { %3170 = vmatpush1.bf16.msra.mxu1 %v4748_v45 }
0x105f   :  { %3171 = vmatprep.subr.bf16.mxu1 %v4753_v3 }
0x1062   :  { %3172 = vmatpush1.bf16.msra.mxu1 %v4751_v48 }
0x1063   :  { %3173 = vmatprep.subr.bf16.mxu1 %v4756_v18 }
0x1066   :  { %3174 = vmatpush1.bf16.msra.mxu1 %v4754_v24 }
0x10d3   :  { %v2984_v47 = vpop.xlane.xlu1 %2983 }
0x10d4   :  { %v2991_v28 = vmul.f32 0.0078125, %v2984_v47 }
0x10d6   :  { %v6150_v14 = vsub.f32 %v2975_v23, %v2991_v28  ;;  %v4757_v28 = vld [vmem:[%s6384_s12 + $0xf8] sm:$0xff]  }
0x10d7   :  { %v2986_v33 = vpop.xlane.xlu1 %2985  ;;  %4107 = vmatprep.subr.bf16.mxu0 %v4757_v28 }
0x10d8   :  { %v2992_v57 = vmul.f32 0.0078125, %v2986_v33  ;;  %v2999_v42 = vmul.f32 %v6150_v14, %v6150_v14  ;;  %v4760_v33 = vld [vmem:[%s6384_s12 + $0xb0] sm:$0xff]  }
0x10da   :  { %v2996_v54 = vsub.f32 %v2976_v26, %v2992_v57  ;;  %3003 = vadd.xlane.f32.xlu1 %v2999_v42  ;;  %v4761_v57 = vld [vmem:[%s6384_s12 + $0xe8] sm:$0xff]  }
0x10db   :  { %v2988_v51 = vpop.xlane.xlu1 %2987  ;;  %v4762_v42 = vld [vmem:[%s6384_s12 + $0xa8] sm:$0xff]  }
0x10dc   :  { %v2993_v37 = vmul.f32 0.0078125, %v2988_v51  ;;  %v3000_v11 = vmul.f32 %v2996_v54, %v2996_v54  ;;  %v4764_v51 = vld [vmem:[%s6384_s12 + $0xa0] sm:$0xff]  }
0x10de   :  { %v6154_v59 = vsub.f32 %v2977_v29, %v2993_v37  ;;  %3005 = vadd.xlane.f32.xlu1 %v3000_v11  ;;  %v4765_v37 = vld [vmem:[%s6384_s12 + $0xd8] sm:$0xff]  }
0x10df   :  { %v2990_v46 = vpop.xlane.xlu1 %2989  ;;  %v4766_v11 = vld [vmem:[%s6384_s12 + $0x98] sm:$0xff]  }
0x10e0   :  { %v2994_v43 = vmul.f32 0.0078125, %v2990_v46  ;;  %v3001_v35 = vmul.f32 %v6154_v59, %v6154_v59  ;;  %v4768_v46 = vld [vmem:[%s6384_s12 + $0x90] sm:$0xff]  }
0x10e2   :  { %v6158_v21 = vsub.f32 %v2978_v55, %v2994_v43  ;;  %3007 = vadd.xlane.f32.xlu0 %v3001_v35  ;;  %v4769_v43 = vld [vmem:[%s6384_s12 + $0xc8] sm:$0xff]  }
0x10e3   :  { %v4770_v35 = vld [vmem:[%s6384_s12 + $0x88] sm:$0xff]  }
0x10e4   :  { %v3002_v58 = vmul.f32 %v6158_v21, %v6158_v21 }
0x10e6   :  { %3009 = vadd.xlane.f32.xlu1 %v3002_v58  ;;  %v4772_v58 = vld [vmem:[%s6384_s12 + $0x80] sm:$0xff]  }
0x1163   :  { %v3004_v31 = vpop.xlane.xlu1 %3003 }
0x1164   :  { %v3011_v5 = vmul.f32 0.0078125, %v3004_v31 }
0x1166   :  { %v3015_v34 = vadd.f32 1e-12, %v3011_v5 }
0x1167   :  { %v3006_v49 = vpop.xlane.xlu1 %3005 }
0x1168   :  { %4949 = vrsqrt.f32 %v3015_v34  ;;  %v3012_v62 = vmul.f32 0.0078125, %v3006_v49 }
0x116a   :  { %v3016_v9 = vadd.f32 1e-12, %v3012_v62 }
0x116b   :  { %v3008_v30 = vpop.xlane.xlu0 %3007 }
0x116c   :  { %4951 = vrsqrt.f32 %v3016_v9  ;;  %v3013_v2 = vmul.f32 0.0078125, %v3008_v30 }
0x116e   :  { %v3017_v19 = vadd.f32 1e-12, %v3013_v2 }
0x116f   :  { %v3010_v61 = vpop.xlane.xlu1 %3009 }
0x1170   :  { %4953 = vrsqrt.f32 %v3017_v19  ;;  %v3014_v8 = vmul.f32 0.0078125, %v3010_v61 }
0x1172   :  { %v3018_v4 = vadd.f32 1e-12, %v3014_v8 }
0x1174   :  { %4955 = vrsqrt.f32 %v3018_v4 }
0x1175   :  { %v4950_v52 = vpop.eup %4949 }
0x1176   :  { %v3023_v6 = vmul.f32 %v4950_v52, %v6150_v14  ;;  %v4758_v14 = vld [vmem:[%s6384_s12 + $0xb8] sm:$0xff]  }
0x1177   :  { %4108 = vmatpush3.bf16.msra.mxu0 %v4758_v14 }
0x1178   :  { %v3033_v12 = vmul.f32 %v3865_v50, %v3023_v6 }
0x1179   :  { %v4952_v22 = vpop.eup %4951 }
0x117a   :  { %v3024_v53 = vmul.f32 %v4952_v22, %v2996_v54  ;;  %v6211_v36 = vadd.f32 %v3866_v56, %v3033_v12  ;;  %v4763_v54 = vld [vmem:[%s6384_s12 + $0xe0] sm:$0xff]  }
0x117c   :  { %v3034_v20 = vmul.f32 %v3865_v50, %v3024_v53 }
0x117d   :  { %v4954_v23 = vpop.eup %4953 }
0x117e   :  { %v6213_v10 = vadd.f32 %v3866_v56, %v3034_v20  ;;  %v3025_v25 = vmul.f32 %v4954_v23, %v6154_v59  ;;  %v4767_v59 = vld [vmem:[%s6384_s12 + $0xd0] sm:$0xff]  }
0x1180   :  { %v3064_v27 = vpack.c.bf16 %v6213_v10, %v6211_v36  ;;  %v3035_v29 = vmul.f32 %v3865_v50, %v3025_v25 }
0x1181   :  { %v4956_v26 = vpop.eup %4955 }
0x1182   :  { %3192 = vmatmul.mubr.bf16.vlgmr.msra.gmra.mxu1 %v3064_v27  ;;  %v3026_v40 = vmul.f32 %v4956_v26, %v6158_v21  ;;  %v6220_v60 = vadd.f32 %v3866_v56, %v3035_v29  ;;  %v4771_v21 = vld [vmem:[%s6384_s12 + $0xc0] sm:$0xff]  }
0x1183   :  { %3201 = vmatprep.mubr.bf16.mxu1 %v4997_v39  ;;  %v4759_v39 = vld [vmem:[%s6384_s12 + $0xf0] sm:$0xff]  }
0x1184   :  { %v3036_v55 = vmul.f32 %v3865_v50, %v3026_v40  ;;  %4109 = vmatprep.subr.bf16.mxu0 %v4759_v39 }
0x1185   :  { %4110 = vmatpush3.bf16.msra.mxu0 %v4760_v33 }
0x1186   :  { %v6222_v7 = vadd.f32 %v3866_v56, %v3036_v55  ;;  %4111 = vmatprep.subr.bf16.mxu0 %v4761_v57 }
0x1188   :  { %v3065_v47 = vpack.c.bf16 %v6222_v7, %v6220_v60 }
0x1189   :  { %4112 = vmatpush3.bf16.msra.mxu0 %v4762_v42 }
0x118a   :  { %3202 = vmatmul.mubr.bf16.gmra.mxu1 %v3065_v47  ;;  %4113 = vmatprep.subr.bf16.mxu0 %v4763_v54 }
0x118d   :  { %4114 = vmatpush3.bf16.msra.mxu0 %v4764_v51 }
0x118e   :  { %4115 = vmatprep.subr.bf16.mxu0 %v4765_v37 }
0x1191   :  { %4116 = vmatpush3.bf16.msra.mxu0 %v4766_v11 }
0x1192   :  { %4117 = vmatprep.subr.bf16.mxu0 %v4767_v59 }
0x1195   :  { %4118 = vmatpush3.bf16.msra.mxu0 %v4768_v46 }
0x1196   :  { %4119 = vmatprep.subr.bf16.mxu0 %v4769_v43 }
0x1199   :  { %4120 = vmatpush3.bf16.msra.mxu0 %v4770_v35 }
0x119a   :  { %4121 = vmatprep.subr.bf16.mxu0 %v4771_v21 }
0x119d   :  { %4122 = vmatpush3.bf16.msra.mxu0 %v4772_v58 }
0x1242   :  { %v3193_v16 = vpop.f32.mrf.mxu1 }
0x1243   :  { %v6279_v1 = vadd.f32 %v3193_v16, %v3072_v63 }
0x1244   :  { %v3195_v32 = vpop.f32.mrf.mxu1 }
0x1245   :  { %v3212_v41 = vmul.f32 %v6279_v1, %v6279_v1  ;;  %v6283_v13 = vadd.f32 %v3195_v32, %v3076_v0 }
0x1246   :  { %v3197_v44 = vpop.f32.mrf.mxu1 }
0x1247   :  { %v3220_v45 = vmul.f32 %v3212_v41, %v6279_v1  ;;  %v3213_v3 = vmul.f32 %v6283_v13, %v6283_v13  ;;  %v6288_v48 = vadd.f32 %v3197_v44, %v3072_v63 }
0x1248   :  { %v3199_v15 = vpop.f32.mrf.mxu1 }
0x1249   :  { %v3228_v18 = vmul.f32 0.044715, %v3220_v45  ;;  %v3221_v17 = vmul.f32 %v3213_v3, %v6283_v13  ;;  %v3214_v24 = vmul.f32 %v6288_v48, %v6288_v48  ;;  %v6293_v31 = vadd.f32 %v3199_v15, %v3076_v0 }
0x124a   :  { %v3203_v5 = vpop.f32.mrf.mxu1 }
0x124b   :  { %v3236_v34 = vadd.f32 %v3228_v18, %v6279_v1  ;;  %v3229_v49 = vmul.f32 0.044715, %v3221_v17  ;;  %v3222_v62 = vmul.f32 %v3214_v24, %v6288_v48  ;;  %v3215_v9 = vmul.f32 %v6293_v31, %v6293_v31 }
0x124c   :  { %v6299_v30 = vadd.f32 %v3203_v5, %v3072_v63  ;;  %v3205_v2 = vpop.f32.mrf.mxu1 }
0x124d   :  { %v3244_v19 = vmul.f32 0.7978846, %v3236_v34  ;;  %v3237_v61 = vadd.f32 %v3229_v49, %v6283_v13  ;;  %v3230_v8 = vmul.f32 0.044715, %v3222_v62  ;;  %v3223_v4 = vmul.f32 %v3215_v9, %v6293_v31 }
0x124e   :  { %v3216_v52 = vmul.f32 %v6299_v30, %v6299_v30  ;;  %v6305_v6 = vadd.f32 %v3205_v2, %v3076_v0  ;;  %v3207_v50 = vpop.f32.mrf.mxu1 }
0x124f   :  { %v3245_v22 = vmul.f32 0.7978846, %v3237_v61  ;;  %v3238_v53 = vadd.f32 %v3230_v8, %v6288_v48  ;;  %v3231_v12 = vmul.f32 0.044715, %v3223_v4  ;;  %4957 = vtanh.f32 %v3244_v19 }
0x1250   :  { %v3224_v56 = vmul.f32 %v3216_v52, %v6299_v30  ;;  %v3217_v20 = vmul.f32 %v6305_v6, %v6305_v6  ;;  %v3208_v23 = vadd.f32 %v3207_v50, %v3072_v63  ;;  %v3209_v25 = vpop.f32.mrf.mxu1 }
0x1251   :  { %4959 = vtanh.f32 %v3245_v22  ;;  %v3246_v27 = vmul.f32 0.7978846, %v3238_v53  ;;  %v3239_v26 = vadd.f32 %v3231_v12, %v6293_v31  ;;  %v3210_v40 = vadd.f32 %v3209_v25, %v3076_v0 }
0x1252   :  { %v3232_v29 = vmul.f32 0.044715, %v3224_v56  ;;  %v3225_v55 = vmul.f32 %v3217_v20, %v6305_v6  ;;  %v3218_v47 = vmul.f32 %v3208_v23, %v3208_v23 }
0x1253   :  { %4961 = vtanh.f32 %v3246_v27  ;;  %v3247_v28 = vmul.f32 0.7978846, %v3239_v26  ;;  %v3219_v14 = vmul.f32 %v3210_v40, %v3210_v40  ;;  %v3933_v26 = vld [vmem:[%s6386_s13 + $0x1] ss:$0 sm:$0xff] }
0x1254   :  { %v3240_v39 = vadd.f32 %v3232_v29, %v6299_v30  ;;  %v3233_v33 = vmul.f32 0.044715, %v3225_v55  ;;  %v3226_v57 = vmul.f32 %v3218_v47, %v3208_v23 }
0x1255   :  { %4963 = vtanh.f32 %v3247_v28  ;;  %v3227_v42 = vmul.f32 %v3219_v14, %v3210_v40 }
0x1256   :  { %v3248_v54 = vmul.f32 0.7978846, %v3240_v39  ;;  %v3241_v51 = vadd.f32 %v3233_v33, %v6305_v6  ;;  %v3234_v37 = vmul.f32 0.044715, %v3226_v57 }
0x1257   :  { %v3235_v11 = vmul.f32 0.044715, %v3227_v42 }
0x1258   :  { %4965 = vtanh.f32 %v3248_v54  ;;  %v3249_v59 = vmul.f32 0.7978846, %v3241_v51  ;;  %v3242_v46 = vadd.f32 %v3234_v37, %v3208_v23 }
0x1259   :  { %v3243_v43 = vadd.f32 %v3235_v11, %v3210_v40 }
0x125a   :  { %4967 = vtanh.f32 %v3249_v59  ;;  %v3250_v35 = vmul.f32 0.7978846, %v3242_v46 }
0x125b   :  { %v3251_v21 = vmul.f32 0.7978846, %v3243_v43 }
0x125c   :  { %4969 = vtanh.f32 %v3250_v35  ;;  %v4958_v58 = vpop.eup %4957 }
0x125d   :  { %4971 = vtanh.f32 %v3251_v21  ;;  %v3260_v16 = vadd.f32 1.0, %v4958_v58 }
0x125e   :  { %v4960_v38 = vpop.eup %4959 }
0x125f   :  { %v3261_v63 = vadd.f32 1.0, %v4960_v38  ;;  %v3268_v15 = vmul.f32 0.5, %v3260_v16 }
0x1260   :  { %v4962_v0 = vpop.eup %4961 }
0x1261   :  { %v3262_v32 = vadd.f32 1.0, %v4962_v0  ;;  %v3269_v3 = vmul.f32 0.5, %v3261_v63  ;;  %v3276_v62 = vmul.f32 %v3268_v15, %v6279_v1  ;;  %v4774_v15 = vld [vmem:[%s6389_s16 + $0x30] sm:$0xff]  }
0x1262   :  { %v4964_v41 = vpop.eup %4963 }
0x1263   :  { %v3270_v44 = vmul.f32 0.5, %v3262_v32  ;;  %v3263_v45 = vadd.f32 1.0, %v4964_v41  ;;  %v3277_v34 = vmul.f32 %v3269_v3, %v6283_v13  ;;  %v4773_v3 = vld [vmem:[%s6389_s16 + $0x38] sm:$0xff]  }
0x1264   :  { %4377 = vmatprep.subr.bf16.mxu1 %v4773_v3 }
0x1265   :  { %v4966_v18 = vpop.eup %4965  ;;  %v3271_v17 = vmul.f32 0.5, %v3263_v45  ;;  %v3278_v24 = vmul.f32 %v3270_v44, %v6288_v48  ;;  %4378 = vmatpush3.bf16.msra.mxu1 %v4773_v3 }
0x1266   :  { %v3264_v2 = vadd.f32 1.0, %v4966_v18  ;;  %4379 = vmatprep.subr.bf16.mxu1 %v4774_v15  ;;  %v4775_v18 = vld [vmem:[%s6389_s16 + $0x28] sm:$0xff]  }
0x1267   :  { %v4968_v5 = vpop.eup %4967  ;;  %v3279_v49 = vmul.f32 %v3271_v17, %v6293_v31  ;;  %v3317_v4 = vpack.c.bf16 %v3278_v24, %v3276_v62  ;;  %v4776_v17 = vld [vmem:[%s6389_s16 + $0x20] sm:$0xff]   ;;  %v4777_v24 = vld [vmem:[%s6389_s16 + $0x18] sm:$0xff]  }
0x1268   :  { %v3265_v9 = vadd.f32 1.0, %v4968_v5  ;;  %v3272_v53 = vmul.f32 0.5, %v3264_v2  ;;  %v4778_v5 = vld [vmem:[%s6389_s16 + $0x10] sm:$0xff]  }
0x1269   :  { %v4970_v19 = vpop.eup %4969  ;;  %v3318_v61 = vpack.c.bf16 %v3279_v49, %v3277_v34  ;;  %4380 = vmatpush3.bf16.msra.mxu1 %v4774_v15  ;;  %v4779_v34 = vld [vmem:[%s6389_s16 + $0x8] sm:$0xff]   ;;  %v4780_v49 = vld [vmem:[%s6389_s16] sm:$0xff]  }
0x126a   :  { %v4972_v8 = vpop.eup %4971  ;;  %v3266_v52 = vadd.f32 1.0, %v4970_v19  ;;  %v3273_v22 = vmul.f32 0.5, %v3265_v9  ;;  %v3280_v1 = vmul.f32 %v3272_v53, %v6299_v30  ;;  %4381 = vmatprep.subr.bf16.mxu1 %v4775_v18 }
0x126b   :  { %3457 = vmatprep.mubr.bf16.mxu0 %v3318_v61  ;;  %v3267_v50 = vadd.f32 1.0, %v4972_v8 }
0x126c   :  { %3458 = vmatmul.mubr.bf16.vlgmr.msra.gmra.mxu0 %v3317_v4  ;;  %v3274_v48 = vmul.f32 0.5, %v3266_v52  ;;  %v3281_v13 = vmul.f32 %v3273_v22, %v6305_v6 }
0x126d   :  { %v3275_v12 = vmul.f32 0.5, %v3267_v50  ;;  %4382 = vmatpush3.bf16.msra.mxu1 %v4775_v18 }
0x126e   :  { %v3282_v56 = vmul.f32 %v3274_v48, %v3208_v23  ;;  %4383 = vmatprep.subr.bf16.mxu1 %v4776_v17 }
0x126f   :  { %v3283_v31 = vmul.f32 %v3275_v12, %v3210_v40 }
0x1270   :  { %v3319_v25 = vpack.c.bf16 %v3282_v56, %v3280_v1 }
0x1271   :  { %v3320_v20 = vpack.c.bf16 %v3283_v31, %v3281_v13  ;;  %4384 = vmatpush3.bf16.msra.mxu1 %v4776_v17  ;;  %v3952_v13 = vld [vmem:[%s6387_s14 + $0x1] ss:$0 sm:$0xff] }
0x1272   :  { %4385 = vmatprep.subr.bf16.mxu1 %v4777_v24 }
0x1273   :  { %3465 = vmatprep.mubr.bf16.mxu0 %v3320_v20 }
0x1274   :  { %3466 = vmatmul.mubr.bf16.gmra.mxu0 %v3319_v25  ;;  %v3953_v25 = vld [vmem:[%s6388_s15 + $0x1] ss:$0 sm:$0xff] }
0x1275   :  { %4386 = vmatpush3.bf16.msra.mxu1 %v4777_v24 }
0x1276   :  { %4387 = vmatprep.subr.bf16.mxu1 %v4778_v5 }
0x1279   :  { %4388 = vmatpush3.bf16.msra.mxu1 %v4778_v5 }
0x127a   :  { %4389 = vmatprep.subr.bf16.mxu1 %v4779_v34 }
0x127d   :  { %4390 = vmatpush3.bf16.msra.mxu1 %v4779_v34 }
0x127e   :  { %4391 = vmatprep.subr.bf16.mxu1 %v4780_v49 }
0x1281   :  { %4392 = vmatpush3.bf16.msra.mxu1 %v4780_v49 }
0x132c   :  { %v4123_v27 = vpop.f32.mrf.mxu0 }
0x132e   :  { %v4124_v29 = vpop.f32.mrf.mxu0 }
0x132f   :  { %v4125_v55 = vadd.f32 %v4124_v29, %v4123_v27 }
0x1330   :  { %v4126_v47 = vpop.f32.mrf.mxu0 }
0x1331   :  { %v3460_v28 = vadd.f32 %v4125_v55, %v3933_v26 }
0x1332   :  { %v4127_v14 = vpop.f32.mrf.mxu0 }
0x1333   :  { %v4128_v23 = vadd.f32 %v4127_v14, %v4126_v47  ;;  %v3474_v6 = vadd.f32 %v3460_v28, %v6211_v36 }
0x1334   :  { %v4129_v40 = vpop.f32.mrf.mxu0 }
0x1335   :  { %v3463_v39 = vadd.f32 %v4128_v23, %v3933_v26  ;;  %3482 = vadd.xlane.f32.xlu0 %v3474_v6 }
0x1336   :  { %v4130_v30 = vpop.f32.mrf.mxu0 }
0x1337   :  { %v4131_v33 = vadd.f32 %v4130_v30, %v4129_v40  ;;  %v3475_v57 = vadd.f32 %v3463_v39, %v6213_v10 }
0x1338   :  { %v4132_v42 = vpop.f32.mrf.mxu0 }
0x1339   :  { %v3468_v54 = vadd.f32 %v4131_v33, %v3933_v26  ;;  %3484 = vadd.xlane.f32.xlu1 %v3475_v57 }
0x133a   :  { %v4133_v51 = vpop.f32.mrf.mxu0 }
0x133b   :  { %v4134_v37 = vadd.f32 %v4133_v51, %v4132_v42  ;;  %v3476_v11 = vadd.f32 %v3468_v54, %v6220_v60 }
0x133d   :  { %v3471_v59 = vadd.f32 %v4134_v37, %v3933_v26  ;;  %3486 = vadd.xlane.f32.xlu0 %v3476_v11 }
0x133f   :  { %v3477_v46 = vadd.f32 %v3471_v59, %v6222_v7 }
0x1341   :  { %3488 = vadd.xlane.f32.xlu1 %v3477_v46 }
0x13be   :  { %v3483_v36 = vpop.xlane.xlu0 %3482 }
0x13bf   :  { %v3490_v43 = vmul.f32 0.0078125, %v3483_v36 }
0x13c1   :  { %v3494_v35 = vsub.f32 %v3474_v6, %v3490_v43 }
0x13c2   :  { %v3485_v21 = vpop.xlane.xlu1 %3484 }
0x13c3   :  { %v3491_v58 = vmul.f32 0.0078125, %v3485_v21  ;;  %v3498_v38 = vmul.f32 %v3494_v35, %v3494_v35 }
0x13c5   :  { %v3495_v63 = vsub.f32 %v3475_v57, %v3491_v58  ;;  %3502 = vadd.xlane.f32.xlu0 %v3498_v38  ;;  %v3954_v57 = vld [vmem:[%s6390_s17] ss:$0 sm:$0xff] }
0x13c6   :  { %v3487_v10 = vpop.xlane.xlu0 %3486 }
0x13c7   :  { %v3492_v0 = vmul.f32 0.0078125, %v3487_v10  ;;  %v3499_v16 = vmul.f32 %v3495_v63, %v3495_v63 }
0x13c9   :  { %v3496_v32 = vsub.f32 %v3476_v11, %v3492_v0  ;;  %3504 = vadd.xlane.f32.xlu1 %v3499_v16 }
0x13ca   :  { %v3489_v41 = vpop.xlane.xlu1 %3488 }
0x13cb   :  { %v3493_v60 = vmul.f32 0.0078125, %v3489_v41  ;;  %v3500_v44 = vmul.f32 %v3496_v32, %v3496_v32 }
0x13cd   :  { %v3497_v45 = vsub.f32 %v3477_v46, %v3493_v60  ;;  %3506 = vadd.xlane.f32.xlu0 %v3500_v44 }
0x13cf   :  { %v3501_v7 = vmul.f32 %v3497_v45, %v3497_v45 }
0x13d1   :  { %3508 = vadd.xlane.f32.xlu1 %v3501_v7 }
0x144e   :  { %v3503_v62 = vpop.xlane.xlu0 %3502 }
0x144f   :  { %v3510_v9 = vmul.f32 0.0078125, %v3503_v62 }
0x1451   :  { %v3514_v2 = vadd.f32 1e-12, %v3510_v9 }
0x1452   :  { %v3505_v19 = vpop.xlane.xlu1 %3504 }
0x1453   :  { %4973 = vrsqrt.f32 %v3514_v2  ;;  %v3511_v61 = vmul.f32 0.0078125, %v3505_v19 }
0x1455   :  { %v3515_v8 = vadd.f32 1e-12, %v3511_v61 }
0x1456   :  { %v3507_v4 = vpop.xlane.xlu0 %3506 }
0x1457   :  { %4975 = vrsqrt.f32 %v3515_v8  ;;  %v3512_v52 = vmul.f32 0.0078125, %v3507_v4 }
0x1459   :  { %v3516_v50 = vadd.f32 1e-12, %v3512_v52 }
0x145a   :  { %v3509_v22 = vpop.xlane.xlu1 %3508 }
0x145b   :  { %4977 = vrsqrt.f32 %v3516_v50  ;;  %v3513_v53 = vmul.f32 0.0078125, %v3509_v22 }
0x145d   :  { %v3517_v48 = vadd.f32 1e-12, %v3513_v53 }
0x145f   :  { %4979 = vrsqrt.f32 %v3517_v48 }
0x1460   :  { %v4974_v12 = vpop.eup %4973 }
0x1461   :  { %v3522_v56 = vmul.f32 %v4974_v12, %v3494_v35 }
0x1463   :  { %v3532_v20 = vmul.f32 %v3952_v13, %v3522_v56 }
0x1464   :  { %v4976_v31 = vpop.eup %4975 }
0x1465   :  { %v3523_v1 = vmul.f32 %v4976_v31, %v3495_v63  ;;  %v3542_v55 = vadd.f32 %v3953_v25, %v3532_v20 }
0x1467   :  { %v3533_v27 = vmul.f32 %v3952_v13, %v3523_v1 }
0x1468   :  { %v4978_v26 = vpop.eup %4977 }
0x1469   :  { %v3524_v29 = vmul.f32 %v4978_v26, %v3496_v32  ;;  %v3543_v47 = vadd.f32 %v3953_v25, %v3533_v27 }
0x146b   :  { %v3562_v28 = vpack.c.bf16 %v3543_v47, %v3542_v55  ;;  %v3534_v6 = vmul.f32 %v3952_v13, %v3524_v29 }
0x146c   :  { %v4980_v14 = vpop.eup %4979 }
0x146d   :  { %v3525_v23 = vmul.f32 %v4980_v14, %v3497_v45  ;;  %4393 = vmatprep.mubr.bf16.mxu1 %v3562_v28  ;;  %v3544_v39 = vadd.f32 %v3953_v25, %v3534_v6 }
0x146f   :  { %v3535_v40 = vmul.f32 %v3952_v13, %v3525_v23 }
0x1471   :  { %v3545_v30 = vadd.f32 %v3953_v25, %v3535_v40 }
0x1473   :  { %v3563_v33 = vpack.c.bf16 %v3545_v30, %v3544_v39 }
0x1475   :  { %4394 = vmatmul.mubr.bf16.vlgmr.msra.gmra.mxu1 %v3563_v33 }
0x1535   :  { %v4395_v42 = vpop.f32.mrf.mxu1 }
0x1536   :  { %v3662_v54 = vadd.f32 %v4395_v42, %v3954_v57 }
0x1537   :  { %v3653_v51 = vpop.f32.mrf.mxu1 }
0x1538   :  { %3670 = vst [vmem:[%s6391_s18 + $0x10] sm:$0xff] %v3662_v54  ;;  %v3654_v37 = vadd.f32 %v3954_v57, %v3653_v51 }
0x1539   :  { %v4396_v11 = vpop.f32.mrf.mxu1 }
0x153a   :  { %3668 = vst [vmem:[%s6391_s18] sm:$0xff] %v3654_v37  ;;  %v3665_v59 = vadd.f32 %v4396_v11, %v3954_v57 }
0x153b   :  { %v3656_v46 = vpop.f32.mrf.mxu1 }
0x153c   :  { %3671 = vst [vmem:[%s6391_s18 + $0x18] sm:$0xff] %v3665_v59  ;;  %v3657_v36 = vadd.f32 %v3954_v57, %v3656_v46 }
0x153e   :  { %3669 = vst [vmem:[%s6391_s18 + $0x8] sm:$0xff] %v3657_v36 }

</bundles_post_ra>
